<compile_context>
chip_gen: v5e
topology: v5e:2x2
jax: 0.10.0
libtpu: 0.0.40
codegen_flags: <defaults>
</compile_context>

<pallas_src>
import functools

import jax
import jax.numpy as jnp
from jax import lax
from jax.experimental import pallas as pl
from jax.experimental.pallas import tpu as pltpu

F32 = jnp.float32
BF16 = jnp.bfloat16

_COMPILER_PARAMS = pltpu.CompilerParams(
    dimension_semantics=("parallel",),
    vmem_limit_bytes=48 * 1024 * 1024,
)


# ---------------------------------------------------------------------------
# BlockSpec / shift helpers
# ---------------------------------------------------------------------------
def _batch_spec(T, C):
    """Per-batch-element block: (B, T, C) array -> (T, C) view."""
    return pl.BlockSpec((None, T, C), lambda i: (i, 0, 0))


def _bcast_spec(arr):
    """Whole-array block shared by every grid step (weights)."""
    n = arr.ndim
    return pl.BlockSpec(arr.shape, lambda i, n=n: (0,) * n)


def _row_masks(T, shifts):
    """Validity masks (T,1): after a sublane roll by -s, row t holds x[t+s];
    it is wrapped garbage unless 0 <= t+s < T."""
    t = lax.broadcasted_iota(jnp.int32, (T, 1), 0)
    return {s: ((t + s >= 0) & (t + s < T)).astype(F32)
            for s in set(shifts) if s != 0}


def _shift(x, s, rm, T):
    """x[t] -> x[t+s] with zero fill.  pltpu.roll follows np.roll semantics
    (out[i] = x[(i - shift) % T]), so shift = (-s) % T; wrapped rows zeroed."""
    if s == 0:
        return x
    return pltpu.roll(x, (-s) % T, 0) * rm[s]


# ---------------------------------------------------------------------------
# Kernel A: enc_conv + cond_layer_e + enc_wn + mask + latent_enc_prj
#           + reparameterize + latent_dec_prj  (all on-chip)
# ---------------------------------------------------------------------------
def _enc_latent_kernel(mel_ref, ht_ref, mask_ref, eps_ref,
                       encw_ref, condw_ref, win_ref, wrs_ref, lbias_ref,
                       eprj_ref, dprj_ref, bmisc_ref,
                       zl_ref, dec_ref, *, T, K, P, H, E, L):
    shifts = [k - P for k in range(K)]
    rm = _row_masks(T, shifts)
    mask = mask_ref[...].astype(F32)                     # (T, 1) mel_mask_conv
    bm = bmisc_ref[...]                                  # (1, H + 2L + H)

    # Shifted h_text taps shared by every enc_wn layer (cond_layer_e fused).
    ht = ht_ref[...].astype(F32)
    ht_taps = [_shift(ht, s, rm, T).astype(BF16) for s in shifts]

    # enc_conv: K accumulated MXU matmuls on shift-adjusted mel.
    mel = mel_ref[...].astype(F32)
    x = bm[:, :H]
    for k, s in enumerate(shifts):
        x = x + jnp.dot(_shift(mel, s, rm, T).astype(BF16), encw_ref[k],
                        preferred_element_type=F32)

    # enc_wn (x_mask=None); last layer's res half is zero-padded host-side.
    def layer(l, carry):
        xc, skip = carry
        lb = lbias_ref[l]                                # (1, 4H) = [in+cond | res_skip] bias
        a = lb[:, :2 * H]
        for k, s in enumerate(shifts):
            a = a + jnp.dot(_shift(xc, s, rm, T).astype(BF16), win_ref[l * K + k],
                            preferred_element_type=F32)
            a = a + jnp.dot(ht_taps[k], condw_ref[l * K + k],
                            preferred_element_type=F32)
        acts = jnp.tanh(a[:, :H]) * jax.nn.sigmoid(a[:, H:])
        # TODO(synk): nn.Dropout(p_dropout=0) is identity; omitted.
        rs = jnp.dot(acts.astype(BF16), wrs_ref[l],
                     preferred_element_type=F32) + lb[:, 2 * H:]
        return xc + rs[:, :H], skip + rs[:, H:]

    _, skip = lax.fori_loop(0, E, layer, (x, jnp.zeros((T, H), F32)))

    h = skip * mask                                      # enc_wn(...) * mel_mask_conv
    stats = jnp.dot(h.astype(BF16), eprj_ref[...],
                    preferred_element_type=F32) + bm[:, H:H + 2 * L]
    m = stats[:, :L] * mask
    logs = stats[:, L:] * mask
    # TODO(synk): reparameterize follows the PortaSpeech logvar convention
    # mu + eps*exp(0.5*logvar); verify against the checkpoint convention.
    z = (m + eps_ref[...].astype(F32) * jnp.exp(0.5 * logs)) * mask
    zl_ref[...] = jnp.concatenate([z, logs], axis=-1).astype(zl_ref.dtype)
    dec_ref[...] = (jnp.dot(z.astype(BF16), dprj_ref[...],
                            preferred_element_type=F32)
                    + bm[:, H + 2 * L:]).astype(dec_ref.dtype)


def enc_latent(mel, h_text, mask, eps, w, cfg):
    B, T, n_mel = mel.shape
    K, H = cfg["conv_kernel_size"], cfg["enc_dec_hidden"]
    E, L = cfg["encoder_layer"], cfg["latent_hidden"]
    P = (K - 1) // 2
    d_model = h_text.shape[-1]
    kernel = functools.partial(_enc_latent_kernel, T=T, K=K, P=P, H=H, E=E, L=L)
    weights = (w["enc_w"], w["cond_w"], w["w_in"], w["w_rs"], w["lbias"],
               w["eprj_w"], w["dprj_w"], w["bmisc"])
    outs = (jax.ShapeDtypeStruct((B, T, 2 * L), mel.dtype),
            jax.ShapeDtypeStruct((B, T, H), mel.dtype))
    return pl.pallas_call(
        kernel, out_shape=outs, grid=(B,),
        in_specs=[_batch_spec(T, n_mel), _batch_spec(T, d_model),
                  _batch_spec(T, 1), _batch_spec(T, L)]
                 + [_bcast_spec(a) for a in weights],
        out_specs=(_batch_spec(T, 2 * L), _batch_spec(T, H)),
        compiler_params=_COMPILER_PARAMS,
    )(mel, h_text, mask, eps, *weights)


# ---------------------------------------------------------------------------
# Kernel B: cond_layer_f + VPFlow (Flip folded into weights host-side)
# ---------------------------------------------------------------------------
def _flow_kernel(zl_ref, ht_ref, mask_ref,
                 condfw_ref, prew_ref, postw_ref, fbias_ref,
                 cndw_ref, win_ref, wrs_ref, lbias_ref, condfb_ref,
                 out_ref, *, T, K, P, FH, FL, NF, HALF):
    shifts = [k - P for k in range(K)]
    rm = _row_masks(T, shifts)
    mask = mask_ref[...].astype(F32)
    maskF = jnp.broadcast_to(mask, (T, FH))              # hoisted broadcasts
    maskH = jnp.broadcast_to(mask, (T, HALF))

    # cond_layer_f(h_text): K-tap conv, shared by all couplings.
    ht = ht_ref[...].astype(F32)
    hf = condfb_ref[...]
    for k, s in enumerate(shifts):
        hf = hf + jnp.dot(_shift(ht, s, rm, T).astype(BF16), condfw_ref[k],
                          preferred_element_type=F32)
    hf_bf = hf.astype(BF16)

    zl = zl_ref[...].astype(F32)                         # [z_q | logs_q]; use z_q
    x0 = zl[:, :HALF]
    x1 = zl[:, HALF:2 * HALF]

    # Flip() is folded into pre/post weights host-side (odd couplings are
    # conjugated by the channel reversal); the loop only alternates halves.
    for f in range(NF):
        src = x0 if f % 2 == 0 else x1
        fb = fbias_ref[f]                                # (1, FH + HALF)
        h = (jnp.dot(src.astype(BF16), prew_ref[f], preferred_element_type=F32)
             + fb[:, :FH]) * maskF

        def layer(l, carry, f=f):
            xc, skip = carry
            idx = f * FL + l
            lb = lbias_ref[idx]                          # (1, 4FH)
            a = lb[:, :2 * FH] + jnp.dot(hf_bf, cndw_ref[idx],
                                         preferred_element_type=F32)
            for k, s in enumerate(shifts):
                a = a + jnp.dot(_shift(xc, s, rm, T).astype(BF16),
                                win_ref[idx * K + k], preferred_element_type=F32)
            acts = jnp.tanh(a[:, :FH]) * jax.nn.sigmoid(a[:, FH:])
            rs = jnp.dot(acts.astype(BF16), wrs_ref[idx],
                         preferred_element_type=F32) + lb[:, 2 * FH:]
            return (xc + rs[:, :FH]) * maskF, skip + rs[:, FH:]

        _, skip = lax.fori_loop(0, FL, layer, (h, jnp.zeros((T, FH), F32)))
        m = (jnp.dot((skip * maskF).astype(BF16), postw_ref[f],
                     preferred_element_type=F32) + fb[:, FH:]) * maskH
        if f % 2 == 0:                                   # mean_only => exp(logs)==1
            x1 = m + x1 * maskH
        else:
            x0 = m + x0 * maskH

    out_ref[...] = jnp.concatenate([x0, x1], axis=-1).astype(out_ref.dtype)


def flows(zl, h_text, mask, w, cfg):
    B, T, _ = zl.shape
    K, FH = cfg["flow_kernel"], cfg["flow_hidden"]
    FL, NF, L = cfg["flow_layer"], cfg["n_flows"], cfg["latent_hidden"]
    HALF = L // 2
    P = (K - 1) // 2
    d_model = h_text.shape[-1]
    kernel = functools.partial(_flow_kernel, T=T, K=K, P=P, FH=FH, FL=FL,
                               NF=NF, HALF=HALF)
    weights = (w["condf_w"], w["pre_w"], w["post_w"], w["fbias"],
               w["cnd_w"], w["w_in"], w["w_rs"], w["lbias"], w["condf_b"])
    z_p = pl.pallas_call(
        kernel, out_shape=jax.ShapeDtypeStruct((B, T, L), zl.dtype), grid=(B,),
        in_specs=[_batch_spec(T, zl.shape[-1]), _batch_spec(T, d_model),
                  _batch_spec(T, 1)] + [_bcast_spec(a) for a in weights],
        out_specs=_batch_spec(T, L),
        compiler_params=_COMPILER_PARAMS,
    )(zl, h_text, mask, *weights)
    if NF % 2 == 1:                 # trailing Flip left over from the folding
        z_p = jnp.flip(z_p, axis=-1)
    return z_p


# ---------------------------------------------------------------------------
# Kernel C: cond_layer_d + dec_wn + mask + dec_conv (transpose-conv as conv,
#           trim fused) + mask + residual LinearNorm
# ---------------------------------------------------------------------------
def _dec_out_kernel(x_ref, ht_ref, mask_ref,
                    condw_ref, win_ref, wrs_ref, lbias_ref,
                    dconvw_ref, resw_ref, bmisc_ref,
                    mel_ref, resid_ref, *, T, K, P, PDEC, H, D, NMEL):
    shifts = [k - P for k in range(K)]
    shifts_dc = [k - PDEC for k in range(K)]
    rm = _row_masks(T, shifts + shifts_dc)
    mask = mask_ref[...].astype(F32)
    bm = bmisc_ref[...]                                  # (1, n_mel + d_model)

    ht = ht_ref[...].astype(F32)
    ht_taps = [_shift(ht, s, rm, T).astype(BF16) for s in shifts]

    x = x_ref[...].astype(F32)

    def layer(l, carry):
        xc, skip = carry
        lb = lbias_ref[l]
        a = lb[:, :2 * H]
        for k, s in enumerate(shifts):
            a = a + jnp.dot(_shift(xc, s, rm, T).astype(BF16), win_ref[l * K + k],
                            preferred_element_type=F32)
            a = a + jnp.dot(ht_taps[k], condw_ref[l * K + k],
                            preferred_element_type=F32)
        acts = jnp.tanh(a[:, :H]) * jax.nn.sigmoid(a[:, H:])
        rs = jnp.dot(acts.astype(BF16), wrs_ref[l],
                     preferred_element_type=F32) + lb[:, 2 * H:]
        return xc + rs[:, :H], skip + rs[:, H:]

    _, skip = lax.fori_loop(0, D, layer, (x, jnp.zeros((T, H), F32)))
    y = skip * mask                                      # dec_wn(...) * mel_mask_conv

    # dec_conv: ConvTranspose1d(stride=1, padding=p) == Conv1d(padding=K-1-p);
    # computing rows 0..T-1 only == trim_output(x, max_len).
    mel_res = bm[:, :NMEL]
    for k, s in enumerate(shifts_dc):
        mel_res = mel_res + jnp.dot(_shift(y, s, rm, T).astype(BF16), dconvw_ref[k],
                                    preferred_element_type=F32)
    mel_res = mel_res * mask
    mel_ref[...] = mel_res.astype(mel_ref.dtype)
    resid_ref[...] = ((jnp.dot(mel_res.astype(BF16), resw_ref[...],
                               preferred_element_type=F32)
                       + bm[:, NMEL:]) * mask).astype(resid_ref.dtype)


def dec_out(x, h_text, mask, w, cfg):
    B, T, H = x.shape
    K, pad = cfg["conv_kernel_size"], cfg["padding"]
    D, n_mel, d_model = cfg["decoder_layer"], cfg["n_mel"], cfg["d_model"]
    P = (K - 1) // 2
    PDEC = K - 1 - pad
    kernel = functools.partial(_dec_out_kernel, T=T, K=K, P=P, PDEC=PDEC,
                               H=H, D=D, NMEL=n_mel)
    weights = (w["cond_w"], w["w_in"], w["w_rs"], w["lbias"],
               w["dconv_w"], w["res_w"], w["bmisc"])
    outs = (jax.ShapeDtypeStruct((B, T, n_mel), x.dtype),
            jax.ShapeDtypeStruct((B, T, d_model), x.dtype))
    return pl.pallas_call(
        kernel, out_shape=outs, grid=(B,),
        in_specs=[_batch_spec(T, H), _batch_spec(T, h_text.shape[-1]),
                  _batch_spec(T, 1)] + [_bcast_spec(a) for a in weights],
        out_specs=(_batch_spec(T, n_mel), _batch_spec(T, d_model)),
        compiler_params=_COMPILER_PARAMS,
    )(x, h_text, mask, *weights)


# ---------------------------------------------------------------------------
# VariationalGenerator.forward
# ---------------------------------------------------------------------------
def variational_generator_forward(pp, mel, mel_len, mel_mask, h_text, eps, cfg):
    """Channels-last forward.  Returned z_p / logs_q / mel_mask_conv are
    [B, T, C] (the torch reference returns them as [B, C, T])."""
    del mel_len  # stride == 1 => pad_input is a no-op and get_conv_mask == mel_mask
    # TODO(synk): the stride>1 branches of pad_input/get_conv_mask are host-side
    # Python in the reference and unreachable for conv_stride_size == 1.
    assert cfg["conv_stride_size"] == 1
    L = cfg["latent_hidden"]
    mask = mel_mask[..., None].astype(mel.dtype)         # mel_mask_conv [B, T, 1]

    zl, dec_in = enc_latent(mel, h_text, mask, eps, pp["enc"], cfg)
    z_p = flows(zl, h_text, mask, pp["flow"], cfg)
    mel_res, residual = dec_out(dec_in, h_text, mask, pp["dec"], cfg)

    logs_q = zl[..., L:]
    return mel_res, residual, (z_p, logs_q, mask)


# ---------------------------------------------------------------------------
# Host-side parameter preparation (stacking / folding / bf16 casting)
# ---------------------------------------------------------------------------
def _wn_stack(layers, hid):
    """Stack WN per-layer weights.  The last layer's res/skip conv (out=hid) is
    zero-padded to 2*hid (real weights in the skip half) so the layer loop is
    uniform.  Returns (w_in (nl*K, hid, 2hid) bf16, w_rs (nl, hid, 2hid) bf16,
    b_in (nl, 2hid) f32, b_rs (nl, 2hid) f32)."""
    nl = len(layers)
    w_in, w_rs, b_in, b_rs = [], [], [], []
    for l, (wi, bi, wr, br) in enumerate(layers):
        for k in range(wi.shape[0]):
            w_in.append(wi[k])
        wr0 = wr[0]
        if l == nl - 1:
            wr0 = jnp.concatenate([jnp.zeros((hid, hid), wr0.dtype), wr0], axis=1)
            br = jnp.concatenate([jnp.zeros((hid,), br.dtype), br])
        w_rs.append(wr0)
        b_in.append(bi)
        b_rs.append(br)
    return (jnp.stack(w_in).astype(BF16), jnp.stack(w_rs).astype(BF16),
            jnp.stack(b_in), jnp.stack(b_rs))


def _cond_conv_stack(cond_w, cond_b, nl, hid):
    """Split a fused cond conv (K, cin, 2*hid*nl) into per-layer/tap slabs
    (nl*K, cin, 2hid) bf16 and per-layer biases (nl, 2hid) f32."""
    K = cond_w.shape[0]
    cw = [cond_w[k, :, l * 2 * hid:(l + 1) * 2 * hid]
          for l in range(nl) for k in range(K)]
    cb = [cond_b[l * 2 * hid:(l + 1) * 2 * hid] for l in range(nl)]
    return jnp.stack(cw).astype(BF16), jnp.stack(cb)


def prepare_params(p, cfg):
    H, L = cfg["enc_dec_hidden"], cfg["latent_hidden"]
    E, D = cfg["encoder_layer"], cfg["decoder_layer"]
    FH, FL, NF = cfg["flow_hidden"], cfg["flow_layer"], cfg["n_flows"]

    pp = {}

    # --- kernel A: enc_conv + cond_layer_e + enc_wn + projections -----------
    w_in, w_rs, b_in, b_rs = _wn_stack(p["enc_wn"], H)
    cond_w, cond_b = _cond_conv_stack(p["cond_e_w"], p["cond_e_b"], E, H)
    pp["enc"] = dict(
        enc_w=p["enc_conv_w"].astype(BF16),
        cond_w=cond_w, w_in=w_in, w_rs=w_rs,
        lbias=jnp.concatenate([cond_b + b_in, b_rs], axis=-1)[:, None, :],
        eprj_w=p["latent_enc_w"][0].astype(BF16),
        dprj_w=p["latent_dec_w"][0].astype(BF16),
        bmisc=jnp.concatenate([p["enc_conv_b"], p["latent_enc_b"],
                               p["latent_dec_b"]])[None, :],
    )

    # --- kernel B: cond_layer_f + VPFlow (Flip folded into weights) ---------
    pre_w, post_w, fbias, cnd_w, f_win, f_wrs, f_lbias = [], [], [], [], [], [], []
    for f, cp in enumerate(p["flow"]):
        wi, wr, bi, br = _wn_stack(cp["wn"], FH)
        cw, cb = _cond_conv_stack(cp["cond_w"], cp["cond_b"], FL, FH)
        pw = cp["pre_w"][0]
        qw, qb = cp["post_w"][0], cp["post_b"]
        if f % 2 == 1:           # conjugate odd couplings by the channel flip
            pw = pw[::-1, :]
            qw = qw[:, ::-1]
            qb = qb[::-1]
        pre_w.append(pw)
        post_w.append(qw)
        fbias.append(jnp.concatenate([cp["pre_b"], qb]))
        cnd_w.append(cw)
        f_win.append(wi)
        f_wrs.append(wr)
        f_lbias.append(jnp.concatenate([cb + bi, br], axis=-1))
    pp["flow"] = dict(
        condf_w=p["cond_f_w"].astype(BF16), condf_b=p["cond_f_b"][None, :],
        pre_w=jnp.stack(pre_w).astype(BF16),          # (NF, HALF, FH)
        post_w=jnp.stack(post_w).astype(BF16),        # (NF, FH, HALF)
        fbias=jnp.stack(fbias)[:, None, :],           # (NF, 1, FH+HALF)
        cnd_w=jnp.concatenate(cnd_w),                 # (NF*FL, H, 2FH)
        w_in=jnp.concatenate(f_win),                  # (NF*FL*K, FH, 2FH)
        w_rs=jnp.concatenate(f_wrs),                  # (NF*FL, FH, 2FH)
        lbias=jnp.concatenate(f_lbias)[:, None, :],   # (NF*FL, 1, 4FH)
    )

    # --- kernel C: cond_layer_d + dec_wn + dec_conv + residual_layer --------
    w_in, w_rs, b_in, b_rs = _wn_stack(p["dec_wn"], H)
    cond_w, cond_b = _cond_conv_stack(p["cond_d_w"], p["cond_d_b"], D, H)
    # TODO(synk): real PyTorch ConvTranspose1d weights must be K-flipped with
    # in/out channels swapped; the synthetic init is already in conv layout.
    pp["dec"] = dict(
        cond_w=cond_w, w_in=w_in, w_rs=w_rs,
        lbias=jnp.concatenate([cond_b + b_in, b_rs], axis=-1)[:, None, :],
        dconv_w=p["dec_conv_w"].astype(BF16),
        res_w=p["res_w"][0].astype(BF16),
        bmisc=jnp.concatenate([p["dec_conv_b"], p["res_b"]])[None, :],
    )
    return pp


# ---------------------------------------------------------------------------
# Deterministic synthetic parameter init (shapes per the reference __init__)
# ---------------------------------------------------------------------------
class KeyGen:
    def __init__(self, key):
        self.key = key

    def __call__(self):
        self.key, sub = jax.random.split(self.key)
        return sub


def w_init(kg, shape):
    return 0.1 * jax.random.normal(kg(), shape, jnp.float32)


def b_init(kg, shape):
    return 0.01 * jax.random.normal(kg(), shape, jnp.float32)


def init_wn(kg, H, K, n_layers):
    layers = []
    for i in range(n_layers):
        out_rs = 2 * H if i < n_layers - 1 else H
        layers.append((w_init(kg, (K, H, 2 * H)), b_init(kg, (2 * H,)),
                       w_init(kg, (1, H, out_rs)), b_init(kg, (out_rs,))))
    return layers


def init_coupling(kg, L, fH, fK, fL, gin):
    half = L // 2
    return dict(
        pre_w=w_init(kg, (1, half, fH)), pre_b=b_init(kg, (fH,)),
        cond_w=w_init(kg, (1, gin, 2 * fH * fL)), cond_b=b_init(kg, (2 * fH * fL,)),
        wn=init_wn(kg, fH, fK, fL),
        post_w=jnp.zeros((1, fH, half), jnp.float32),  # zeroed in reference __init__
        post_b=jnp.zeros((half,), jnp.float32),
    )


def init_params(kg, cfg):
    K = cfg["conv_kernel_size"]
    n_mel, d_model = cfg["n_mel"], cfg["d_model"]
    H, L = cfg["enc_dec_hidden"], cfg["latent_hidden"]
    p = {}
    p["enc_conv_w"], p["enc_conv_b"] = w_init(kg, (K, n_mel, H)), b_init(kg, (H,))
    p["cond_e_w"] = w_init(kg, (K, d_model, 2 * H * cfg["encoder_layer"]))
    p["cond_e_b"] = b_init(kg, (2 * H * cfg["encoder_layer"],))
    p["cond_f_w"], p["cond_f_b"] = w_init(kg, (K, d_model, H)), b_init(kg, (H,))
    p["cond_d_w"] = w_init(kg, (K, d_model, 2 * H * cfg["decoder_layer"]))
    p["cond_d_b"] = b_init(kg, (2 * H * cfg["decoder_layer"],))
    p["enc_wn"] = init_wn(kg, H, K, cfg["encoder_layer"])
    p["latent_enc_w"], p["latent_enc_b"] = w_init(kg, (1, H, 2 * L)), b_init(kg, (2 * L,))
    p["latent_dec_w"], p["latent_dec_b"] = w_init(kg, (1, L, H)), b_init(kg, (H,))
    p["dec_wn"] = init_wn(kg, H, K, cfg["decoder_layer"])
    p["dec_conv_w"], p["dec_conv_b"] = w_init(kg, (K, H, n_mel)), b_init(kg, (n_mel,))
    p["res_w"], p["res_b"] = w_init(kg, (1, n_mel, d_model)), b_init(kg, (d_model,))
    p["flow"] = [init_coupling(kg, L, cfg["flow_hidden"], cfg["flow_kernel"],
                               cfg["flow_layer"], d_model)
                 for _ in range(cfg["n_flows"])]
    return p


if __name__ == "__main__":
    B, T = 2, 16
    cfg = dict(n_mel=8, d_model=16, enc_dec_hidden=16, encoder_layer=2,
               decoder_layer=2, conv_kernel_size=3, conv_stride_size=1,
               padding=1,                                 # (kernel - stride) // 2
               latent_hidden=8, flow_layer=2, flow_hidden=16, flow_kernel=3,
               n_flows=4)
    # flow gin_channels == d_model must equal cond_layer_f out channels
    assert cfg["d_model"] == cfg["enc_dec_hidden"]

    kg = KeyGen(jax.random.PRNGKey(0))
    raw_params = init_params(kg, cfg)
    params = prepare_params(raw_params, cfg)

    mel = jax.random.normal(kg(), (B, T, cfg["n_mel"]), jnp.float32)
    h_text = jax.random.normal(kg(), (B, T, cfg["d_model"]), jnp.float32)
    mel_len = jnp.array([T, T - 3], jnp.int32)            # max == T (stride-1 branch)
    mel_mask = (jnp.arange(T)[None, :] < mel_len[:, None]).astype(jnp.float32)
    eps = jax.random.normal(kg(), (B, T, cfg["latent_hidden"]), jnp.float32)

    fwd = jax.jit(functools.partial(variational_generator_forward, cfg=cfg))
    out = fwd(params, mel, mel_len, mel_mask, h_text, eps)
    jax.block_until_ready(out)

    mel_res, residual, (z_p, logs_q, mel_mask_conv) = out
    assert mel_res.shape == (B, T, cfg["n_mel"])
    assert residual.shape == (B, T, cfg["d_model"])
    assert z_p.shape == (B, T, cfg["latent_hidden"])
    assert logs_q.shape == (B, T, cfg["latent_hidden"])
    assert mel_mask_conv.shape == (B, T, 1)
    assert all(bool(jnp.all(jnp.isfinite(a))) for a in (mel_res, residual, z_p, logs_q))
    print("KERNEL_OK")
</pallas_src>

<mosaic_0001>
module attributes {stable_mosaic.version = 11 : i64} {
  func.func @_enc_latent_kernel(%arg0: i32, %arg1: memref<1x16x8xf32, #tpu.memory_space<vmem>>, %arg2: memref<1x16x16xf32, #tpu.memory_space<vmem>>, %arg3: memref<1x16x1xf32, #tpu.memory_space<vmem>>, %arg4: memref<1x16x8xf32, #tpu.memory_space<vmem>>, %arg5: memref<3x8x16xbf16, #tpu.memory_space<vmem>>, %arg6: memref<6x16x32xbf16, #tpu.memory_space<vmem>>, %arg7: memref<6x16x32xbf16, #tpu.memory_space<vmem>>, %arg8: memref<2x16x32xbf16, #tpu.memory_space<vmem>>, %arg9: memref<2x1x64xf32, #tpu.memory_space<vmem>>, %arg10: memref<16x16xbf16, #tpu.memory_space<vmem>>, %arg11: memref<8x16xbf16, #tpu.memory_space<vmem>>, %arg12: memref<1x48xf32, #tpu.memory_space<vmem>>, %arg13: memref<1x16x16xf32, #tpu.memory_space<vmem>>, %arg14: memref<1x16x16xf32, #tpu.memory_space<vmem>>) attributes {dimension_semantics = [#tpu.dimension_semantics<parallel>], iteration_bounds = array<i64: 2>, scalar_prefetch = 0 : i64, scratch_operands = 0 : i64, tpu.core_type = #tpu.core_type<tc>, window_params = [{transform_indices = @transform_0, window_bounds = array<i64: 1, 16, 8>}, {transform_indices = @transform_1, window_bounds = array<i64: 1, 16, 16>}, {transform_indices = @transform_2, window_bounds = array<i64: 1, 16, 1>}, {transform_indices = @transform_3, window_bounds = array<i64: 1, 16, 8>}, {pipeline_mode = #tpu.pipeline_mode<synchronous>, transform_indices = @transform_4, window_bounds = array<i64: 3, 8, 16>}, {pipeline_mode = #tpu.pipeline_mode<synchronous>, transform_indices = @transform_5, window_bounds = array<i64: 6, 16, 32>}, {pipeline_mode = #tpu.pipeline_mode<synchronous>, transform_indices = @transform_6, window_bounds = array<i64: 6, 16, 32>}, {pipeline_mode = #tpu.pipeline_mode<synchronous>, transform_indices = @transform_7, window_bounds = array<i64: 2, 16, 32>}, {pipeline_mode = #tpu.pipeline_mode<synchronous>, transform_indices = @transform_8, window_bounds = array<i64: 2, 1, 64>}, {pipeline_mode = #tpu.pipeline_mode<synchronous>, transform_indices = @transform_9, window_bounds = array<i64: 16, 16>}, {pipeline_mode = #tpu.pipeline_mode<synchronous>, transform_indices = @transform_10, window_bounds = array<i64: 8, 16>}, {pipeline_mode = #tpu.pipeline_mode<synchronous>, transform_indices = @transform_11, window_bounds = array<i64: 1, 48>}, {transform_indices = @transform_12, window_bounds = array<i64: 1, 16, 16>}, {transform_indices = @transform_13, window_bounds = array<i64: 1, 16, 16>}]} {
    %0 = tpu.iota {dimensions = array<i32: 0>} : vector<16x1xi32>
    %c1_i32 = arith.constant 1 : i32
    %1 = vector.broadcast %c1_i32 : i32 to vector<16x1xi32>
    %2 = arith.addi %0, %1 : vector<16x1xi32>
    %c0_i32 = arith.constant 0 : i32
    %3 = vector.broadcast %c0_i32 : i32 to vector<16x1xi32>
    %4 = arith.cmpi sge, %2, %3 : vector<16x1xi32>
    %c1_i32_0 = arith.constant 1 : i32
    %5 = vector.broadcast %c1_i32_0 : i32 to vector<16x1xi32>
    %6 = arith.addi %0, %5 : vector<16x1xi32>
    %c16_i32 = arith.constant 16 : i32
    %7 = vector.broadcast %c16_i32 : i32 to vector<16x1xi32>
    %8 = arith.cmpi slt, %6, %7 : vector<16x1xi32>
    %9 = arith.andi %4, %8 : vector<16x1xi1>
    %10 = arith.extui %9 : vector<16x1xi1> to vector<16x1xi32>
    %11 = arith.sitofp %10 : vector<16x1xi32> to vector<16x1xf32>
    %c-1_i32 = arith.constant -1 : i32
    %12 = vector.broadcast %c-1_i32 : i32 to vector<16x1xi32>
    %13 = arith.addi %0, %12 : vector<16x1xi32>
    %c0_i32_1 = arith.constant 0 : i32
    %14 = vector.broadcast %c0_i32_1 : i32 to vector<16x1xi32>
    %15 = arith.cmpi sge, %13, %14 : vector<16x1xi32>
    %c-1_i32_2 = arith.constant -1 : i32
    %16 = vector.broadcast %c-1_i32_2 : i32 to vector<16x1xi32>
    %17 = arith.addi %0, %16 : vector<16x1xi32>
    %c16_i32_3 = arith.constant 16 : i32
    %18 = vector.broadcast %c16_i32_3 : i32 to vector<16x1xi32>
    %19 = arith.cmpi slt, %17, %18 : vector<16x1xi32>
    %20 = arith.andi %15, %19 : vector<16x1xi1>
    %21 = arith.extui %20 : vector<16x1xi1> to vector<16x1xi32>
    %22 = arith.sitofp %21 : vector<16x1xi32> to vector<16x1xf32>
    %c0 = arith.constant 0 : index
    %c0_4 = arith.constant 0 : index
    %c0_5 = arith.constant 0 : index
    %23 = vector.load %arg3[%c0, %c0_4, %c0_5] : memref<1x16x1xf32, #tpu.memory_space<vmem>>, vector<1x16x1xf32>
    %24 = vector.shape_cast %23 : vector<1x16x1xf32> to vector<16x1xf32>
    %c0_6 = arith.constant 0 : index
    %c0_7 = arith.constant 0 : index
    %25 = vector.load %arg12[%c0_6, %c0_7] : memref<1x48xf32, #tpu.memory_space<vmem>>, vector<1x48xf32>
    %c0_8 = arith.constant 0 : index
    %c0_9 = arith.constant 0 : index
    %c0_10 = arith.constant 0 : index
    %26 = vector.load %arg2[%c0_8, %c0_9, %c0_10] : memref<1x16x16xf32, #tpu.memory_space<vmem>>, vector<1x16x16xf32>
    %27 = vector.shape_cast %26 : vector<1x16x16xf32> to vector<16x16xf32>
    %c1_i32_11 = arith.constant 1 : i32
    %28 = tpu.dynamic_rotate %27 by %c1_i32_11 dim 0 : vector<16x16xf32>, i32 -> vector<16x16xf32>
    %29 = vector.broadcast %22 : vector<16x1xf32> to vector<16x16xf32>
    %30 = arith.mulf %28, %29 : vector<16x16xf32>
    %31 = arith.truncf %30 : vector<16x16xf32> to vector<16x16xbf16>
    %32 = arith.truncf %27 : vector<16x16xf32> to vector<16x16xbf16>
    %c15_i32 = arith.constant 15 : i32
    %33 = tpu.dynamic_rotate %27 by %c15_i32 dim 0 : vector<16x16xf32>, i32 -> vector<16x16xf32>
    %34 = vector.broadcast %11 : vector<16x1xf32> to vector<16x16xf32>
    %35 = arith.mulf %33, %34 : vector<16x16xf32>
    %36 = arith.truncf %35 : vector<16x16xf32> to vector<16x16xbf16>
    %c0_12 = arith.constant 0 : index
    %c0_13 = arith.constant 0 : index
    %c0_14 = arith.constant 0 : index
    %37 = vector.load %arg1[%c0_12, %c0_13, %c0_14] : memref<1x16x8xf32, #tpu.memory_space<vmem>>, vector<1x16x8xf32>
    %38 = vector.shape_cast %37 : vector<1x16x8xf32> to vector<16x8xf32>
    %39 = vector.extract_strided_slice %25 {offsets = [0, 0], sizes = [1, 16], strides = [1, 1]} : vector<1x48xf32> to vector<1x16xf32>
    %c1_i32_15 = arith.constant 1 : i32
    %40 = tpu.dynamic_rotate %38 by %c1_i32_15 dim 0 : vector<16x8xf32>, i32 -> vector<16x8xf32>
    %41 = vector.broadcast %22 : vector<16x1xf32> to vector<16x8xf32>
    %42 = arith.mulf %40, %41 : vector<16x8xf32>
    %43 = arith.truncf %42 : vector<16x8xf32> to vector<16x8xbf16>
    %c0_16 = arith.constant 0 : index
    %c0_17 = arith.constant 0 : index
    %c0_18 = arith.constant 0 : index
    %44 = vector.load %arg5[%c0_16, %c0_17, %c0_18] : memref<3x8x16xbf16, #tpu.memory_space<vmem>>, vector<1x8x16xbf16>
    %45 = vector.shape_cast %44 : vector<1x8x16xbf16> to vector<8x16xbf16>
    %cst = arith.constant dense<0.000000e+00> : vector<16x16xf32>
    %46 = tpu.matmul %43, %45, %cst {dimension_numbers = #tpu.dot_dimension_numbers<[1], [0], [0], [1], [0, 0, 1, 1], [], []>} : vector<16x8xbf16>, vector<8x16xbf16>, vector<16x16xf32> -> vector<16x16xf32>
    %47 = vector.broadcast %39 : vector<1x16xf32> to vector<16x16xf32>
    %48 = arith.addf %47, %46 : vector<16x16xf32>
    %49 = arith.truncf %38 : vector<16x8xf32> to vector<16x8xbf16>
    %c1 = arith.constant 1 : index
    %c0_19 = arith.constant 0 : index
    %c0_20 = arith.constant 0 : index
    %50 = vector.load %arg5[%c1, %c0_19, %c0_20] : memref<3x8x16xbf16, #tpu.memory_space<vmem>>, vector<1x8x16xbf16>
    %51 = vector.shape_cast %50 : vector<1x8x16xbf16> to vector<8x16xbf16>
    %cst_21 = arith.constant dense<0.000000e+00> : vector<16x16xf32>
    %52 = tpu.matmul %49, %51, %cst_21 {dimension_numbers = #tpu.dot_dimension_numbers<[1], [0], [0], [1], [0, 0, 1, 1], [], []>} : vector<16x8xbf16>, vector<8x16xbf16>, vector<16x16xf32> -> vector<16x16xf32>
    %53 = arith.addf %48, %52 : vector<16x16xf32>
    %c15_i32_22 = arith.constant 15 : i32
    %54 = tpu.dynamic_rotate %38 by %c15_i32_22 dim 0 : vector<16x8xf32>, i32 -> vector<16x8xf32>
    %55 = vector.broadcast %11 : vector<16x1xf32> to vector<16x8xf32>
    %56 = arith.mulf %54, %55 : vector<16x8xf32>
    %57 = arith.truncf %56 : vector<16x8xf32> to vector<16x8xbf16>
    %c2 = arith.constant 2 : index
    %c0_23 = arith.constant 0 : index
    %c0_24 = arith.constant 0 : index
    %58 = vector.load %arg5[%c2, %c0_23, %c0_24] : memref<3x8x16xbf16, #tpu.memory_space<vmem>>, vector<1x8x16xbf16>
    %59 = vector.shape_cast %58 : vector<1x8x16xbf16> to vector<8x16xbf16>
    %cst_25 = arith.constant dense<0.000000e+00> : vector<16x16xf32>
    %60 = tpu.matmul %57, %59, %cst_25 {dimension_numbers = #tpu.dot_dimension_numbers<[1], [0], [0], [1], [0, 0, 1, 1], [], []>} : vector<16x8xbf16>, vector<8x16xbf16>, vector<16x16xf32> -> vector<16x16xf32>
    %61 = arith.addf %53, %60 : vector<16x16xf32>
    %cst_26 = arith.constant 0.000000e+00 : f32
    %62 = vector.broadcast %cst_26 : f32 to vector<16x16xf32>
    %c0_i32_27 = arith.constant 0 : i32
    %c2_i32 = arith.constant 2 : i32
    %63 = arith.addi %c0_i32_27, %c2_i32 : i32
    %c1_i32_28 = arith.constant 1 : i32
    %64:2 = scf.for %arg15 = %c0_i32_27 to %63 step %c1_i32_28 iter_args(%arg16 = %61, %arg17 = %62) -> (vector<16x16xf32>, vector<16x16xf32>)  : i32 {
      %101 = arith.index_cast %arg15 : i32 to index
      %c0_46 = arith.constant 0 : index
      %c0_47 = arith.constant 0 : index
      %102 = vector.load %arg9[%101, %c0_46, %c0_47] : memref<2x1x64xf32, #tpu.memory_space<vmem>>, vector<1x1x64xf32>
      %103 = vector.shape_cast %102 : vector<1x1x64xf32> to vector<1x64xf32>
      %104 = vector.extract_strided_slice %103 {offsets = [0, 0], sizes = [1, 32], strides = [1, 1]} : vector<1x64xf32> to vector<1x32xf32>
      %c1_i32_48 = arith.constant 1 : i32
      %105 = tpu.dynamic_rotate %arg16 by %c1_i32_48 dim 0 : vector<16x16xf32>, i32 -> vector<16x16xf32>
      %106 = vector.broadcast %22 : vector<16x1xf32> to vector<16x16xf32>
      %107 = arith.mulf %105, %106 : vector<16x16xf32>
      %108 = arith.truncf %107 : vector<16x16xf32> to vector<16x16xbf16>
      %c3_i32 = arith.constant 3 : i32
      %109 = arith.muli %arg15, %c3_i32 : i32
      %c0_i32_49 = arith.constant 0 : i32
      %110 = arith.addi %109, %c0_i32_49 : i32
      %111 = arith.index_cast %110 : i32 to index
      %c0_50 = arith.constant 0 : index
      %c0_51 = arith.constant 0 : index
      %112 = vector.load %arg7[%111, %c0_50, %c0_51] : memref<6x16x32xbf16, #tpu.memory_space<vmem>>, vector<1x16x32xbf16>
      %113 = vector.shape_cast %112 : vector<1x16x32xbf16> to vector<16x32xbf16>
      %cst_52 = arith.constant dense<0.000000e+00> : vector<16x32xf32>
      %114 = tpu.matmul %108, %113, %cst_52 {dimension_numbers = #tpu.dot_dimension_numbers<[1], [0], [0], [1], [0, 0, 1, 1], [], []>} : vector<16x16xbf16>, vector<16x32xbf16>, vector<16x32xf32> -> vector<16x32xf32>
      %115 = vector.broadcast %104 : vector<1x32xf32> to vector<16x32xf32>
      %116 = arith.addf %115, %114 : vector<16x32xf32>
      %c3_i32_53 = arith.constant 3 : i32
      %117 = arith.muli %arg15, %c3_i32_53 : i32
      %c0_i32_54 = arith.constant 0 : i32
      %118 = arith.addi %117, %c0_i32_54 : i32
      %119 = arith.index_cast %118 : i32 to index
      %c0_55 = arith.constant 0 : index
      %c0_56 = arith.constant 0 : index
      %120 = vector.load %arg6[%119, %c0_55, %c0_56] : memref<6x16x32xbf16, #tpu.memory_space<vmem>>, vector<1x16x32xbf16>
      %121 = vector.shape_cast %120 : vector<1x16x32xbf16> to vector<16x32xbf16>
      %cst_57 = arith.constant dense<0.000000e+00> : vector<16x32xf32>
      %122 = tpu.matmul %31, %121, %cst_57 {dimension_numbers = #tpu.dot_dimension_numbers<[1], [0], [0], [1], [0, 0, 1, 1], [], []>} : vector<16x16xbf16>, vector<16x32xbf16>, vector<16x32xf32> -> vector<16x32xf32>
      %123 = arith.addf %116, %122 : vector<16x32xf32>
      %124 = arith.truncf %arg16 : vector<16x16xf32> to vector<16x16xbf16>
      %c3_i32_58 = arith.constant 3 : i32
      %125 = arith.muli %arg15, %c3_i32_58 : i32
      %c1_i32_59 = arith.constant 1 : i32
      %126 = arith.addi %125, %c1_i32_59 : i32
      %127 = arith.index_cast %126 : i32 to index
      %c0_60 = arith.constant 0 : index
      %c0_61 = arith.constant 0 : index
      %128 = vector.load %arg7[%127, %c0_60, %c0_61] : memref<6x16x32xbf16, #tpu.memory_space<vmem>>, vector<1x16x32xbf16>
      %129 = vector.shape_cast %128 : vector<1x16x32xbf16> to vector<16x32xbf16>
      %cst_62 = arith.constant dense<0.000000e+00> : vector<16x32xf32>
      %130 = tpu.matmul %124, %129, %cst_62 {dimension_numbers = #tpu.dot_dimension_numbers<[1], [0], [0], [1], [0, 0, 1, 1], [], []>} : vector<16x16xbf16>, vector<16x32xbf16>, vector<16x32xf32> -> vector<16x32xf32>
      %131 = arith.addf %123, %130 : vector<16x32xf32>
      %c3_i32_63 = arith.constant 3 : i32
      %132 = arith.muli %arg15, %c3_i32_63 : i32
      %c1_i32_64 = arith.constant 1 : i32
      %133 = arith.addi %132, %c1_i32_64 : i32
      %134 = arith.index_cast %133 : i32 to index
      %c0_65 = arith.constant 0 : index
      %c0_66 = arith.constant 0 : index
      %135 = vector.load %arg6[%134, %c0_65, %c0_66] : memref<6x16x32xbf16, #tpu.memory_space<vmem>>, vector<1x16x32xbf16>
      %136 = vector.shape_cast %135 : vector<1x16x32xbf16> to vector<16x32xbf16>
      %cst_67 = arith.constant dense<0.000000e+00> : vector<16x32xf32>
      %137 = tpu.matmul %32, %136, %cst_67 {dimension_numbers = #tpu.dot_dimension_numbers<[1], [0], [0], [1], [0, 0, 1, 1], [], []>} : vector<16x16xbf16>, vector<16x32xbf16>, vector<16x32xf32> -> vector<16x32xf32>
      %138 = arith.addf %131, %137 : vector<16x32xf32>
      %c15_i32_68 = arith.constant 15 : i32
      %139 = tpu.dynamic_rotate %arg16 by %c15_i32_68 dim 0 : vector<16x16xf32>, i32 -> vector<16x16xf32>
      %140 = vector.broadcast %11 : vector<16x1xf32> to vector<16x16xf32>
      %141 = arith.mulf %139, %140 : vector<16x16xf32>
      %142 = arith.truncf %141 : vector<16x16xf32> to vector<16x16xbf16>
      %c3_i32_69 = arith.constant 3 : i32
      %143 = arith.muli %arg15, %c3_i32_69 : i32
      %c2_i32_70 = arith.constant 2 : i32
      %144 = arith.addi %143, %c2_i32_70 : i32
      %145 = arith.index_cast %144 : i32 to index
      %c0_71 = arith.constant 0 : index
      %c0_72 = arith.constant 0 : index
      %146 = vector.load %arg7[%145, %c0_71, %c0_72] : memref<6x16x32xbf16, #tpu.memory_space<vmem>>, vector<1x16x32xbf16>
      %147 = vector.shape_cast %146 : vector<1x16x32xbf16> to vector<16x32xbf16>
      %cst_73 = arith.constant dense<0.000000e+00> : vector<16x32xf32>
      %148 = tpu.matmul %142, %147, %cst_73 {dimension_numbers = #tpu.dot_dimension_numbers<[1], [0], [0], [1], [0, 0, 1, 1], [], []>} : vector<16x16xbf16>, vector<16x32xbf16>, vector<16x32xf32> -> vector<16x32xf32>
      %149 = arith.addf %138, %148 : vector<16x32xf32>
      %c3_i32_74 = arith.constant 3 : i32
      %150 = arith.muli %arg15, %c3_i32_74 : i32
      %c2_i32_75 = arith.constant 2 : i32
      %151 = arith.addi %150, %c2_i32_75 : i32
      %152 = arith.index_cast %151 : i32 to index
      %c0_76 = arith.constant 0 : index
      %c0_77 = arith.constant 0 : index
      %153 = vector.load %arg6[%152, %c0_76, %c0_77] : memref<6x16x32xbf16, #tpu.memory_space<vmem>>, vector<1x16x32xbf16>
      %154 = vector.shape_cast %153 : vector<1x16x32xbf16> to vector<16x32xbf16>
      %cst_78 = arith.constant dense<0.000000e+00> : vector<16x32xf32>
      %155 = tpu.matmul %36, %154, %cst_78 {dimension_numbers = #tpu.dot_dimension_numbers<[1], [0], [0], [1], [0, 0, 1, 1], [], []>} : vector<16x16xbf16>, vector<16x32xbf16>, vector<16x32xf32> -> vector<16x32xf32>
      %156 = arith.addf %149, %155 : vector<16x32xf32>
      %157 = vector.extract_strided_slice %156 {offsets = [0, 0], sizes = [16, 16], strides = [1, 1]} : vector<16x32xf32> to vector<16x16xf32>
      %158 = math.tanh %157 : vector<16x16xf32>
      %159 = vector.extract_strided_slice %156 {offsets = [0, 16], sizes = [16, 16], strides = [1, 1]} : vector<16x32xf32> to vector<16x16xf32>
      %160 = arith.negf %159 : vector<16x16xf32>
      %161 = math.exp %160 : vector<16x16xf32>
      %cst_79 = arith.constant 1.000000e+00 : f32
      %162 = vector.broadcast %cst_79 : f32 to vector<16x16xf32>
      %163 = arith.addf %162, %161 : vector<16x16xf32>
      %164 = arith.divf %162, %163 : vector<16x16xf32>
      %165 = arith.mulf %158, %164 : vector<16x16xf32>
      %166 = arith.truncf %165 : vector<16x16xf32> to vector<16x16xbf16>
      %167 = arith.index_cast %arg15 : i32 to index
      %c0_80 = arith.constant 0 : index
      %c0_81 = arith.constant 0 : index
      %168 = vector.load %arg8[%167, %c0_80, %c0_81] : memref<2x16x32xbf16, #tpu.memory_space<vmem>>, vector<1x16x32xbf16>
      %169 = vector.shape_cast %168 : vector<1x16x32xbf16> to vector<16x32xbf16>
      %cst_82 = arith.constant dense<0.000000e+00> : vector<16x32xf32>
      %170 = tpu.matmul %166, %169, %cst_82 {dimension_numbers = #tpu.dot_dimension_numbers<[1], [0], [0], [1], [0, 0, 1, 1], [], []>} : vector<16x16xbf16>, vector<16x32xbf16>, vector<16x32xf32> -> vector<16x32xf32>
      %171 = vector.extract_strided_slice %103 {offsets = [0, 32], sizes = [1, 32], strides = [1, 1]} : vector<1x64xf32> to vector<1x32xf32>
      %172 = vector.broadcast %171 : vector<1x32xf32> to vector<16x32xf32>
      %173 = arith.addf %170, %172 : vector<16x32xf32>
      %174 = vector.extract_strided_slice %173 {offsets = [0, 0], sizes = [16, 16], strides = [1, 1]} : vector<16x32xf32> to vector<16x16xf32>
      %175 = arith.addf %arg16, %174 : vector<16x16xf32>
      %176 = vector.extract_strided_slice %173 {offsets = [0, 16], sizes = [16, 16], strides = [1, 1]} : vector<16x32xf32> to vector<16x16xf32>
      %177 = arith.addf %arg17, %176 : vector<16x16xf32>
      scf.yield %175, %177 : vector<16x16xf32>, vector<16x16xf32>
    }
    %c2_i32_29 = arith.constant 2 : i32
    %65 = vector.broadcast %24 : vector<16x1xf32> to vector<16x16xf32>
    %66 = arith.mulf %64#1, %65 : vector<16x16xf32>
    %67 = arith.truncf %66 : vector<16x16xf32> to vector<16x16xbf16>
    %c0_30 = arith.constant 0 : index
    %c0_31 = arith.constant 0 : index
    %68 = vector.load %arg10[%c0_30, %c0_31] : memref<16x16xbf16, #tpu.memory_space<vmem>>, vector<16x16xbf16>
    %cst_32 = arith.constant dense<0.000000e+00> : vector<16x16xf32>
    %69 = tpu.matmul %67, %68, %cst_32 {dimension_numbers = #tpu.dot_dimension_numbers<[1], [0], [0], [1], [0, 0, 1, 1], [], []>} : vector<16x16xbf16>, vector<16x16xbf16>, vector<16x16xf32> -> vector<16x16xf32>
    %70 = vector.extract_strided_slice %25 {offsets = [0, 16], sizes = [1, 16], strides = [1, 1]} : vector<1x48xf32> to vector<1x16xf32>
    %71 = vector.broadcast %70 : vector<1x16xf32> to vector<16x16xf32>
    %72 = arith.addf %69, %71 : vector<16x16xf32>
    %73 = vector.extract_strided_slice %72 {offsets = [0, 0], sizes = [16, 8], strides = [1, 1]} : vector<16x16xf32> to vector<16x8xf32>
    %74 = vector.broadcast %24 : vector<16x1xf32> to vector<16x8xf32>
    %75 = arith.mulf %73, %74 : vector<16x8xf32>
    %76 = vector.extract_strided_slice %72 {offsets = [0, 8], sizes = [16, 8], strides = [1, 1]} : vector<16x16xf32> to vector<16x8xf32>
    %77 = vector.broadcast %24 : vector<16x1xf32> to vector<16x8xf32>
    %78 = arith.mulf %76, %77 : vector<16x8xf32>
    %c0_33 = arith.constant 0 : index
    %c0_34 = arith.constant 0 : index
    %c0_35 = arith.constant 0 : index
    %79 = vector.load %arg4[%c0_33, %c0_34, %c0_35] : memref<1x16x8xf32, #tpu.memory_space<vmem>>, vector<1x16x8xf32>
    %80 = vector.shape_cast %79 : vector<1x16x8xf32> to vector<16x8xf32>
    %cst_36 = arith.constant 5.000000e-01 : f32
    %81 = vector.broadcast %cst_36 : f32 to vector<16x8xf32>
    %82 = arith.mulf %81, %78 : vector<16x8xf32>
    %83 = math.exp %82 : vector<16x8xf32>
    %84 = arith.mulf %80, %83 : vector<16x8xf32>
    %85 = arith.addf %75, %84 : vector<16x8xf32>
    %86 = vector.broadcast %24 : vector<16x1xf32> to vector<16x8xf32>
    %87 = arith.mulf %85, %86 : vector<16x8xf32>
    %88 = tpu.concatenate %87, %78 in 1 : vector<16x8xf32>, vector<16x8xf32> -> vector<16x16xf32>
    %c0_37 = arith.constant 0 : index
    %c0_38 = arith.constant 0 : index
    %c0_39 = arith.constant 0 : index
    %89 = vector.load %arg13[%c0_37, %c0_38, %c0_39] : memref<1x16x16xf32, #tpu.memory_space<vmem>>, vector<1x16x16xf32>
    %90 = vector.shape_cast %89 : vector<1x16x16xf32> to vector<16x16xf32>
    %91 = vector.shape_cast %88 : vector<16x16xf32> to vector<1x16x16xf32>
    tpu.vector_store %arg13[%c0_37, %c0_38, %c0_39], %91 {strides = array<i32>} : memref<1x16x16xf32, #tpu.memory_space<vmem>>, vector<1x16x16xf32>,
    %92 = arith.truncf %87 : vector<16x8xf32> to vector<16x8xbf16>
    %c0_40 = arith.constant 0 : index
    %c0_41 = arith.constant 0 : index
    %93 = vector.load %arg11[%c0_40, %c0_41] : memref<8x16xbf16, #tpu.memory_space<vmem>>, vector<8x16xbf16>
    %cst_42 = arith.constant dense<0.000000e+00> : vector<16x16xf32>
    %94 = tpu.matmul %92, %93, %cst_42 {dimension_numbers = #tpu.dot_dimension_numbers<[1], [0], [0], [1], [0, 0, 1, 1], [], []>} : vector<16x8xbf16>, vector<8x16xbf16>, vector<16x16xf32> -> vector<16x16xf32>
    %95 = vector.extract_strided_slice %25 {offsets = [0, 32], sizes = [1, 16], strides = [1, 1]} : vector<1x48xf32> to vector<1x16xf32>
    %96 = vector.broadcast %95 : vector<1x16xf32> to vector<16x16xf32>
    %97 = arith.addf %94, %96 : vector<16x16xf32>
    %c0_43 = arith.constant 0 : index
    %c0_44 = arith.constant 0 : index
    %c0_45 = arith.constant 0 : index
    %98 = vector.load %arg14[%c0_43, %c0_44, %c0_45] : memref<1x16x16xf32, #tpu.memory_space<vmem>>, vector<1x16x16xf32>
    %99 = vector.shape_cast %98 : vector<1x16x16xf32> to vector<16x16xf32>
    %100 = vector.shape_cast %97 : vector<16x16xf32> to vector<1x16x16xf32>
    tpu.vector_store %arg14[%c0_43, %c0_44, %c0_45], %100 {strides = array<i32>} : memref<1x16x16xf32, #tpu.memory_space<vmem>>, vector<1x16x16xf32>,
    return
  }
  func.func @transform_0(%arg0: i32) -> (i32, i32, i32) {
    %c0_i32 = arith.constant 0 : i32
    %c0_i32_0 = arith.constant 0 : i32
    %c0_i32_1 = arith.constant 0 : i32
    return %arg0, %c0_i32, %c0_i32_0 : i32, i32, i32
  }
  func.func @transform_1(%arg0: i32) -> (i32, i32, i32) {
    %c0_i32 = arith.constant 0 : i32
    %c0_i32_0 = arith.constant 0 : i32
    %c0_i32_1 = arith.constant 0 : i32
    return %arg0, %c0_i32, %c0_i32_0 : i32, i32, i32
  }
  func.func @transform_2(%arg0: i32) -> (i32, i32, i32) {
    %c0_i32 = arith.constant 0 : i32
    %c0_i32_0 = arith.constant 0 : i32
    %c0_i32_1 = arith.constant 0 : i32
    return %arg0, %c0_i32, %c0_i32_0 : i32, i32, i32
  }
  func.func @transform_3(%arg0: i32) -> (i32, i32, i32) {
    %c0_i32 = arith.constant 0 : i32
    %c0_i32_0 = arith.constant 0 : i32
    %c0_i32_1 = arith.constant 0 : i32
    return %arg0, %c0_i32, %c0_i32_0 : i32, i32, i32
  }
  func.func @transform_4(%arg0: i32) -> (i32, i32, i32) {
    %c0_i32 = arith.constant 0 : i32
    %c0_i32_0 = arith.constant 0 : i32
    %c0_i32_1 = arith.constant 0 : i32
    %c0_i32_2 = arith.constant 0 : i32
    return %c0_i32, %c0_i32_0, %c0_i32_1 : i32, i32, i32
  }
  func.func @transform_5(%arg0: i32) -> (i32, i32, i32) {
    %c0_i32 = arith.constant 0 : i32
    %c0_i32_0 = arith.constant 0 : i32
    %c0_i32_1 = arith.constant 0 : i32
    %c0_i32_2 = arith.constant 0 : i32
    return %c0_i32, %c0_i32_0, %c0_i32_1 : i32, i32, i32
  }
  func.func @transform_6(%arg0: i32) -> (i32, i32, i32) {
    %c0_i32 = arith.constant 0 : i32
    %c0_i32_0 = arith.constant 0 : i32
    %c0_i32_1 = arith.constant 0 : i32
    %c0_i32_2 = arith.constant 0 : i32
    return %c0_i32, %c0_i32_0, %c0_i32_1 : i32, i32, i32
  }
  func.func @transform_7(%arg0: i32) -> (i32, i32, i32) {
    %c0_i32 = arith.constant 0 : i32
    %c0_i32_0 = arith.constant 0 : i32
    %c0_i32_1 = arith.constant 0 : i32
    %c0_i32_2 = arith.constant 0 : i32
    return %c0_i32, %c0_i32_0, %c0_i32_1 : i32, i32, i32
  }
  func.func @transform_8(%arg0: i32) -> (i32, i32, i32) {
    %c0_i32 = arith.constant 0 : i32
    %c0_i32_0 = arith.constant 0 : i32
    %c0_i32_1 = arith.constant 0 : i32
    %c0_i32_2 = arith.constant 0 : i32
    return %c0_i32, %c0_i32_0, %c0_i32_1 : i32, i32, i32
  }
  func.func @transform_9(%arg0: i32) -> (i32, i32) {
    %c0_i32 = arith.constant 0 : i32
    %c0_i32_0 = arith.constant 0 : i32
    %c0_i32_1 = arith.constant 0 : i32
    return %c0_i32, %c0_i32_0 : i32, i32
  }
  func.func @transform_10(%arg0: i32) -> (i32, i32) {
    %c0_i32 = arith.constant 0 : i32
    %c0_i32_0 = arith.constant 0 : i32
    %c0_i32_1 = arith.constant 0 : i32
    return %c0_i32, %c0_i32_0 : i32, i32
  }
  func.func @transform_11(%arg0: i32) -> (i32, i32) {
    %c0_i32 = arith.constant 0 : i32
    %c0_i32_0 = arith.constant 0 : i32
    %c0_i32_1 = arith.constant 0 : i32
    return %c0_i32, %c0_i32_0 : i32, i32
  }
  func.func @transform_12(%arg0: i32) -> (i32, i32, i32) {
    %c0_i32 = arith.constant 0 : i32
    %c0_i32_0 = arith.constant 0 : i32
    %c0_i32_1 = arith.constant 0 : i32
    return %arg0, %c0_i32, %c0_i32_0 : i32, i32, i32
  }
  func.func @transform_13(%arg0: i32) -> (i32, i32, i32) {
    %c0_i32 = arith.constant 0 : i32
    %c0_i32_0 = arith.constant 0 : i32
    %c0_i32_1 = arith.constant 0 : i32
    return %arg0, %c0_i32, %c0_i32_0 : i32, i32, i32
  }
}

module attributes {stable_mosaic.version = 11 : i64} {
  func.func @_dec_out_kernel(%arg0: i32, %arg1: memref<1x16x16xf32, #tpu.memory_space<vmem>>, %arg2: memref<1x16x16xf32, #tpu.memory_space<vmem>>, %arg3: memref<1x16x1xf32, #tpu.memory_space<vmem>>, %arg4: memref<6x16x32xbf16, #tpu.memory_space<vmem>>, %arg5: memref<6x16x32xbf16, #tpu.memory_space<vmem>>, %arg6: memref<2x16x32xbf16, #tpu.memory_space<vmem>>, %arg7: memref<2x1x64xf32, #tpu.memory_space<vmem>>, %arg8: memref<3x16x8xbf16, #tpu.memory_space<vmem>>, %arg9: memref<8x16xbf16, #tpu.memory_space<vmem>>, %arg10: memref<1x24xf32, #tpu.memory_space<vmem>>, %arg11: memref<1x16x8xf32, #tpu.memory_space<vmem>>, %arg12: memref<1x16x16xf32, #tpu.memory_space<vmem>>) attributes {dimension_semantics = [#tpu.dimension_semantics<parallel>], iteration_bounds = array<i64: 2>, scalar_prefetch = 0 : i64, scratch_operands = 0 : i64, tpu.core_type = #tpu.core_type<tc>, window_params = [{transform_indices = @transform_0, window_bounds = array<i64: 1, 16, 16>}, {transform_indices = @transform_1, window_bounds = array<i64: 1, 16, 16>}, {transform_indices = @transform_2, window_bounds = array<i64: 1, 16, 1>}, {pipeline_mode = #tpu.pipeline_mode<synchronous>, transform_indices = @transform_3, window_bounds = array<i64: 6, 16, 32>}, {pipeline_mode = #tpu.pipeline_mode<synchronous>, transform_indices = @transform_4, window_bounds = array<i64: 6, 16, 32>}, {pipeline_mode = #tpu.pipeline_mode<synchronous>, transform_indices = @transform_5, window_bounds = array<i64: 2, 16, 32>}, {pipeline_mode = #tpu.pipeline_mode<synchronous>, transform_indices = @transform_6, window_bounds = array<i64: 2, 1, 64>}, {pipeline_mode = #tpu.pipeline_mode<synchronous>, transform_indices = @transform_7, window_bounds = array<i64: 3, 16, 8>}, {pipeline_mode = #tpu.pipeline_mode<synchronous>, transform_indices = @transform_8, window_bounds = array<i64: 8, 16>}, {pipeline_mode = #tpu.pipeline_mode<synchronous>, transform_indices = @transform_9, window_bounds = array<i64: 1, 24>}, {transform_indices = @transform_10, window_bounds = array<i64: 1, 16, 8>}, {transform_indices = @transform_11, window_bounds = array<i64: 1, 16, 16>}]} {
    %0 = tpu.iota {dimensions = array<i32: 0>} : vector<16x1xi32>
    %c1_i32 = arith.constant 1 : i32
    %1 = vector.broadcast %c1_i32 : i32 to vector<16x1xi32>
    %2 = arith.addi %0, %1 : vector<16x1xi32>
    %c0_i32 = arith.constant 0 : i32
    %3 = vector.broadcast %c0_i32 : i32 to vector<16x1xi32>
    %4 = arith.cmpi sge, %2, %3 : vector<16x1xi32>
    %c1_i32_0 = arith.constant 1 : i32
    %5 = vector.broadcast %c1_i32_0 : i32 to vector<16x1xi32>
    %6 = arith.addi %0, %5 : vector<16x1xi32>
    %c16_i32 = arith.constant 16 : i32
    %7 = vector.broadcast %c16_i32 : i32 to vector<16x1xi32>
    %8 = arith.cmpi slt, %6, %7 : vector<16x1xi32>
    %9 = arith.andi %4, %8 : vector<16x1xi1>
    %10 = arith.extui %9 : vector<16x1xi1> to vector<16x1xi32>
    %11 = arith.sitofp %10 : vector<16x1xi32> to vector<16x1xf32>
    %c-1_i32 = arith.constant -1 : i32
    %12 = vector.broadcast %c-1_i32 : i32 to vector<16x1xi32>
    %13 = arith.addi %0, %12 : vector<16x1xi32>
    %c0_i32_1 = arith.constant 0 : i32
    %14 = vector.broadcast %c0_i32_1 : i32 to vector<16x1xi32>
    %15 = arith.cmpi sge, %13, %14 : vector<16x1xi32>
    %c-1_i32_2 = arith.constant -1 : i32
    %16 = vector.broadcast %c-1_i32_2 : i32 to vector<16x1xi32>
    %17 = arith.addi %0, %16 : vector<16x1xi32>
    %c16_i32_3 = arith.constant 16 : i32
    %18 = vector.broadcast %c16_i32_3 : i32 to vector<16x1xi32>
    %19 = arith.cmpi slt, %17, %18 : vector<16x1xi32>
    %20 = arith.andi %15, %19 : vector<16x1xi1>
    %21 = arith.extui %20 : vector<16x1xi1> to vector<16x1xi32>
    %22 = arith.sitofp %21 : vector<16x1xi32> to vector<16x1xf32>
    %c0 = arith.constant 0 : index
    %c0_4 = arith.constant 0 : index
    %c0_5 = arith.constant 0 : index
    %23 = vector.load %arg3[%c0, %c0_4, %c0_5] : memref<1x16x1xf32, #tpu.memory_space<vmem>>, vector<1x16x1xf32>
    %24 = vector.shape_cast %23 : vector<1x16x1xf32> to vector<16x1xf32>
    %c0_6 = arith.constant 0 : index
    %c0_7 = arith.constant 0 : index
    %25 = vector.load %arg10[%c0_6, %c0_7] : memref<1x24xf32, #tpu.memory_space<vmem>>, vector<1x24xf32>
    %c0_8 = arith.constant 0 : index
    %c0_9 = arith.constant 0 : index
    %c0_10 = arith.constant 0 : index
    %26 = vector.load %arg2[%c0_8, %c0_9, %c0_10] : memref<1x16x16xf32, #tpu.memory_space<vmem>>, vector<1x16x16xf32>
    %27 = vector.shape_cast %26 : vector<1x16x16xf32> to vector<16x16xf32>
    %c1_i32_11 = arith.constant 1 : i32
    %28 = tpu.dynamic_rotate %27 by %c1_i32_11 dim 0 : vector<16x16xf32>, i32 -> vector<16x16xf32>
    %29 = vector.broadcast %22 : vector<16x1xf32> to vector<16x16xf32>
    %30 = arith.mulf %28, %29 : vector<16x16xf32>
    %31 = arith.truncf %30 : vector<16x16xf32> to vector<16x16xbf16>
    %32 = arith.truncf %27 : vector<16x16xf32> to vector<16x16xbf16>
    %c15_i32 = arith.constant 15 : i32
    %33 = tpu.dynamic_rotate %27 by %c15_i32 dim 0 : vector<16x16xf32>, i32 -> vector<16x16xf32>
    %34 = vector.broadcast %11 : vector<16x1xf32> to vector<16x16xf32>
    %35 = arith.mulf %33, %34 : vector<16x16xf32>
    %36 = arith.truncf %35 : vector<16x16xf32> to vector<16x16xbf16>
    %c0_12 = arith.constant 0 : index
    %c0_13 = arith.constant 0 : index
    %c0_14 = arith.constant 0 : index
    %37 = vector.load %arg1[%c0_12, %c0_13, %c0_14] : memref<1x16x16xf32, #tpu.memory_space<vmem>>, vector<1x16x16xf32>
    %38 = vector.shape_cast %37 : vector<1x16x16xf32> to vector<16x16xf32>
    %cst = arith.constant 0.000000e+00 : f32
    %39 = vector.broadcast %cst : f32 to vector<16x16xf32>
    %c0_i32_15 = arith.constant 0 : i32
    %c2_i32 = arith.constant 2 : i32
    %40 = arith.addi %c0_i32_15, %c2_i32 : i32
    %c1_i32_16 = arith.constant 1 : i32
    %41:2 = scf.for %arg13 = %c0_i32_15 to %40 step %c1_i32_16 iter_args(%arg14 = %38, %arg15 = %39) -> (vector<16x16xf32>, vector<16x16xf32>)  : i32 {
      %83 = arith.index_cast %arg13 : i32 to index
      %c0_39 = arith.constant 0 : index
      %c0_40 = arith.constant 0 : index
      %84 = vector.load %arg7[%83, %c0_39, %c0_40] : memref<2x1x64xf32, #tpu.memory_space<vmem>>, vector<1x1x64xf32>
      %85 = vector.shape_cast %84 : vector<1x1x64xf32> to vector<1x64xf32>
      %86 = vector.extract_strided_slice %85 {offsets = [0, 0], sizes = [1, 32], strides = [1, 1]} : vector<1x64xf32> to vector<1x32xf32>
      %c1_i32_41 = arith.constant 1 : i32
      %87 = tpu.dynamic_rotate %arg14 by %c1_i32_41 dim 0 : vector<16x16xf32>, i32 -> vector<16x16xf32>
      %88 = vector.broadcast %22 : vector<16x1xf32> to vector<16x16xf32>
      %89 = arith.mulf %87, %88 : vector<16x16xf32>
      %90 = arith.truncf %89 : vector<16x16xf32> to vector<16x16xbf16>
      %c3_i32 = arith.constant 3 : i32
      %91 = arith.muli %arg13, %c3_i32 : i32
      %c0_i32_42 = arith.constant 0 : i32
      %92 = arith.addi %91, %c0_i32_42 : i32
      %93 = arith.index_cast %92 : i32 to index
      %c0_43 = arith.constant 0 : index
      %c0_44 = arith.constant 0 : index
      %94 = vector.load %arg5[%93, %c0_43, %c0_44] : memref<6x16x32xbf16, #tpu.memory_space<vmem>>, vector<1x16x32xbf16>
      %95 = vector.shape_cast %94 : vector<1x16x32xbf16> to vector<16x32xbf16>
      %cst_45 = arith.constant dense<0.000000e+00> : vector<16x32xf32>
      %96 = tpu.matmul %90, %95, %cst_45 {dimension_numbers = #tpu.dot_dimension_numbers<[1], [0], [0], [1], [0, 0, 1, 1], [], []>} : vector<16x16xbf16>, vector<16x32xbf16>, vector<16x32xf32> -> vector<16x32xf32>
      %97 = vector.broadcast %86 : vector<1x32xf32> to vector<16x32xf32>
      %98 = arith.addf %97, %96 : vector<16x32xf32>
      %c3_i32_46 = arith.constant 3 : i32
      %99 = arith.muli %arg13, %c3_i32_46 : i32
      %c0_i32_47 = arith.constant 0 : i32
      %100 = arith.addi %99, %c0_i32_47 : i32
      %101 = arith.index_cast %100 : i32 to index
      %c0_48 = arith.constant 0 : index
      %c0_49 = arith.constant 0 : index
      %102 = vector.load %arg4[%101, %c0_48, %c0_49] : memref<6x16x32xbf16, #tpu.memory_space<vmem>>, vector<1x16x32xbf16>
      %103 = vector.shape_cast %102 : vector<1x16x32xbf16> to vector<16x32xbf16>
      %cst_50 = arith.constant dense<0.000000e+00> : vector<16x32xf32>
      %104 = tpu.matmul %31, %103, %cst_50 {dimension_numbers = #tpu.dot_dimension_numbers<[1], [0], [0], [1], [0, 0, 1, 1], [], []>} : vector<16x16xbf16>, vector<16x32xbf16>, vector<16x32xf32> -> vector<16x32xf32>
      %105 = arith.addf %98, %104 : vector<16x32xf32>
      %106 = arith.truncf %arg14 : vector<16x16xf32> to vector<16x16xbf16>
      %c3_i32_51 = arith.constant 3 : i32
      %107 = arith.muli %arg13, %c3_i32_51 : i32
      %c1_i32_52 = arith.constant 1 : i32
      %108 = arith.addi %107, %c1_i32_52 : i32
      %109 = arith.index_cast %108 : i32 to index
      %c0_53 = arith.constant 0 : index
      %c0_54 = arith.constant 0 : index
      %110 = vector.load %arg5[%109, %c0_53, %c0_54] : memref<6x16x32xbf16, #tpu.memory_space<vmem>>, vector<1x16x32xbf16>
      %111 = vector.shape_cast %110 : vector<1x16x32xbf16> to vector<16x32xbf16>
      %cst_55 = arith.constant dense<0.000000e+00> : vector<16x32xf32>
      %112 = tpu.matmul %106, %111, %cst_55 {dimension_numbers = #tpu.dot_dimension_numbers<[1], [0], [0], [1], [0, 0, 1, 1], [], []>} : vector<16x16xbf16>, vector<16x32xbf16>, vector<16x32xf32> -> vector<16x32xf32>
      %113 = arith.addf %105, %112 : vector<16x32xf32>
      %c3_i32_56 = arith.constant 3 : i32
      %114 = arith.muli %arg13, %c3_i32_56 : i32
      %c1_i32_57 = arith.constant 1 : i32
      %115 = arith.addi %114, %c1_i32_57 : i32
      %116 = arith.index_cast %115 : i32 to index
      %c0_58 = arith.constant 0 : index
      %c0_59 = arith.constant 0 : index
      %117 = vector.load %arg4[%116, %c0_58, %c0_59] : memref<6x16x32xbf16, #tpu.memory_space<vmem>>, vector<1x16x32xbf16>
      %118 = vector.shape_cast %117 : vector<1x16x32xbf16> to vector<16x32xbf16>
      %cst_60 = arith.constant dense<0.000000e+00> : vector<16x32xf32>
      %119 = tpu.matmul %32, %118, %cst_60 {dimension_numbers = #tpu.dot_dimension_numbers<[1], [0], [0], [1], [0, 0, 1, 1], [], []>} : vector<16x16xbf16>, vector<16x32xbf16>, vector<16x32xf32> -> vector<16x32xf32>
      %120 = arith.addf %113, %119 : vector<16x32xf32>
      %c15_i32_61 = arith.constant 15 : i32
      %121 = tpu.dynamic_rotate %arg14 by %c15_i32_61 dim 0 : vector<16x16xf32>, i32 -> vector<16x16xf32>
      %122 = vector.broadcast %11 : vector<16x1xf32> to vector<16x16xf32>
      %123 = arith.mulf %121, %122 : vector<16x16xf32>
      %124 = arith.truncf %123 : vector<16x16xf32> to vector<16x16xbf16>
      %c3_i32_62 = arith.constant 3 : i32
      %125 = arith.muli %arg13, %c3_i32_62 : i32
      %c2_i32_63 = arith.constant 2 : i32
      %126 = arith.addi %125, %c2_i32_63 : i32
      %127 = arith.index_cast %126 : i32 to index
      %c0_64 = arith.constant 0 : index
      %c0_65 = arith.constant 0 : index
      %128 = vector.load %arg5[%127, %c0_64, %c0_65] : memref<6x16x32xbf16, #tpu.memory_space<vmem>>, vector<1x16x32xbf16>
      %129 = vector.shape_cast %128 : vector<1x16x32xbf16> to vector<16x32xbf16>
      %cst_66 = arith.constant dense<0.000000e+00> : vector<16x32xf32>
      %130 = tpu.matmul %124, %129, %cst_66 {dimension_numbers = #tpu.dot_dimension_numbers<[1], [0], [0], [1], [0, 0, 1, 1], [], []>} : vector<16x16xbf16>, vector<16x32xbf16>, vector<16x32xf32> -> vector<16x32xf32>
      %131 = arith.addf %120, %130 : vector<16x32xf32>
      %c3_i32_67 = arith.constant 3 : i32
      %132 = arith.muli %arg13, %c3_i32_67 : i32
      %c2_i32_68 = arith.constant 2 : i32
      %133 = arith.addi %132, %c2_i32_68 : i32
      %134 = arith.index_cast %133 : i32 to index
      %c0_69 = arith.constant 0 : index
      %c0_70 = arith.constant 0 : index
      %135 = vector.load %arg4[%134, %c0_69, %c0_70] : memref<6x16x32xbf16, #tpu.memory_space<vmem>>, vector<1x16x32xbf16>
      %136 = vector.shape_cast %135 : vector<1x16x32xbf16> to vector<16x32xbf16>
      %cst_71 = arith.constant dense<0.000000e+00> : vector<16x32xf32>
      %137 = tpu.matmul %36, %136, %cst_71 {dimension_numbers = #tpu.dot_dimension_numbers<[1], [0], [0], [1], [0, 0, 1, 1], [], []>} : vector<16x16xbf16>, vector<16x32xbf16>, vector<16x32xf32> -> vector<16x32xf32>
      %138 = arith.addf %131, %137 : vector<16x32xf32>
      %139 = vector.extract_strided_slice %138 {offsets = [0, 0], sizes = [16, 16], strides = [1, 1]} : vector<16x32xf32> to vector<16x16xf32>
      %140 = math.tanh %139 : vector<16x16xf32>
      %141 = vector.extract_strided_slice %138 {offsets = [0, 16], sizes = [16, 16], strides = [1, 1]} : vector<16x32xf32> to vector<16x16xf32>
      %142 = arith.negf %141 : vector<16x16xf32>
      %143 = math.exp %142 : vector<16x16xf32>
      %cst_72 = arith.constant 1.000000e+00 : f32
      %144 = vector.broadcast %cst_72 : f32 to vector<16x16xf32>
      %145 = arith.addf %144, %143 : vector<16x16xf32>
      %146 = arith.divf %144, %145 : vector<16x16xf32>
      %147 = arith.mulf %140, %146 : vector<16x16xf32>
      %148 = arith.truncf %147 : vector<16x16xf32> to vector<16x16xbf16>
      %149 = arith.index_cast %arg13 : i32 to index
      %c0_73 = arith.constant 0 : index
      %c0_74 = arith.constant 0 : index
      %150 = vector.load %arg6[%149, %c0_73, %c0_74] : memref<2x16x32xbf16, #tpu.memory_space<vmem>>, vector<1x16x32xbf16>
      %151 = vector.shape_cast %150 : vector<1x16x32xbf16> to vector<16x32xbf16>
      %cst_75 = arith.constant dense<0.000000e+00> : vector<16x32xf32>
      %152 = tpu.matmul %148, %151, %cst_75 {dimension_numbers = #tpu.dot_dimension_numbers<[1], [0], [0], [1], [0, 0, 1, 1], [], []>} : vector<16x16xbf16>, vector<16x32xbf16>, vector<16x32xf32> -> vector<16x32xf32>
      %153 = vector.extract_strided_slice %85 {offsets = [0, 32], sizes = [1, 32], strides = [1, 1]} : vector<1x64xf32> to vector<1x32xf32>
      %154 = vector.broadcast %153 : vector<1x32xf32> to vector<16x32xf32>
      %155 = arith.addf %152, %154 : vector<16x32xf32>
      %156 = vector.extract_strided_slice %155 {offsets = [0, 0], sizes = [16, 16], strides = [1, 1]} : vector<16x32xf32> to vector<16x16xf32>
      %157 = arith.addf %arg14, %156 : vector<16x16xf32>
      %158 = vector.extract_strided_slice %155 {offsets = [0, 16], sizes = [16, 16], strides = [1, 1]} : vector<16x32xf32> to vector<16x16xf32>
      %159 = arith.addf %arg15, %158 : vector<16x16xf32>
      scf.yield %157, %159 : vector<16x16xf32>, vector<16x16xf32>
    }
    %c2_i32_17 = arith.constant 2 : i32
    %42 = vector.broadcast %24 : vector<16x1xf32> to vector<16x16xf32>
    %43 = arith.mulf %41#1, %42 : vector<16x16xf32>
    %44 = vector.extract_strided_slice %25 {offsets = [0, 0], sizes = [1, 8], strides = [1, 1]} : vector<1x24xf32> to vector<1x8xf32>
    %c1_i32_18 = arith.constant 1 : i32
    %45 = tpu.dynamic_rotate %43 by %c1_i32_18 dim 0 : vector<16x16xf32>, i32 -> vector<16x16xf32>
    %46 = vector.broadcast %22 : vector<16x1xf32> to vector<16x16xf32>
    %47 = arith.mulf %45, %46 : vector<16x16xf32>
    %48 = arith.truncf %47 : vector<16x16xf32> to vector<16x16xbf16>
    %c0_19 = arith.constant 0 : index
    %c0_20 = arith.constant 0 : index
    %c0_21 = arith.constant 0 : index
    %49 = vector.load %arg8[%c0_19, %c0_20, %c0_21] : memref<3x16x8xbf16, #tpu.memory_space<vmem>>, vector<1x16x8xbf16>
    %50 = vector.shape_cast %49 : vector<1x16x8xbf16> to vector<16x8xbf16>
    %cst_22 = arith.constant dense<0.000000e+00> : vector<16x8xf32>
    %51 = tpu.matmul %48, %50, %cst_22 {dimension_numbers = #tpu.dot_dimension_numbers<[1], [0], [0], [1], [0, 0, 1, 1], [], []>} : vector<16x16xbf16>, vector<16x8xbf16>, vector<16x8xf32> -> vector<16x8xf32>
    %52 = vector.broadcast %44 : vector<1x8xf32> to vector<16x8xf32>
    %53 = arith.addf %52, %51 : vector<16x8xf32>
    %54 = arith.truncf %43 : vector<16x16xf32> to vector<16x16xbf16>
    %c1 = arith.constant 1 : index
    %c0_23 = arith.constant 0 : index
    %c0_24 = arith.constant 0 : index
    %55 = vector.load %arg8[%c1, %c0_23, %c0_24] : memref<3x16x8xbf16, #tpu.memory_space<vmem>>, vector<1x16x8xbf16>
    %56 = vector.shape_cast %55 : vector<1x16x8xbf16> to vector<16x8xbf16>
    %cst_25 = arith.constant dense<0.000000e+00> : vector<16x8xf32>
    %57 = tpu.matmul %54, %56, %cst_25 {dimension_numbers = #tpu.dot_dimension_numbers<[1], [0], [0], [1], [0, 0, 1, 1], [], []>} : vector<16x16xbf16>, vector<16x8xbf16>, vector<16x8xf32> -> vector<16x8xf32>
    %58 = arith.addf %53, %57 : vector<16x8xf32>
    %c15_i32_26 = arith.constant 15 : i32
    %59 = tpu.dynamic_rotate %43 by %c15_i32_26 dim 0 : vector<16x16xf32>, i32 -> vector<16x16xf32>
    %60 = vector.broadcast %11 : vector<16x1xf32> to vector<16x16xf32>
    %61 = arith.mulf %59, %60 : vector<16x16xf32>
    %62 = arith.truncf %61 : vector<16x16xf32> to vector<16x16xbf16>
    %c2 = arith.constant 2 : index
    %c0_27 = arith.constant 0 : index
    %c0_28 = arith.constant 0 : index
    %63 = vector.load %arg8[%c2, %c0_27, %c0_28] : memref<3x16x8xbf16, #tpu.memory_space<vmem>>, vector<1x16x8xbf16>
    %64 = vector.shape_cast %63 : vector<1x16x8xbf16> to vector<16x8xbf16>
    %cst_29 = arith.constant dense<0.000000e+00> : vector<16x8xf32>
    %65 = tpu.matmul %62, %64, %cst_29 {dimension_numbers = #tpu.dot_dimension_numbers<[1], [0], [0], [1], [0, 0, 1, 1], [], []>} : vector<16x16xbf16>, vector<16x8xbf16>, vector<16x8xf32> -> vector<16x8xf32>
    %66 = arith.addf %58, %65 : vector<16x8xf32>
    %67 = vector.broadcast %24 : vector<16x1xf32> to vector<16x8xf32>
    %68 = arith.mulf %66, %67 : vector<16x8xf32>
    %c0_30 = arith.constant 0 : index
    %c0_31 = arith.constant 0 : index
    %c0_32 = arith.constant 0 : index
    %69 = vector.load %arg11[%c0_30, %c0_31, %c0_32] : memref<1x16x8xf32, #tpu.memory_space<vmem>>, vector<1x16x8xf32>
    %70 = vector.shape_cast %69 : vector<1x16x8xf32> to vector<16x8xf32>
    %71 = vector.shape_cast %68 : vector<16x8xf32> to vector<1x16x8xf32>
    tpu.vector_store %arg11[%c0_30, %c0_31, %c0_32], %71 {strides = array<i32>} : memref<1x16x8xf32, #tpu.memory_space<vmem>>, vector<1x16x8xf32>,
    %72 = arith.truncf %68 : vector<16x8xf32> to vector<16x8xbf16>
    %c0_33 = arith.constant 0 : index
    %c0_34 = arith.constant 0 : index
    %73 = vector.load %arg9[%c0_33, %c0_34] : memref<8x16xbf16, #tpu.memory_space<vmem>>, vector<8x16xbf16>
    %cst_35 = arith.constant dense<0.000000e+00> : vector<16x16xf32>
    %74 = tpu.matmul %72, %73, %cst_35 {dimension_numbers = #tpu.dot_dimension_numbers<[1], [0], [0], [1], [0, 0, 1, 1], [], []>} : vector<16x8xbf16>, vector<8x16xbf16>, vector<16x16xf32> -> vector<16x16xf32>
    %75 = vector.extract_strided_slice %25 {offsets = [0, 8], sizes = [1, 16], strides = [1, 1]} : vector<1x24xf32> to vector<1x16xf32>
    %76 = vector.broadcast %75 : vector<1x16xf32> to vector<16x16xf32>
    %77 = arith.addf %74, %76 : vector<16x16xf32>
    %78 = vector.broadcast %24 : vector<16x1xf32> to vector<16x16xf32>
    %79 = arith.mulf %77, %78 : vector<16x16xf32>
    %c0_36 = arith.constant 0 : index
    %c0_37 = arith.constant 0 : index
    %c0_38 = arith.constant 0 : index
    %80 = vector.load %arg12[%c0_36, %c0_37, %c0_38] : memref<1x16x16xf32, #tpu.memory_space<vmem>>, vector<1x16x16xf32>
    %81 = vector.shape_cast %80 : vector<1x16x16xf32> to vector<16x16xf32>
    %82 = vector.shape_cast %79 : vector<16x16xf32> to vector<1x16x16xf32>
    tpu.vector_store %arg12[%c0_36, %c0_37, %c0_38], %82 {strides = array<i32>} : memref<1x16x16xf32, #tpu.memory_space<vmem>>, vector<1x16x16xf32>,
    return
  }
  func.func @transform_0(%arg0: i32) -> (i32, i32, i32) {
    %c0_i32 = arith.constant 0 : i32
    %c0_i32_0 = arith.constant 0 : i32
    %c0_i32_1 = arith.constant 0 : i32
    return %arg0, %c0_i32, %c0_i32_0 : i32, i32, i32
  }
  func.func @transform_1(%arg0: i32) -> (i32, i32, i32) {
    %c0_i32 = arith.constant 0 : i32
    %c0_i32_0 = arith.constant 0 : i32
    %c0_i32_1 = arith.constant 0 : i32
    return %arg0, %c0_i32, %c0_i32_0 : i32, i32, i32
  }
  func.func @transform_2(%arg0: i32) -> (i32, i32, i32) {
    %c0_i32 = arith.constant 0 : i32
    %c0_i32_0 = arith.constant 0 : i32
    %c0_i32_1 = arith.constant 0 : i32
    return %arg0, %c0_i32, %c0_i32_0 : i32, i32, i32
  }
  func.func @transform_3(%arg0: i32) -> (i32, i32, i32) {
    %c0_i32 = arith.constant 0 : i32
    %c0_i32_0 = arith.constant 0 : i32
    %c0_i32_1 = arith.constant 0 : i32
    %c0_i32_2 = arith.constant 0 : i32
    return %c0_i32, %c0_i32_0, %c0_i32_1 : i32, i32, i32
  }
  func.func @transform_4(%arg0: i32) -> (i32, i32, i32) {
    %c0_i32 = arith.constant 0 : i32
    %c0_i32_0 = arith.constant 0 : i32
    %c0_i32_1 = arith.constant 0 : i32
    %c0_i32_2 = arith.constant 0 : i32
    return %c0_i32, %c0_i32_0, %c0_i32_1 : i32, i32, i32
  }
  func.func @transform_5(%arg0: i32) -> (i32, i32, i32) {
    %c0_i32 = arith.constant 0 : i32
    %c0_i32_0 = arith.constant 0 : i32
    %c0_i32_1 = arith.constant 0 : i32
    %c0_i32_2 = arith.constant 0 : i32
    return %c0_i32, %c0_i32_0, %c0_i32_1 : i32, i32, i32
  }
  func.func @transform_6(%arg0: i32) -> (i32, i32, i32) {
    %c0_i32 = arith.constant 0 : i32
    %c0_i32_0 = arith.constant 0 : i32
    %c0_i32_1 = arith.constant 0 : i32
    %c0_i32_2 = arith.constant 0 : i32
    return %c0_i32, %c0_i32_0, %c0_i32_1 : i32, i32, i32
  }
  func.func @transform_7(%arg0: i32) -> (i32, i32, i32) {
    %c0_i32 = arith.constant 0 : i32
    %c0_i32_0 = arith.constant 0 : i32
    %c0_i32_1 = arith.constant 0 : i32
    %c0_i32_2 = arith.constant 0 : i32
    return %c0_i32, %c0_i32_0, %c0_i32_1 : i32, i32, i32
  }
  func.func @transform_8(%arg0: i32) -> (i32, i32) {
    %c0_i32 = arith.constant 0 : i32
    %c0_i32_0 = arith.constant 0 : i32
    %c0_i32_1 = arith.constant 0 : i32
    return %c0_i32, %c0_i32_0 : i32, i32
  }
  func.func @transform_9(%arg0: i32) -> (i32, i32) {
    %c0_i32 = arith.constant 0 : i32
    %c0_i32_0 = arith.constant 0 : i32
    %c0_i32_1 = arith.constant 0 : i32
    return %c0_i32, %c0_i32_0 : i32, i32
  }
  func.func @transform_10(%arg0: i32) -> (i32, i32, i32) {
    %c0_i32 = arith.constant 0 : i32
    %c0_i32_0 = arith.constant 0 : i32
    %c0_i32_1 = arith.constant 0 : i32
    return %arg0, %c0_i32, %c0_i32_0 : i32, i32, i32
  }
  func.func @transform_11(%arg0: i32) -> (i32, i32, i32) {
    %c0_i32 = arith.constant 0 : i32
    %c0_i32_0 = arith.constant 0 : i32
    %c0_i32_1 = arith.constant 0 : i32
    return %arg0, %c0_i32, %c0_i32_0 : i32, i32, i32
  }
}

module attributes {stable_mosaic.version = 11 : i64} {
  func.func @_flow_kernel(%arg0: i32, %arg1: memref<1x16x16xf32, #tpu.memory_space<vmem>>, %arg2: memref<1x16x16xf32, #tpu.memory_space<vmem>>, %arg3: memref<1x16x1xf32, #tpu.memory_space<vmem>>, %arg4: memref<3x16x16xbf16, #tpu.memory_space<vmem>>, %arg5: memref<4x4x16xbf16, #tpu.memory_space<vmem>>, %arg6: memref<4x16x4xbf16, #tpu.memory_space<vmem>>, %arg7: memref<4x1x20xf32, #tpu.memory_space<vmem>>, %arg8: memref<8x16x32xbf16, #tpu.memory_space<vmem>>, %arg9: memref<24x16x32xbf16, #tpu.memory_space<vmem>>, %arg10: memref<8x16x32xbf16, #tpu.memory_space<vmem>>, %arg11: memref<8x1x64xf32, #tpu.memory_space<vmem>>, %arg12: memref<1x16xf32, #tpu.memory_space<vmem>>, %arg13: memref<1x16x8xf32, #tpu.memory_space<vmem>>) attributes {dimension_semantics = [#tpu.dimension_semantics<parallel>], iteration_bounds = array<i64: 2>, scalar_prefetch = 0 : i64, scratch_operands = 0 : i64, tpu.core_type = #tpu.core_type<tc>, window_params = [{transform_indices = @transform_0, window_bounds = array<i64: 1, 16, 16>}, {transform_indices = @transform_1, window_bounds = array<i64: 1, 16, 16>}, {transform_indices = @transform_2, window_bounds = array<i64: 1, 16, 1>}, {pipeline_mode = #tpu.pipeline_mode<synchronous>, transform_indices = @transform_3, window_bounds = array<i64: 3, 16, 16>}, {pipeline_mode = #tpu.pipeline_mode<synchronous>, transform_indices = @transform_4, window_bounds = array<i64: 4, 4, 16>}, {pipeline_mode = #tpu.pipeline_mode<synchronous>, transform_indices = @transform_5, window_bounds = array<i64: 4, 16, 4>}, {pipeline_mode = #tpu.pipeline_mode<synchronous>, transform_indices = @transform_6, window_bounds = array<i64: 4, 1, 20>}, {pipeline_mode = #tpu.pipeline_mode<synchronous>, transform_indices = @transform_7, window_bounds = array<i64: 8, 16, 32>}, {pipeline_mode = #tpu.pipeline_mode<synchronous>, transform_indices = @transform_8, window_bounds = array<i64: 24, 16, 32>}, {pipeline_mode = #tpu.pipeline_mode<synchronous>, transform_indices = @transform_9, window_bounds = array<i64: 8, 16, 32>}, {pipeline_mode = #tpu.pipeline_mode<synchronous>, transform_indices = @transform_10, window_bounds = array<i64: 8, 1, 64>}, {pipeline_mode = #tpu.pipeline_mode<synchronous>, transform_indices = @transform_11, window_bounds = array<i64: 1, 16>}, {transform_indices = @transform_12, window_bounds = array<i64: 1, 16, 8>}]} {
    %0 = tpu.iota {dimensions = array<i32: 0>} : vector<16x1xi32>
    %c1_i32 = arith.constant 1 : i32
    %1 = vector.broadcast %c1_i32 : i32 to vector<16x1xi32>
    %2 = arith.addi %0, %1 : vector<16x1xi32>
    %c0_i32 = arith.constant 0 : i32
    %3 = vector.broadcast %c0_i32 : i32 to vector<16x1xi32>
    %4 = arith.cmpi sge, %2, %3 : vector<16x1xi32>
    %c1_i32_0 = arith.constant 1 : i32
    %5 = vector.broadcast %c1_i32_0 : i32 to vector<16x1xi32>
    %6 = arith.addi %0, %5 : vector<16x1xi32>
    %c16_i32 = arith.constant 16 : i32
    %7 = vector.broadcast %c16_i32 : i32 to vector<16x1xi32>
    %8 = arith.cmpi slt, %6, %7 : vector<16x1xi32>
    %9 = arith.andi %4, %8 : vector<16x1xi1>
    %10 = arith.extui %9 : vector<16x1xi1> to vector<16x1xi32>
    %11 = arith.sitofp %10 : vector<16x1xi32> to vector<16x1xf32>
    %c-1_i32 = arith.constant -1 : i32
    %12 = vector.broadcast %c-1_i32 : i32 to vector<16x1xi32>
    %13 = arith.addi %0, %12 : vector<16x1xi32>
    %c0_i32_1 = arith.constant 0 : i32
    %14 = vector.broadcast %c0_i32_1 : i32 to vector<16x1xi32>
    %15 = arith.cmpi sge, %13, %14 : vector<16x1xi32>
    %c-1_i32_2 = arith.constant -1 : i32
    %16 = vector.broadcast %c-1_i32_2 : i32 to vector<16x1xi32>
    %17 = arith.addi %0, %16 : vector<16x1xi32>
    %c16_i32_3 = arith.constant 16 : i32
    %18 = vector.broadcast %c16_i32_3 : i32 to vector<16x1xi32>
    %19 = arith.cmpi slt, %17, %18 : vector<16x1xi32>
    %20 = arith.andi %15, %19 : vector<16x1xi1>
    %21 = arith.extui %20 : vector<16x1xi1> to vector<16x1xi32>
    %22 = arith.sitofp %21 : vector<16x1xi32> to vector<16x1xf32>
    %c0 = arith.constant 0 : index
    %c0_4 = arith.constant 0 : index
    %c0_5 = arith.constant 0 : index
    %23 = vector.load %arg3[%c0, %c0_4, %c0_5] : memref<1x16x1xf32, #tpu.memory_space<vmem>>, vector<1x16x1xf32>
    %24 = vector.shape_cast %23 : vector<1x16x1xf32> to vector<16x1xf32>
    %25 = vector.shape_cast %24 : vector<16x1xf32> to vector<16x1xf32>
    %26 = vector.broadcast %25 : vector<16x1xf32> to vector<16x16xf32>
    %27 = vector.shape_cast %24 : vector<16x1xf32> to vector<16x1xf32>
    %28 = vector.broadcast %27 : vector<16x1xf32> to vector<16x4xf32>
    %c0_6 = arith.constant 0 : index
    %c0_7 = arith.constant 0 : index
    %c0_8 = arith.constant 0 : index
    %29 = vector.load %arg2[%c0_6, %c0_7, %c0_8] : memref<1x16x16xf32, #tpu.memory_space<vmem>>, vector<1x16x16xf32>
    %30 = vector.shape_cast %29 : vector<1x16x16xf32> to vector<16x16xf32>
    %c0_9 = arith.constant 0 : index
    %c0_10 = arith.constant 0 : index
    %31 = vector.load %arg12[%c0_9, %c0_10] : memref<1x16xf32, #tpu.memory_space<vmem>>, vector<1x16xf32>
    %c1_i32_11 = arith.constant 1 : i32
    %32 = tpu.dynamic_rotate %30 by %c1_i32_11 dim 0 : vector<16x16xf32>, i32 -> vector<16x16xf32>
    %33 = vector.broadcast %22 : vector<16x1xf32> to vector<16x16xf32>
    %34 = arith.mulf %32, %33 : vector<16x16xf32>
    %35 = arith.truncf %34 : vector<16x16xf32> to vector<16x16xbf16>
    %c0_12 = arith.constant 0 : index
    %c0_13 = arith.constant 0 : index
    %c0_14 = arith.constant 0 : index
    %36 = vector.load %arg4[%c0_12, %c0_13, %c0_14] : memref<3x16x16xbf16, #tpu.memory_space<vmem>>, vector<1x16x16xbf16>
    %37 = vector.shape_cast %36 : vector<1x16x16xbf16> to vector<16x16xbf16>
    %cst = arith.constant dense<0.000000e+00> : vector<16x16xf32>
    %38 = tpu.matmul %35, %37, %cst {dimension_numbers = #tpu.dot_dimension_numbers<[1], [0], [0], [1], [0, 0, 1, 1], [], []>} : vector<16x16xbf16>, vector<16x16xbf16>, vector<16x16xf32> -> vector<16x16xf32>
    %39 = vector.broadcast %31 : vector<1x16xf32> to vector<16x16xf32>
    %40 = arith.addf %39, %38 : vector<16x16xf32>
    %41 = arith.truncf %30 : vector<16x16xf32> to vector<16x16xbf16>
    %c1 = arith.constant 1 : index
    %c0_15 = arith.constant 0 : index
    %c0_16 = arith.constant 0 : index
    %42 = vector.load %arg4[%c1, %c0_15, %c0_16] : memref<3x16x16xbf16, #tpu.memory_space<vmem>>, vector<1x16x16xbf16>
    %43 = vector.shape_cast %42 : vector<1x16x16xbf16> to vector<16x16xbf16>
    %cst_17 = arith.constant dense<0.000000e+00> : vector<16x16xf32>
    %44 = tpu.matmul %41, %43, %cst_17 {dimension_numbers = #tpu.dot_dimension_numbers<[1], [0], [0], [1], [0, 0, 1, 1], [], []>} : vector<16x16xbf16>, vector<16x16xbf16>, vector<16x16xf32> -> vector<16x16xf32>
    %45 = arith.addf %40, %44 : vector<16x16xf32>
    %c15_i32 = arith.constant 15 : i32
    %46 = tpu.dynamic_rotate %30 by %c15_i32 dim 0 : vector<16x16xf32>, i32 -> vector<16x16xf32>
    %47 = vector.broadcast %11 : vector<16x1xf32> to vector<16x16xf32>
    %48 = arith.mulf %46, %47 : vector<16x16xf32>
    %49 = arith.truncf %48 : vector<16x16xf32> to vector<16x16xbf16>
    %c2 = arith.constant 2 : index
    %c0_18 = arith.constant 0 : index
    %c0_19 = arith.constant 0 : index
    %50 = vector.load %arg4[%c2, %c0_18, %c0_19] : memref<3x16x16xbf16, #tpu.memory_space<vmem>>, vector<1x16x16xbf16>
    %51 = vector.shape_cast %50 : vector<1x16x16xbf16> to vector<16x16xbf16>
    %cst_20 = arith.constant dense<0.000000e+00> : vector<16x16xf32>
    %52 = tpu.matmul %49, %51, %cst_20 {dimension_numbers = #tpu.dot_dimension_numbers<[1], [0], [0], [1], [0, 0, 1, 1], [], []>} : vector<16x16xbf16>, vector<16x16xbf16>, vector<16x16xf32> -> vector<16x16xf32>
    %53 = arith.addf %45, %52 : vector<16x16xf32>
    %54 = arith.truncf %53 : vector<16x16xf32> to vector<16x16xbf16>
    %c0_21 = arith.constant 0 : index
    %c0_22 = arith.constant 0 : index
    %c0_23 = arith.constant 0 : index
    %55 = vector.load %arg1[%c0_21, %c0_22, %c0_23] : memref<1x16x16xf32, #tpu.memory_space<vmem>>, vector<1x16x16xf32>
    %56 = vector.shape_cast %55 : vector<1x16x16xf32> to vector<16x16xf32>
    %57 = vector.extract_strided_slice %56 {offsets = [0, 0], sizes = [16, 4], strides = [1, 1]} : vector<16x16xf32> to vector<16x4xf32>
    %58 = vector.extract_strided_slice %56 {offsets = [0, 4], sizes = [16, 4], strides = [1, 1]} : vector<16x16xf32> to vector<16x4xf32>
    %c0_24 = arith.constant 0 : index
    %c0_25 = arith.constant 0 : index
    %c0_26 = arith.constant 0 : index
    %59 = vector.load %arg7[%c0_24, %c0_25, %c0_26] : memref<4x1x20xf32, #tpu.memory_space<vmem>>, vector<1x1x20xf32>
    %60 = vector.shape_cast %59 : vector<1x1x20xf32> to vector<1x20xf32>
    %61 = arith.truncf %57 : vector<16x4xf32> to vector<16x4xbf16>
    %c0_27 = arith.constant 0 : index
    %c0_28 = arith.constant 0 : index
    %c0_29 = arith.constant 0 : index
    %62 = vector.load %arg5[%c0_27, %c0_28, %c0_29] : memref<4x4x16xbf16, #tpu.memory_space<vmem>>, vector<1x4x16xbf16>
    %63 = vector.shape_cast %62 : vector<1x4x16xbf16> to vector<4x16xbf16>
    %cst_30 = arith.constant dense<0.000000e+00> : vector<16x16xf32>
    %64 = tpu.matmul %61, %63, %cst_30 {dimension_numbers = #tpu.dot_dimension_numbers<[1], [0], [0], [1], [0, 0, 1, 1], [], []>} : vector<16x4xbf16>, vector<4x16xbf16>, vector<16x16xf32> -> vector<16x16xf32>
    %65 = vector.extract_strided_slice %60 {offsets = [0, 0], sizes = [1, 16], strides = [1, 1]} : vector<1x20xf32> to vector<1x16xf32>
    %66 = vector.broadcast %65 : vector<1x16xf32> to vector<16x16xf32>
    %67 = arith.addf %64, %66 : vector<16x16xf32>
    %68 = arith.mulf %67, %26 : vector<16x16xf32>
    %cst_31 = arith.constant 0.000000e+00 : f32
    %69 = vector.broadcast %cst_31 : f32 to vector<16x16xf32>
    %c0_i32_32 = arith.constant 0 : i32
    %c2_i32 = arith.constant 2 : i32
    %70 = arith.addi %c0_i32_32, %c2_i32 : i32
    %c1_i32_33 = arith.constant 1 : i32
    %71:2 = scf.for %arg14 = %c0_i32_32 to %70 step %c1_i32_33 iter_args(%arg15 = %68, %arg16 = %69) -> (vector<16x16xf32>, vector<16x16xf32>)  : i32 {
      %c0_i32_89 = arith.constant 0 : i32
      %159 = arith.addi %c0_i32_89, %arg14 : i32
      %160 = arith.index_cast %159 : i32 to index
      %c0_90 = arith.constant 0 : index
      %c0_91 = arith.constant 0 : index
      %161 = vector.load %arg11[%160, %c0_90, %c0_91] : memref<8x1x64xf32, #tpu.memory_space<vmem>>, vector<1x1x64xf32>
      %162 = vector.shape_cast %161 : vector<1x1x64xf32> to vector<1x64xf32>
      %163 = vector.extract_strided_slice %162 {offsets = [0, 0], sizes = [1, 32], strides = [1, 1]} : vector<1x64xf32> to vector<1x32xf32>
      %164 = arith.index_cast %159 : i32 to index
      %c0_92 = arith.constant 0 : index
      %c0_93 = arith.constant 0 : index
      %165 = vector.load %arg8[%164, %c0_92, %c0_93] : memref<8x16x32xbf16, #tpu.memory_space<vmem>>, vector<1x16x32xbf16>
      %166 = vector.shape_cast %165 : vector<1x16x32xbf16> to vector<16x32xbf16>
      %cst_94 = arith.constant dense<0.000000e+00> : vector<16x32xf32>
      %167 = tpu.matmul %54, %166, %cst_94 {dimension_numbers = #tpu.dot_dimension_numbers<[1], [0], [0], [1], [0, 0, 1, 1], [], []>} : vector<16x16xbf16>, vector<16x32xbf16>, vector<16x32xf32> -> vector<16x32xf32>
      %168 = vector.broadcast %163 : vector<1x32xf32> to vector<16x32xf32>
      %169 = arith.addf %168, %167 : vector<16x32xf32>
      %c1_i32_95 = arith.constant 1 : i32
      %170 = tpu.dynamic_rotate %arg15 by %c1_i32_95 dim 0 : vector<16x16xf32>, i32 -> vector<16x16xf32>
      %171 = vector.broadcast %22 : vector<16x1xf32> to vector<16x16xf32>
      %172 = arith.mulf %170, %171 : vector<16x16xf32>
      %173 = arith.truncf %172 : vector<16x16xf32> to vector<16x16xbf16>
      %c3_i32 = arith.constant 3 : i32
      %174 = arith.muli %159, %c3_i32 : i32
      %c0_i32_96 = arith.constant 0 : i32
      %175 = arith.addi %174, %c0_i32_96 : i32
      %176 = arith.index_cast %175 : i32 to index
      %c0_97 = arith.constant 0 : index
      %c0_98 = arith.constant 0 : index
      %177 = vector.load %arg9[%176, %c0_97, %c0_98] : memref<24x16x32xbf16, #tpu.memory_space<vmem>>, vector<1x16x32xbf16>
      %178 = vector.shape_cast %177 : vector<1x16x32xbf16> to vector<16x32xbf16>
      %cst_99 = arith.constant dense<0.000000e+00> : vector<16x32xf32>
      %179 = tpu.matmul %173, %178, %cst_99 {dimension_numbers = #tpu.dot_dimension_numbers<[1], [0], [0], [1], [0, 0, 1, 1], [], []>} : vector<16x16xbf16>, vector<16x32xbf16>, vector<16x32xf32> -> vector<16x32xf32>
      %180 = arith.addf %169, %179 : vector<16x32xf32>
      %181 = arith.truncf %arg15 : vector<16x16xf32> to vector<16x16xbf16>
      %c3_i32_100 = arith.constant 3 : i32
      %182 = arith.muli %159, %c3_i32_100 : i32
      %c1_i32_101 = arith.constant 1 : i32
      %183 = arith.addi %182, %c1_i32_101 : i32
      %184 = arith.index_cast %183 : i32 to index
      %c0_102 = arith.constant 0 : index
      %c0_103 = arith.constant 0 : index
      %185 = vector.load %arg9[%184, %c0_102, %c0_103] : memref<24x16x32xbf16, #tpu.memory_space<vmem>>, vector<1x16x32xbf16>
      %186 = vector.shape_cast %185 : vector<1x16x32xbf16> to vector<16x32xbf16>
      %cst_104 = arith.constant dense<0.000000e+00> : vector<16x32xf32>
      %187 = tpu.matmul %181, %186, %cst_104 {dimension_numbers = #tpu.dot_dimension_numbers<[1], [0], [0], [1], [0, 0, 1, 1], [], []>} : vector<16x16xbf16>, vector<16x32xbf16>, vector<16x32xf32> -> vector<16x32xf32>
      %188 = arith.addf %180, %187 : vector<16x32xf32>
      %c15_i32_105 = arith.constant 15 : i32
      %189 = tpu.dynamic_rotate %arg15 by %c15_i32_105 dim 0 : vector<16x16xf32>, i32 -> vector<16x16xf32>
      %190 = vector.broadcast %11 : vector<16x1xf32> to vector<16x16xf32>
      %191 = arith.mulf %189, %190 : vector<16x16xf32>
      %192 = arith.truncf %191 : vector<16x16xf32> to vector<16x16xbf16>
      %c3_i32_106 = arith.constant 3 : i32
      %193 = arith.muli %159, %c3_i32_106 : i32
      %c2_i32_107 = arith.constant 2 : i32
      %194 = arith.addi %193, %c2_i32_107 : i32
      %195 = arith.index_cast %194 : i32 to index
      %c0_108 = arith.constant 0 : index
      %c0_109 = arith.constant 0 : index
      %196 = vector.load %arg9[%195, %c0_108, %c0_109] : memref<24x16x32xbf16, #tpu.memory_space<vmem>>, vector<1x16x32xbf16>
      %197 = vector.shape_cast %196 : vector<1x16x32xbf16> to vector<16x32xbf16>
      %cst_110 = arith.constant dense<0.000000e+00> : vector<16x32xf32>
      %198 = tpu.matmul %192, %197, %cst_110 {dimension_numbers = #tpu.dot_dimension_numbers<[1], [0], [0], [1], [0, 0, 1, 1], [], []>} : vector<16x16xbf16>, vector<16x32xbf16>, vector<16x32xf32> -> vector<16x32xf32>
      %199 = arith.addf %188, %198 : vector<16x32xf32>
      %200 = vector.extract_strided_slice %199 {offsets = [0, 0], sizes = [16, 16], strides = [1, 1]} : vector<16x32xf32> to vector<16x16xf32>
      %201 = math.tanh %200 : vector<16x16xf32>
      %202 = vector.extract_strided_slice %199 {offsets = [0, 16], sizes = [16, 16], strides = [1, 1]} : vector<16x32xf32> to vector<16x16xf32>
      %203 = arith.negf %202 : vector<16x16xf32>
      %204 = math.exp %203 : vector<16x16xf32>
      %cst_111 = arith.constant 1.000000e+00 : f32
      %205 = vector.broadcast %cst_111 : f32 to vector<16x16xf32>
      %206 = arith.addf %205, %204 : vector<16x16xf32>
      %207 = arith.divf %205, %206 : vector<16x16xf32>
      %208 = arith.mulf %201, %207 : vector<16x16xf32>
      %209 = arith.truncf %208 : vector<16x16xf32> to vector<16x16xbf16>
      %210 = arith.index_cast %159 : i32 to index
      %c0_112 = arith.constant 0 : index
      %c0_113 = arith.constant 0 : index
      %211 = vector.load %arg10[%210, %c0_112, %c0_113] : memref<8x16x32xbf16, #tpu.memory_space<vmem>>, vector<1x16x32xbf16>
      %212 = vector.shape_cast %211 : vector<1x16x32xbf16> to vector<16x32xbf16>
      %cst_114 = arith.constant dense<0.000000e+00> : vector<16x32xf32>
      %213 = tpu.matmul %209, %212, %cst_114 {dimension_numbers = #tpu.dot_dimension_numbers<[1], [0], [0], [1], [0, 0, 1, 1], [], []>} : vector<16x16xbf16>, vector<16x32xbf16>, vector<16x32xf32> -> vector<16x32xf32>
      %214 = vector.extract_strided_slice %162 {offsets = [0, 32], sizes = [1, 32], strides = [1, 1]} : vector<1x64xf32> to vector<1x32xf32>
      %215 = vector.broadcast %214 : vector<1x32xf32> to vector<16x32xf32>
      %216 = arith.addf %213, %215 : vector<16x32xf32>
      %217 = vector.extract_strided_slice %216 {offsets = [0, 0], sizes = [16, 16], strides = [1, 1]} : vector<16x32xf32> to vector<16x16xf32>
      %218 = arith.addf %arg15, %217 : vector<16x16xf32>
      %219 = arith.mulf %218, %26 : vector<16x16xf32>
      %220 = vector.extract_strided_slice %216 {offsets = [0, 16], sizes = [16, 16], strides = [1, 1]} : vector<16x32xf32> to vector<16x16xf32>
      %221 = arith.addf %arg16, %220 : vector<16x16xf32>
      scf.yield %219, %221 : vector<16x16xf32>, vector<16x16xf32>
    }
    %c2_i32_34 = arith.constant 2 : i32
    %72 = arith.mulf %71#1, %26 : vector<16x16xf32>
    %73 = arith.truncf %72 : vector<16x16xf32> to vector<16x16xbf16>
    %c0_35 = arith.constant 0 : index
    %c0_36 = arith.constant 0 : index
    %c0_37 = arith.constant 0 : index
    %74 = vector.load %arg6[%c0_35, %c0_36, %c0_37] : memref<4x16x4xbf16, #tpu.memory_space<vmem>>, vector<1x16x4xbf16>
    %75 = vector.shape_cast %74 : vector<1x16x4xbf16> to vector<16x4xbf16>
    %cst_38 = arith.constant dense<0.000000e+00> : vector<16x4xf32>
    %76 = tpu.matmul %73, %75, %cst_38 {dimension_numbers = #tpu.dot_dimension_numbers<[1], [0], [0], [1], [0, 0, 1, 1], [], []>} : vector<16x16xbf16>, vector<16x4xbf16>, vector<16x4xf32> -> vector<16x4xf32>
    %77 = vector.extract_strided_slice %60 {offsets = [0, 16], sizes = [1, 4], strides = [1, 1]} : vector<1x20xf32> to vector<1x4xf32>
    %78 = vector.broadcast %77 : vector<1x4xf32> to vector<16x4xf32>
    %79 = arith.addf %76, %78 : vector<16x4xf32>
    %80 = arith.mulf %79, %28 : vector<16x4xf32>
    %81 = arith.mulf %58, %28 : vector<16x4xf32>
    %82 = arith.addf %80, %81 : vector<16x4xf32>
    %c1_39 = arith.constant 1 : index
    %c0_40 = arith.constant 0 : index
    %c0_41 = arith.constant 0 : index
    %83 = vector.load %arg7[%c1_39, %c0_40, %c0_41] : memref<4x1x20xf32, #tpu.memory_space<vmem>>, vector<1x1x20xf32>
    %84 = vector.shape_cast %83 : vector<1x1x20xf32> to vector<1x20xf32>
    %85 = arith.truncf %82 : vector<16x4xf32> to vector<16x4xbf16>
    %c1_42 = arith.constant 1 : index
    %c0_43 = arith.constant 0 : index
    %c0_44 = arith.constant 0 : index
    %86 = vector.load %arg5[%c1_42, %c0_43, %c0_44] : memref<4x4x16xbf16, #tpu.memory_space<vmem>>, vector<1x4x16xbf16>
    %87 = vector.shape_cast %86 : vector<1x4x16xbf16> to vector<4x16xbf16>
    %cst_45 = arith.constant dense<0.000000e+00> : vector<16x16xf32>
    %88 = tpu.matmul %85, %87, %cst_45 {dimension_numbers = #tpu.dot_dimension_numbers<[1], [0], [0], [1], [0, 0, 1, 1], [], []>} : vector<16x4xbf16>, vector<4x16xbf16>, vector<16x16xf32> -> vector<16x16xf32>
    %89 = vector.extract_strided_slice %84 {offsets = [0, 0], sizes = [1, 16], strides = [1, 1]} : vector<1x20xf32> to vector<1x16xf32>
    %90 = vector.broadcast %89 : vector<1x16xf32> to vector<16x16xf32>
    %91 = arith.addf %88, %90 : vector<16x16xf32>
    %92 = arith.mulf %91, %26 : vector<16x16xf32>
    %cst_46 = arith.constant 0.000000e+00 : f32
    %93 = vector.broadcast %cst_46 : f32 to vector<16x16xf32>
    %c0_i32_47 = arith.constant 0 : i32
    %c2_i32_48 = arith.constant 2 : i32
    %94 = arith.addi %c0_i32_47, %c2_i32_48 : i32
    %c1_i32_49 = arith.constant 1 : i32
    %95:2 = scf.for %arg14 = %c0_i32_47 to %94 step %c1_i32_49 iter_args(%arg15 = %92, %arg16 = %93) -> (vector<16x16xf32>, vector<16x16xf32>)  : i32 {
      %c2_i32_89 = arith.constant 2 : i32
      %159 = arith.addi %c2_i32_89, %arg14 : i32
      %160 = arith.index_cast %159 : i32 to index
      %c0_90 = arith.constant 0 : index
      %c0_91 = arith.constant 0 : index
      %161 = vector.load %arg11[%160, %c0_90, %c0_91] : memref<8x1x64xf32, #tpu.memory_space<vmem>>, vector<1x1x64xf32>
      %162 = vector.shape_cast %161 : vector<1x1x64xf32> to vector<1x64xf32>
      %163 = vector.extract_strided_slice %162 {offsets = [0, 0], sizes = [1, 32], strides = [1, 1]} : vector<1x64xf32> to vector<1x32xf32>
      %164 = arith.index_cast %159 : i32 to index
      %c0_92 = arith.constant 0 : index
      %c0_93 = arith.constant 0 : index
      %165 = vector.load %arg8[%164, %c0_92, %c0_93] : memref<8x16x32xbf16, #tpu.memory_space<vmem>>, vector<1x16x32xbf16>
      %166 = vector.shape_cast %165 : vector<1x16x32xbf16> to vector<16x32xbf16>
      %cst_94 = arith.constant dense<0.000000e+00> : vector<16x32xf32>
      %167 = tpu.matmul %54, %166, %cst_94 {dimension_numbers = #tpu.dot_dimension_numbers<[1], [0], [0], [1], [0, 0, 1, 1], [], []>} : vector<16x16xbf16>, vector<16x32xbf16>, vector<16x32xf32> -> vector<16x32xf32>
      %168 = vector.broadcast %163 : vector<1x32xf32> to vector<16x32xf32>
      %169 = arith.addf %168, %167 : vector<16x32xf32>
      %c1_i32_95 = arith.constant 1 : i32
      %170 = tpu.dynamic_rotate %arg15 by %c1_i32_95 dim 0 : vector<16x16xf32>, i32 -> vector<16x16xf32>
      %171 = vector.broadcast %22 : vector<16x1xf32> to vector<16x16xf32>
      %172 = arith.mulf %170, %171 : vector<16x16xf32>
      %173 = arith.truncf %172 : vector<16x16xf32> to vector<16x16xbf16>
      %c3_i32 = arith.constant 3 : i32
      %174 = arith.muli %159, %c3_i32 : i32
      %c0_i32_96 = arith.constant 0 : i32
      %175 = arith.addi %174, %c0_i32_96 : i32
      %176 = arith.index_cast %175 : i32 to index
      %c0_97 = arith.constant 0 : index
      %c0_98 = arith.constant 0 : index
      %177 = vector.load %arg9[%176, %c0_97, %c0_98] : memref<24x16x32xbf16, #tpu.memory_space<vmem>>, vector<1x16x32xbf16>
      %178 = vector.shape_cast %177 : vector<1x16x32xbf16> to vector<16x32xbf16>
      %cst_99 = arith.constant dense<0.000000e+00> : vector<16x32xf32>
      %179 = tpu.matmul %173, %178, %cst_99 {dimension_numbers = #tpu.dot_dimension_numbers<[1], [0], [0], [1], [0, 0, 1, 1], [], []>} : vector<16x16xbf16>, vector<16x32xbf16>, vector<16x32xf32> -> vector<16x32xf32>
      %180 = arith.addf %169, %179 : vector<16x32xf32>
      %181 = arith.truncf %arg15 : vector<16x16xf32> to vector<16x16xbf16>
      %c3_i32_100 = arith.constant 3 : i32
      %182 = arith.muli %159, %c3_i32_100 : i32
      %c1_i32_101 = arith.constant 1 : i32
      %183 = arith.addi %182, %c1_i32_101 : i32
      %184 = arith.index_cast %183 : i32 to index
      %c0_102 = arith.constant 0 : index
      %c0_103 = arith.constant 0 : index
      %185 = vector.load %arg9[%184, %c0_102, %c0_103] : memref<24x16x32xbf16, #tpu.memory_space<vmem>>, vector<1x16x32xbf16>
      %186 = vector.shape_cast %185 : vector<1x16x32xbf16> to vector<16x32xbf16>
      %cst_104 = arith.constant dense<0.000000e+00> : vector<16x32xf32>
      %187 = tpu.matmul %181, %186, %cst_104 {dimension_numbers = #tpu.dot_dimension_numbers<[1], [0], [0], [1], [0, 0, 1, 1], [], []>} : vector<16x16xbf16>, vector<16x32xbf16>, vector<16x32xf32> -> vector<16x32xf32>
      %188 = arith.addf %180, %187 : vector<16x32xf32>
      %c15_i32_105 = arith.constant 15 : i32
      %189 = tpu.dynamic_rotate %arg15 by %c15_i32_105 dim 0 : vector<16x16xf32>, i32 -> vector<16x16xf32>
      %190 = vector.broadcast %11 : vector<16x1xf32> to vector<16x16xf32>
      %191 = arith.mulf %189, %190 : vector<16x16xf32>
      %192 = arith.truncf %191 : vector<16x16xf32> to vector<16x16xbf16>
      %c3_i32_106 = arith.constant 3 : i32
      %193 = arith.muli %159, %c3_i32_106 : i32
      %c2_i32_107 = arith.constant 2 : i32
      %194 = arith.addi %193, %c2_i32_107 : i32
      %195 = arith.index_cast %194 : i32 to index
      %c0_108 = arith.constant 0 : index
      %c0_109 = arith.constant 0 : index
      %196 = vector.load %arg9[%195, %c0_108, %c0_109] : memref<24x16x32xbf16, #tpu.memory_space<vmem>>, vector<1x16x32xbf16>
      %197 = vector.shape_cast %196 : vector<1x16x32xbf16> to vector<16x32xbf16>
      %cst_110 = arith.constant dense<0.000000e+00> : vector<16x32xf32>
      %198 = tpu.matmul %192, %197, %cst_110 {dimension_numbers = #tpu.dot_dimension_numbers<[1], [0], [0], [1], [0, 0, 1, 1], [], []>} : vector<16x16xbf16>, vector<16x32xbf16>, vector<16x32xf32> -> vector<16x32xf32>
      %199 = arith.addf %188, %198 : vector<16x32xf32>
      %200 = vector.extract_strided_slice %199 {offsets = [0, 0], sizes = [16, 16], strides = [1, 1]} : vector<16x32xf32> to vector<16x16xf32>
      %201 = math.tanh %200 : vector<16x16xf32>
      %202 = vector.extract_strided_slice %199 {offsets = [0, 16], sizes = [16, 16], strides = [1, 1]} : vector<16x32xf32> to vector<16x16xf32>
      %203 = arith.negf %202 : vector<16x16xf32>
      %204 = math.exp %203 : vector<16x16xf32>
      %cst_111 = arith.constant 1.000000e+00 : f32
      %205 = vector.broadcast %cst_111 : f32 to vector<16x16xf32>
      %206 = arith.addf %205, %204 : vector<16x16xf32>
      %207 = arith.divf %205, %206 : vector<16x16xf32>
      %208 = arith.mulf %201, %207 : vector<16x16xf32>
      %209 = arith.truncf %208 : vector<16x16xf32> to vector<16x16xbf16>
      %210 = arith.index_cast %159 : i32 to index
      %c0_112 = arith.constant 0 : index
      %c0_113 = arith.constant 0 : index
      %211 = vector.load %arg10[%210, %c0_112, %c0_113] : memref<8x16x32xbf16, #tpu.memory_space<vmem>>, vector<1x16x32xbf16>
      %212 = vector.shape_cast %211 : vector<1x16x32xbf16> to vector<16x32xbf16>
      %cst_114 = arith.constant dense<0.000000e+00> : vector<16x32xf32>
      %213 = tpu.matmul %209, %212, %cst_114 {dimension_numbers = #tpu.dot_dimension_numbers<[1], [0], [0], [1], [0, 0, 1, 1], [], []>} : vector<16x16xbf16>, vector<16x32xbf16>, vector<16x32xf32> -> vector<16x32xf32>
      %214 = vector.extract_strided_slice %162 {offsets = [0, 32], sizes = [1, 32], strides = [1, 1]} : vector<1x64xf32> to vector<1x32xf32>
      %215 = vector.broadcast %214 : vector<1x32xf32> to vector<16x32xf32>
      %216 = arith.addf %213, %215 : vector<16x32xf32>
      %217 = vector.extract_strided_slice %216 {offsets = [0, 0], sizes = [16, 16], strides = [1, 1]} : vector<16x32xf32> to vector<16x16xf32>
      %218 = arith.addf %arg15, %217 : vector<16x16xf32>
      %219 = arith.mulf %218, %26 : vector<16x16xf32>
      %220 = vector.extract_strided_slice %216 {offsets = [0, 16], sizes = [16, 16], strides = [1, 1]} : vector<16x32xf32> to vector<16x16xf32>
      %221 = arith.addf %arg16, %220 : vector<16x16xf32>
      scf.yield %219, %221 : vector<16x16xf32>, vector<16x16xf32>
    }
    %c2_i32_50 = arith.constant 2 : i32
    %96 = arith.mulf %95#1, %26 : vector<16x16xf32>
    %97 = arith.truncf %96 : vector<16x16xf32> to vector<16x16xbf16>
    %c1_51 = arith.constant 1 : index
    %c0_52 = arith.constant 0 : index
    %c0_53 = arith.constant 0 : index
    %98 = vector.load %arg6[%c1_51, %c0_52, %c0_53] : memref<4x16x4xbf16, #tpu.memory_space<vmem>>, vector<1x16x4xbf16>
    %99 = vector.shape_cast %98 : vector<1x16x4xbf16> to vector<16x4xbf16>
    %cst_54 = arith.constant dense<0.000000e+00> : vector<16x4xf32>
    %100 = tpu.matmul %97, %99, %cst_54 {dimension_numbers = #tpu.dot_dimension_numbers<[1], [0], [0], [1], [0, 0, 1, 1], [], []>} : vector<16x16xbf16>, vector<16x4xbf16>, vector<16x4xf32> -> vector<16x4xf32>
    %101 = vector.extract_strided_slice %84 {offsets = [0, 16], sizes = [1, 4], strides = [1, 1]} : vector<1x20xf32> to vector<1x4xf32>
    %102 = vector.broadcast %101 : vector<1x4xf32> to vector<16x4xf32>
    %103 = arith.addf %100, %102 : vector<16x4xf32>
    %104 = arith.mulf %103, %28 : vector<16x4xf32>
    %105 = arith.mulf %57, %28 : vector<16x4xf32>
    %106 = arith.addf %104, %105 : vector<16x4xf32>
    %c2_55 = arith.constant 2 : index
    %c0_56 = arith.constant 0 : index
    %c0_57 = arith.constant 0 : index
    %107 = vector.load %arg7[%c2_55, %c0_56, %c0_57] : memref<4x1x20xf32, #tpu.memory_space<vmem>>, vector<1x1x20xf32>
    %108 = vector.shape_cast %107 : vector<1x1x20xf32> to vector<1x20xf32>
    %109 = arith.truncf %106 : vector<16x4xf32> to vector<16x4xbf16>
    %c2_58 = arith.constant 2 : index
    %c0_59 = arith.constant 0 : index
    %c0_60 = arith.constant 0 : index
    %110 = vector.load %arg5[%c2_58, %c0_59, %c0_60] : memref<4x4x16xbf16, #tpu.memory_space<vmem>>, vector<1x4x16xbf16>
    %111 = vector.shape_cast %110 : vector<1x4x16xbf16> to vector<4x16xbf16>
    %cst_61 = arith.constant dense<0.000000e+00> : vector<16x16xf32>
    %112 = tpu.matmul %109, %111, %cst_61 {dimension_numbers = #tpu.dot_dimension_numbers<[1], [0], [0], [1], [0, 0, 1, 1], [], []>} : vector<16x4xbf16>, vector<4x16xbf16>, vector<16x16xf32> -> vector<16x16xf32>
    %113 = vector.extract_strided_slice %108 {offsets = [0, 0], sizes = [1, 16], strides = [1, 1]} : vector<1x20xf32> to vector<1x16xf32>
    %114 = vector.broadcast %113 : vector<1x16xf32> to vector<16x16xf32>
    %115 = arith.addf %112, %114 : vector<16x16xf32>
    %116 = arith.mulf %115, %26 : vector<16x16xf32>
    %cst_62 = arith.constant 0.000000e+00 : f32
    %117 = vector.broadcast %cst_62 : f32 to vector<16x16xf32>
    %c0_i32_63 = arith.constant 0 : i32
    %c2_i32_64 = arith.constant 2 : i32
    %118 = arith.addi %c0_i32_63, %c2_i32_64 : i32
    %c1_i32_65 = arith.constant 1 : i32
    %119:2 = scf.for %arg14 = %c0_i32_63 to %118 step %c1_i32_65 iter_args(%arg15 = %116, %arg16 = %117) -> (vector<16x16xf32>, vector<16x16xf32>)  : i32 {
      %c4_i32 = arith.constant 4 : i32
      %159 = arith.addi %c4_i32, %arg14 : i32
      %160 = arith.index_cast %159 : i32 to index
      %c0_89 = arith.constant 0 : index
      %c0_90 = arith.constant 0 : index
      %161 = vector.load %arg11[%160, %c0_89, %c0_90] : memref<8x1x64xf32, #tpu.memory_space<vmem>>, vector<1x1x64xf32>
      %162 = vector.shape_cast %161 : vector<1x1x64xf32> to vector<1x64xf32>
      %163 = vector.extract_strided_slice %162 {offsets = [0, 0], sizes = [1, 32], strides = [1, 1]} : vector<1x64xf32> to vector<1x32xf32>
      %164 = arith.index_cast %159 : i32 to index
      %c0_91 = arith.constant 0 : index
      %c0_92 = arith.constant 0 : index
      %165 = vector.load %arg8[%164, %c0_91, %c0_92] : memref<8x16x32xbf16, #tpu.memory_space<vmem>>, vector<1x16x32xbf16>
      %166 = vector.shape_cast %165 : vector<1x16x32xbf16> to vector<16x32xbf16>
      %cst_93 = arith.constant dense<0.000000e+00> : vector<16x32xf32>
      %167 = tpu.matmul %54, %166, %cst_93 {dimension_numbers = #tpu.dot_dimension_numbers<[1], [0], [0], [1], [0, 0, 1, 1], [], []>} : vector<16x16xbf16>, vector<16x32xbf16>, vector<16x32xf32> -> vector<16x32xf32>
      %168 = vector.broadcast %163 : vector<1x32xf32> to vector<16x32xf32>
      %169 = arith.addf %168, %167 : vector<16x32xf32>
      %c1_i32_94 = arith.constant 1 : i32
      %170 = tpu.dynamic_rotate %arg15 by %c1_i32_94 dim 0 : vector<16x16xf32>, i32 -> vector<16x16xf32>
      %171 = vector.broadcast %22 : vector<16x1xf32> to vector<16x16xf32>
      %172 = arith.mulf %170, %171 : vector<16x16xf32>
      %173 = arith.truncf %172 : vector<16x16xf32> to vector<16x16xbf16>
      %c3_i32 = arith.constant 3 : i32
      %174 = arith.muli %159, %c3_i32 : i32
      %c0_i32_95 = arith.constant 0 : i32
      %175 = arith.addi %174, %c0_i32_95 : i32
      %176 = arith.index_cast %175 : i32 to index
      %c0_96 = arith.constant 0 : index
      %c0_97 = arith.constant 0 : index
      %177 = vector.load %arg9[%176, %c0_96, %c0_97] : memref<24x16x32xbf16, #tpu.memory_space<vmem>>, vector<1x16x32xbf16>
      %178 = vector.shape_cast %177 : vector<1x16x32xbf16> to vector<16x32xbf16>
      %cst_98 = arith.constant dense<0.000000e+00> : vector<16x32xf32>
      %179 = tpu.matmul %173, %178, %cst_98 {dimension_numbers = #tpu.dot_dimension_numbers<[1], [0], [0], [1], [0, 0, 1, 1], [], []>} : vector<16x16xbf16>, vector<16x32xbf16>, vector<16x32xf32> -> vector<16x32xf32>
      %180 = arith.addf %169, %179 : vector<16x32xf32>
      %181 = arith.truncf %arg15 : vector<16x16xf32> to vector<16x16xbf16>
      %c3_i32_99 = arith.constant 3 : i32
      %182 = arith.muli %159, %c3_i32_99 : i32
      %c1_i32_100 = arith.constant 1 : i32
      %183 = arith.addi %182, %c1_i32_100 : i32
      %184 = arith.index_cast %183 : i32 to index
      %c0_101 = arith.constant 0 : index
      %c0_102 = arith.constant 0 : index
      %185 = vector.load %arg9[%184, %c0_101, %c0_102] : memref<24x16x32xbf16, #tpu.memory_space<vmem>>, vector<1x16x32xbf16>
      %186 = vector.shape_cast %185 : vector<1x16x32xbf16> to vector<16x32xbf16>
      %cst_103 = arith.constant dense<0.000000e+00> : vector<16x32xf32>
      %187 = tpu.matmul %181, %186, %cst_103 {dimension_numbers = #tpu.dot_dimension_numbers<[1], [0], [0], [1], [0, 0, 1, 1], [], []>} : vector<16x16xbf16>, vector<16x32xbf16>, vector<16x32xf32> -> vector<16x32xf32>
      %188 = arith.addf %180, %187 : vector<16x32xf32>
      %c15_i32_104 = arith.constant 15 : i32
      %189 = tpu.dynamic_rotate %arg15 by %c15_i32_104 dim 0 : vector<16x16xf32>, i32 -> vector<16x16xf32>
      %190 = vector.broadcast %11 : vector<16x1xf32> to vector<16x16xf32>
      %191 = arith.mulf %189, %190 : vector<16x16xf32>
      %192 = arith.truncf %191 : vector<16x16xf32> to vector<16x16xbf16>
      %c3_i32_105 = arith.constant 3 : i32
      %193 = arith.muli %159, %c3_i32_105 : i32
      %c2_i32_106 = arith.constant 2 : i32
      %194 = arith.addi %193, %c2_i32_106 : i32
      %195 = arith.index_cast %194 : i32 to index
      %c0_107 = arith.constant 0 : index
      %c0_108 = arith.constant 0 : index
      %196 = vector.load %arg9[%195, %c0_107, %c0_108] : memref<24x16x32xbf16, #tpu.memory_space<vmem>>, vector<1x16x32xbf16>
      %197 = vector.shape_cast %196 : vector<1x16x32xbf16> to vector<16x32xbf16>
      %cst_109 = arith.constant dense<0.000000e+00> : vector<16x32xf32>
      %198 = tpu.matmul %192, %197, %cst_109 {dimension_numbers = #tpu.dot_dimension_numbers<[1], [0], [0], [1], [0, 0, 1, 1], [], []>} : vector<16x16xbf16>, vector<16x32xbf16>, vector<16x32xf32> -> vector<16x32xf32>
      %199 = arith.addf %188, %198 : vector<16x32xf32>
      %200 = vector.extract_strided_slice %199 {offsets = [0, 0], sizes = [16, 16], strides = [1, 1]} : vector<16x32xf32> to vector<16x16xf32>
      %201 = math.tanh %200 : vector<16x16xf32>
      %202 = vector.extract_strided_slice %199 {offsets = [0, 16], sizes = [16, 16], strides = [1, 1]} : vector<16x32xf32> to vector<16x16xf32>
      %203 = arith.negf %202 : vector<16x16xf32>
      %204 = math.exp %203 : vector<16x16xf32>
      %cst_110 = arith.constant 1.000000e+00 : f32
      %205 = vector.broadcast %cst_110 : f32 to vector<16x16xf32>
      %206 = arith.addf %205, %204 : vector<16x16xf32>
      %207 = arith.divf %205, %206 : vector<16x16xf32>
      %208 = arith.mulf %201, %207 : vector<16x16xf32>
      %209 = arith.truncf %208 : vector<16x16xf32> to vector<16x16xbf16>
      %210 = arith.index_cast %159 : i32 to index
      %c0_111 = arith.constant 0 : index
      %c0_112 = arith.constant 0 : index
      %211 = vector.load %arg10[%210, %c0_111, %c0_112] : memref<8x16x32xbf16, #tpu.memory_space<vmem>>, vector<1x16x32xbf16>
      %212 = vector.shape_cast %211 : vector<1x16x32xbf16> to vector<16x32xbf16>
      %cst_113 = arith.constant dense<0.000000e+00> : vector<16x32xf32>
      %213 = tpu.matmul %209, %212, %cst_113 {dimension_numbers = #tpu.dot_dimension_numbers<[1], [0], [0], [1], [0, 0, 1, 1], [], []>} : vector<16x16xbf16>, vector<16x32xbf16>, vector<16x32xf32> -> vector<16x32xf32>
      %214 = vector.extract_strided_slice %162 {offsets = [0, 32], sizes = [1, 32], strides = [1, 1]} : vector<1x64xf32> to vector<1x32xf32>
      %215 = vector.broadcast %214 : vector<1x32xf32> to vector<16x32xf32>
      %216 = arith.addf %213, %215 : vector<16x32xf32>
      %217 = vector.extract_strided_slice %216 {offsets = [0, 0], sizes = [16, 16], strides = [1, 1]} : vector<16x32xf32> to vector<16x16xf32>
      %218 = arith.addf %arg15, %217 : vector<16x16xf32>
      %219 = arith.mulf %218, %26 : vector<16x16xf32>
      %220 = vector.extract_strided_slice %216 {offsets = [0, 16], sizes = [16, 16], strides = [1, 1]} : vector<16x32xf32> to vector<16x16xf32>
      %221 = arith.addf %arg16, %220 : vector<16x16xf32>
      scf.yield %219, %221 : vector<16x16xf32>, vector<16x16xf32>
    }
    %c2_i32_66 = arith.constant 2 : i32
    %120 = arith.mulf %119#1, %26 : vector<16x16xf32>
    %121 = arith.truncf %120 : vector<16x16xf32> to vector<16x16xbf16>
    %c2_67 = arith.constant 2 : index
    %c0_68 = arith.constant 0 : index
    %c0_69 = arith.constant 0 : index
    %122 = vector.load %arg6[%c2_67, %c0_68, %c0_69] : memref<4x16x4xbf16, #tpu.memory_space<vmem>>, vector<1x16x4xbf16>
    %123 = vector.shape_cast %122 : vector<1x16x4xbf16> to vector<16x4xbf16>
    %cst_70 = arith.constant dense<0.000000e+00> : vector<16x4xf32>
    %124 = tpu.matmul %121, %123, %cst_70 {dimension_numbers = #tpu.dot_dimension_numbers<[1], [0], [0], [1], [0, 0, 1, 1], [], []>} : vector<16x16xbf16>, vector<16x4xbf16>, vector<16x4xf32> -> vector<16x4xf32>
    %125 = vector.extract_strided_slice %108 {offsets = [0, 16], sizes = [1, 4], strides = [1, 1]} : vector<1x20xf32> to vector<1x4xf32>
    %126 = vector.broadcast %125 : vector<1x4xf32> to vector<16x4xf32>
    %127 = arith.addf %124, %126 : vector<16x4xf32>
    %128 = arith.mulf %127, %28 : vector<16x4xf32>
    %129 = arith.mulf %82, %28 : vector<16x4xf32>
    %130 = arith.addf %128, %129 : vector<16x4xf32>
    %c3 = arith.constant 3 : index
    %c0_71 = arith.constant 0 : index
    %c0_72 = arith.constant 0 : index
    %131 = vector.load %arg7[%c3, %c0_71, %c0_72] : memref<4x1x20xf32, #tpu.memory_space<vmem>>, vector<1x1x20xf32>
    %132 = vector.shape_cast %131 : vector<1x1x20xf32> to vector<1x20xf32>
    %133 = arith.truncf %130 : vector<16x4xf32> to vector<16x4xbf16>
    %c3_73 = arith.constant 3 : index
    %c0_74 = arith.constant 0 : index
    %c0_75 = arith.constant 0 : index
    %134 = vector.load %arg5[%c3_73, %c0_74, %c0_75] : memref<4x4x16xbf16, #tpu.memory_space<vmem>>, vector<1x4x16xbf16>
    %135 = vector.shape_cast %134 : vector<1x4x16xbf16> to vector<4x16xbf16>
    %cst_76 = arith.constant dense<0.000000e+00> : vector<16x16xf32>
    %136 = tpu.matmul %133, %135, %cst_76 {dimension_numbers = #tpu.dot_dimension_numbers<[1], [0], [0], [1], [0, 0, 1, 1], [], []>} : vector<16x4xbf16>, vector<4x16xbf16>, vector<16x16xf32> -> vector<16x16xf32>
    %137 = vector.extract_strided_slice %132 {offsets = [0, 0], sizes = [1, 16], strides = [1, 1]} : vector<1x20xf32> to vector<1x16xf32>
    %138 = vector.broadcast %137 : vector<1x16xf32> to vector<16x16xf32>
    %139 = arith.addf %136, %138 : vector<16x16xf32>
    %140 = arith.mulf %139, %26 : vector<16x16xf32>
    %cst_77 = arith.constant 0.000000e+00 : f32
    %141 = vector.broadcast %cst_77 : f32 to vector<16x16xf32>
    %c0_i32_78 = arith.constant 0 : i32
    %c2_i32_79 = arith.constant 2 : i32
    %142 = arith.addi %c0_i32_78, %c2_i32_79 : i32
    %c1_i32_80 = arith.constant 1 : i32
    %143:2 = scf.for %arg14 = %c0_i32_78 to %142 step %c1_i32_80 iter_args(%arg15 = %140, %arg16 = %141) -> (vector<16x16xf32>, vector<16x16xf32>)  : i32 {
      %c6_i32 = arith.constant 6 : i32
      %159 = arith.addi %c6_i32, %arg14 : i32
      %160 = arith.index_cast %159 : i32 to index
      %c0_89 = arith.constant 0 : index
      %c0_90 = arith.constant 0 : index
      %161 = vector.load %arg11[%160, %c0_89, %c0_90] : memref<8x1x64xf32, #tpu.memory_space<vmem>>, vector<1x1x64xf32>
      %162 = vector.shape_cast %161 : vector<1x1x64xf32> to vector<1x64xf32>
      %163 = vector.extract_strided_slice %162 {offsets = [0, 0], sizes = [1, 32], strides = [1, 1]} : vector<1x64xf32> to vector<1x32xf32>
      %164 = arith.index_cast %159 : i32 to index
      %c0_91 = arith.constant 0 : index
      %c0_92 = arith.constant 0 : index
      %165 = vector.load %arg8[%164, %c0_91, %c0_92] : memref<8x16x32xbf16, #tpu.memory_space<vmem>>, vector<1x16x32xbf16>
      %166 = vector.shape_cast %165 : vector<1x16x32xbf16> to vector<16x32xbf16>
      %cst_93 = arith.constant dense<0.000000e+00> : vector<16x32xf32>
      %167 = tpu.matmul %54, %166, %cst_93 {dimension_numbers = #tpu.dot_dimension_numbers<[1], [0], [0], [1], [0, 0, 1, 1], [], []>} : vector<16x16xbf16>, vector<16x32xbf16>, vector<16x32xf32> -> vector<16x32xf32>
      %168 = vector.broadcast %163 : vector<1x32xf32> to vector<16x32xf32>
      %169 = arith.addf %168, %167 : vector<16x32xf32>
      %c1_i32_94 = arith.constant 1 : i32
      %170 = tpu.dynamic_rotate %arg15 by %c1_i32_94 dim 0 : vector<16x16xf32>, i32 -> vector<16x16xf32>
      %171 = vector.broadcast %22 : vector<16x1xf32> to vector<16x16xf32>
      %172 = arith.mulf %170, %171 : vector<16x16xf32>
      %173 = arith.truncf %172 : vector<16x16xf32> to vector<16x16xbf16>
      %c3_i32 = arith.constant 3 : i32
      %174 = arith.muli %159, %c3_i32 : i32
      %c0_i32_95 = arith.constant 0 : i32
      %175 = arith.addi %174, %c0_i32_95 : i32
      %176 = arith.index_cast %175 : i32 to index
      %c0_96 = arith.constant 0 : index
      %c0_97 = arith.constant 0 : index
      %177 = vector.load %arg9[%176, %c0_96, %c0_97] : memref<24x16x32xbf16, #tpu.memory_space<vmem>>, vector<1x16x32xbf16>
      %178 = vector.shape_cast %177 : vector<1x16x32xbf16> to vector<16x32xbf16>
      %cst_98 = arith.constant dense<0.000000e+00> : vector<16x32xf32>
      %179 = tpu.matmul %173, %178, %cst_98 {dimension_numbers = #tpu.dot_dimension_numbers<[1], [0], [0], [1], [0, 0, 1, 1], [], []>} : vector<16x16xbf16>, vector<16x32xbf16>, vector<16x32xf32> -> vector<16x32xf32>
      %180 = arith.addf %169, %179 : vector<16x32xf32>
      %181 = arith.truncf %arg15 : vector<16x16xf32> to vector<16x16xbf16>
      %c3_i32_99 = arith.constant 3 : i32
      %182 = arith.muli %159, %c3_i32_99 : i32
      %c1_i32_100 = arith.constant 1 : i32
      %183 = arith.addi %182, %c1_i32_100 : i32
      %184 = arith.index_cast %183 : i32 to index
      %c0_101 = arith.constant 0 : index
      %c0_102 = arith.constant 0 : index
      %185 = vector.load %arg9[%184, %c0_101, %c0_102] : memref<24x16x32xbf16, #tpu.memory_space<vmem>>, vector<1x16x32xbf16>
      %186 = vector.shape_cast %185 : vector<1x16x32xbf16> to vector<16x32xbf16>
      %cst_103 = arith.constant dense<0.000000e+00> : vector<16x32xf32>
      %187 = tpu.matmul %181, %186, %cst_103 {dimension_numbers = #tpu.dot_dimension_numbers<[1], [0], [0], [1], [0, 0, 1, 1], [], []>} : vector<16x16xbf16>, vector<16x32xbf16>, vector<16x32xf32> -> vector<16x32xf32>
      %188 = arith.addf %180, %187 : vector<16x32xf32>
      %c15_i32_104 = arith.constant 15 : i32
      %189 = tpu.dynamic_rotate %arg15 by %c15_i32_104 dim 0 : vector<16x16xf32>, i32 -> vector<16x16xf32>
      %190 = vector.broadcast %11 : vector<16x1xf32> to vector<16x16xf32>
      %191 = arith.mulf %189, %190 : vector<16x16xf32>
      %192 = arith.truncf %191 : vector<16x16xf32> to vector<16x16xbf16>
      %c3_i32_105 = arith.constant 3 : i32
      %193 = arith.muli %159, %c3_i32_105 : i32
      %c2_i32_106 = arith.constant 2 : i32
      %194 = arith.addi %193, %c2_i32_106 : i32
      %195 = arith.index_cast %194 : i32 to index
      %c0_107 = arith.constant 0 : index
      %c0_108 = arith.constant 0 : index
      %196 = vector.load %arg9[%195, %c0_107, %c0_108] : memref<24x16x32xbf16, #tpu.memory_space<vmem>>, vector<1x16x32xbf16>
      %197 = vector.shape_cast %196 : vector<1x16x32xbf16> to vector<16x32xbf16>
      %cst_109 = arith.constant dense<0.000000e+00> : vector<16x32xf32>
      %198 = tpu.matmul %192, %197, %cst_109 {dimension_numbers = #tpu.dot_dimension_numbers<[1], [0], [0], [1], [0, 0, 1, 1], [], []>} : vector<16x16xbf16>, vector<16x32xbf16>, vector<16x32xf32> -> vector<16x32xf32>
      %199 = arith.addf %188, %198 : vector<16x32xf32>
      %200 = vector.extract_strided_slice %199 {offsets = [0, 0], sizes = [16, 16], strides = [1, 1]} : vector<16x32xf32> to vector<16x16xf32>
      %201 = math.tanh %200 : vector<16x16xf32>
      %202 = vector.extract_strided_slice %199 {offsets = [0, 16], sizes = [16, 16], strides = [1, 1]} : vector<16x32xf32> to vector<16x16xf32>
      %203 = arith.negf %202 : vector<16x16xf32>
      %204 = math.exp %203 : vector<16x16xf32>
      %cst_110 = arith.constant 1.000000e+00 : f32
      %205 = vector.broadcast %cst_110 : f32 to vector<16x16xf32>
      %206 = arith.addf %205, %204 : vector<16x16xf32>
      %207 = arith.divf %205, %206 : vector<16x16xf32>
      %208 = arith.mulf %201, %207 : vector<16x16xf32>
      %209 = arith.truncf %208 : vector<16x16xf32> to vector<16x16xbf16>
      %210 = arith.index_cast %159 : i32 to index
      %c0_111 = arith.constant 0 : index
      %c0_112 = arith.constant 0 : index
      %211 = vector.load %arg10[%210, %c0_111, %c0_112] : memref<8x16x32xbf16, #tpu.memory_space<vmem>>, vector<1x16x32xbf16>
      %212 = vector.shape_cast %211 : vector<1x16x32xbf16> to vector<16x32xbf16>
      %cst_113 = arith.constant dense<0.000000e+00> : vector<16x32xf32>
      %213 = tpu.matmul %209, %212, %cst_113 {dimension_numbers = #tpu.dot_dimension_numbers<[1], [0], [0], [1], [0, 0, 1, 1], [], []>} : vector<16x16xbf16>, vector<16x32xbf16>, vector<16x32xf32> -> vector<16x32xf32>
      %214 = vector.extract_strided_slice %162 {offsets = [0, 32], sizes = [1, 32], strides = [1, 1]} : vector<1x64xf32> to vector<1x32xf32>
      %215 = vector.broadcast %214 : vector<1x32xf32> to vector<16x32xf32>
      %216 = arith.addf %213, %215 : vector<16x32xf32>
      %217 = vector.extract_strided_slice %216 {offsets = [0, 0], sizes = [16, 16], strides = [1, 1]} : vector<16x32xf32> to vector<16x16xf32>
      %218 = arith.addf %arg15, %217 : vector<16x16xf32>
      %219 = arith.mulf %218, %26 : vector<16x16xf32>
      %220 = vector.extract_strided_slice %216 {offsets = [0, 16], sizes = [16, 16], strides = [1, 1]} : vector<16x32xf32> to vector<16x16xf32>
      %221 = arith.addf %arg16, %220 : vector<16x16xf32>
      scf.yield %219, %221 : vector<16x16xf32>, vector<16x16xf32>
    }
    %c2_i32_81 = arith.constant 2 : i32
    %144 = arith.mulf %143#1, %26 : vector<16x16xf32>
    %145 = arith.truncf %144 : vector<16x16xf32> to vector<16x16xbf16>
    %c3_82 = arith.constant 3 : index
    %c0_83 = arith.constant 0 : index
    %c0_84 = arith.constant 0 : index
    %146 = vector.load %arg6[%c3_82, %c0_83, %c0_84] : memref<4x16x4xbf16, #tpu.memory_space<vmem>>, vector<1x16x4xbf16>
    %147 = vector.shape_cast %146 : vector<1x16x4xbf16> to vector<16x4xbf16>
    %cst_85 = arith.constant dense<0.000000e+00> : vector<16x4xf32>
    %148 = tpu.matmul %145, %147, %cst_85 {dimension_numbers = #tpu.dot_dimension_numbers<[1], [0], [0], [1], [0, 0, 1, 1], [], []>} : vector<16x16xbf16>, vector<16x4xbf16>, vector<16x4xf32> -> vector<16x4xf32>
    %149 = vector.extract_strided_slice %132 {offsets = [0, 16], sizes = [1, 4], strides = [1, 1]} : vector<1x20xf32> to vector<1x4xf32>
    %150 = vector.broadcast %149 : vector<1x4xf32> to vector<16x4xf32>
    %151 = arith.addf %148, %150 : vector<16x4xf32>
    %152 = arith.mulf %151, %28 : vector<16x4xf32>
    %153 = arith.mulf %106, %28 : vector<16x4xf32>
    %154 = arith.addf %152, %153 : vector<16x4xf32>
    %155 = tpu.concatenate %154, %130 in 1 : vector<16x4xf32>, vector<16x4xf32> -> vector<16x8xf32>
    %c0_86 = arith.constant 0 : index
    %c0_87 = arith.constant 0 : index
    %c0_88 = arith.constant 0 : index
    %156 = vector.load %arg13[%c0_86, %c0_87, %c0_88] : memref<1x16x8xf32, #tpu.memory_space<vmem>>, vector<1x16x8xf32>
    %157 = vector.shape_cast %156 : vector<1x16x8xf32> to vector<16x8xf32>
    %158 = vector.shape_cast %155 : vector<16x8xf32> to vector<1x16x8xf32>
    tpu.vector_store %arg13[%c0_86, %c0_87, %c0_88], %158 {strides = array<i32>} : memref<1x16x8xf32, #tpu.memory_space<vmem>>, vector<1x16x8xf32>,
    return
  }
  func.func @transform_0(%arg0: i32) -> (i32, i32, i32) {
    %c0_i32 = arith.constant 0 : i32
    %c0_i32_0 = arith.constant 0 : i32
    %c0_i32_1 = arith.constant 0 : i32
    return %arg0, %c0_i32, %c0_i32_0 : i32, i32, i32
  }
  func.func @transform_1(%arg0: i32) -> (i32, i32, i32) {
    %c0_i32 = arith.constant 0 : i32
    %c0_i32_0 = arith.constant 0 : i32
    %c0_i32_1 = arith.constant 0 : i32
    return %arg0, %c0_i32, %c0_i32_0 : i32, i32, i32
  }
  func.func @transform_2(%arg0: i32) -> (i32, i32, i32) {
    %c0_i32 = arith.constant 0 : i32
    %c0_i32_0 = arith.constant 0 : i32
    %c0_i32_1 = arith.constant 0 : i32
    return %arg0, %c0_i32, %c0_i32_0 : i32, i32, i32
  }
  func.func @transform_3(%arg0: i32) -> (i32, i32, i32) {
    %c0_i32 = arith.constant 0 : i32
    %c0_i32_0 = arith.constant 0 : i32
    %c0_i32_1 = arith.constant 0 : i32
    %c0_i32_2 = arith.constant 0 : i32
    return %c0_i32, %c0_i32_0, %c0_i32_1 : i32, i32, i32
  }
  func.func @transform_4(%arg0: i32) -> (i32, i32, i32) {
    %c0_i32 = arith.constant 0 : i32
    %c0_i32_0 = arith.constant 0 : i32
    %c0_i32_1 = arith.constant 0 : i32
    %c0_i32_2 = arith.constant 0 : i32
    return %c0_i32, %c0_i32_0, %c0_i32_1 : i32, i32, i32
  }
  func.func @transform_5(%arg0: i32) -> (i32, i32, i32) {
    %c0_i32 = arith.constant 0 : i32
    %c0_i32_0 = arith.constant 0 : i32
    %c0_i32_1 = arith.constant 0 : i32
    %c0_i32_2 = arith.constant 0 : i32
    return %c0_i32, %c0_i32_0, %c0_i32_1 : i32, i32, i32
  }
  func.func @transform_6(%arg0: i32) -> (i32, i32, i32) {
    %c0_i32 = arith.constant 0 : i32
    %c0_i32_0 = arith.constant 0 : i32
    %c0_i32_1 = arith.constant 0 : i32
    %c0_i32_2 = arith.constant 0 : i32
    return %c0_i32, %c0_i32_0, %c0_i32_1 : i32, i32, i32
  }
  func.func @transform_7(%arg0: i32) -> (i32, i32, i32) {
    %c0_i32 = arith.constant 0 : i32
    %c0_i32_0 = arith.constant 0 : i32
    %c0_i32_1 = arith.constant 0 : i32
    %c0_i32_2 = arith.constant 0 : i32
    return %c0_i32, %c0_i32_0, %c0_i32_1 : i32, i32, i32
  }
  func.func @transform_8(%arg0: i32) -> (i32, i32, i32) {
    %c0_i32 = arith.constant 0 : i32
    %c0_i32_0 = arith.constant 0 : i32
    %c0_i32_1 = arith.constant 0 : i32
    %c0_i32_2 = arith.constant 0 : i32
    return %c0_i32, %c0_i32_0, %c0_i32_1 : i32, i32, i32
  }
  func.func @transform_9(%arg0: i32) -> (i32, i32, i32) {
    %c0_i32 = arith.constant 0 : i32
    %c0_i32_0 = arith.constant 0 : i32
    %c0_i32_1 = arith.constant 0 : i32
    %c0_i32_2 = arith.constant 0 : i32
    return %c0_i32, %c0_i32_0, %c0_i32_1 : i32, i32, i32
  }
  func.func @transform_10(%arg0: i32) -> (i32, i32, i32) {
    %c0_i32 = arith.constant 0 : i32
    %c0_i32_0 = arith.constant 0 : i32
    %c0_i32_1 = arith.constant 0 : i32
    %c0_i32_2 = arith.constant 0 : i32
    return %c0_i32, %c0_i32_0, %c0_i32_1 : i32, i32, i32
  }
  func.func @transform_11(%arg0: i32) -> (i32, i32) {
    %c0_i32 = arith.constant 0 : i32
    %c0_i32_0 = arith.constant 0 : i32
    %c0_i32_1 = arith.constant 0 : i32
    return %c0_i32, %c0_i32_0 : i32, i32
  }
  func.func @transform_12(%arg0: i32) -> (i32, i32, i32) {
    %c0_i32 = arith.constant 0 : i32
    %c0_i32_0 = arith.constant 0 : i32
    %c0_i32_1 = arith.constant 0 : i32
    return %arg0, %c0_i32, %c0_i32_0 : i32, i32, i32
  }
}

</mosaic_0001>

<bundles_post_ra>
// kernel: variational_generator_forward.3
= control target key start
LH: loop header
LB: loop body
LE: loop exit
PB: predicated region body
PF: predicated region fallthrough
CT: control target
= control target key end

     0   :  { %s2347_s0 = inlined_call_operand.vmem [shape: f32[2,16,8], index: 0, kind: input, shape index: {}]   ;;  %s2348_s1 = inlined_call_operand.hbm [shape: f32[2,16,16], index: 1, kind: input, shape index: {}]   ;;  %s2349_s2 = inlined_call_operand.vmem [shape: f32[2,16,1], index: 2, kind: input, shape index: {}]   ;;  %s2350_s3 = inlined_call_operand.vmem [shape: f32[2,16,8], index: 3, kind: input, shape index: {}]   ;;  %s2351_s4 = inlined_call_operand.hbm [shape: bf16[3,8,16], index: 4, kind: input, shape index: {}]   ;;  %s2352_s5 = inlined_call_operand.hbm [shape: bf16[6,16,32], index: 5, kind: input, shape index: {}]   ;;  %s2353_s6 = inlined_call_operand.hbm [shape: bf16[6,16,32], index: 6, kind: input, shape index: {}]   ;;  %s2354_s7 = inlined_call_operand.hbm [shape: bf16[2,16,32], index: 7, kind: input, shape index: {}]   ;;  %s2355_s8 = inlined_call_operand.vmem [shape: f32[2,1,64], index: 8, kind: input, shape index: {}]   ;;  %s2356_s9 = inlined_call_operand.vmem [shape: bf16[16,16], index: 9, kind: input, shape index: {}]   ;;  %s2357_s10 = inlined_call_operand.vmem [shape: bf16[8,16], index: 10, kind: input, shape index: {}]   ;;  %s2358_s11 = inlined_call_operand.hbm [shape: f32[1,48], index: 11, kind: input, shape index: {}]   ;;  %s2359_s12 = inlined_call_operand.vmem [shape: f32[2,16,16], index: 12, kind: output, shape index: {0}]   ;;  %s2360_s13 = inlined_call_operand.vmem [shape: f32[2,16,16], index: 13, kind: output, shape index: {1}]  }
   0x1   :  { %2361 = sst [smem:[#allocation16_spill]] %s2351_s4 }
   0x2   :  { %2362 = sst [smem:[#allocation17_spill]] %s2353_s6 }
   0x3   :  { %2363 = sst [smem:[#allocation18_spill]] %s2356_s9 }
   0x4   :  { %2364 = sst [smem:[#allocation19_spill]] %s2357_s10 }
   0x5   :  { %19 = vsyncpa [#allocation3], 0 }
   0x6   :  { %21 = vsyncpa [#allocation3 + $0x1], 0 }
   0x7   :  { %22 = vsyncpa [#allocation5], 0 }
   0x8   :  { %23 = vsyncpa [#allocation8], 0 }
   0x9   :  { %24 = vsyncpa [#allocation11], 0  ;;  %s2007_s25 = smov 0   ;;  %s2009_s26 = smov 0  }
   0xa   :  { %s2011_s27 = smov 0   ;;  %s2013_s28 = smov 0  }
   0xb LB: > { %s2365_s4 = sld [smem:[#allocation16_spill]]  ;;  %s2031_s15 = sadd.s32 4294967295, %s1899_s28   ;;  %s1899_s28 = sphi %s2013_s28, %s2378_s28   ;;  %s1895_s27 = sphi %s2011_s27, %s2377_s27   ;;  %s1891_s26 = sphi %s2009_s26, %s2376_s26   ;;  %s1887_s25 = sphi %s2007_s25, %s2375_s25  }
   0xc   : > { %p1382_p0 = scmp.ge.s32.totalorder %s1899_s28, 1  ;;  %p77_p1 = scmp.eq.s32.totalorder %s2031_s15, 0 }
   0xd   : > { %p359_p2 = scmp.lt.s32.totalorder %s1899_s28, 3  ;;  %s1921_s17 = smov [#allocation4]  }
   0xe   : > { %s372_s18 = sshll.u32 %s1921_s17, 4  ;;  %s2367_s6 = sld [smem:[#allocation17_spill]]  ;;  %s373_s18 = int_to_ptr.vmem [resolvable:$true] %s372_s18 }
   0xf   : > { %p2036_p3 = pnand %p1382_p0, %p359_p2  ;;  %s384_s29 = sshll.u32 %s2352_s5, 4  ;;  %s385_s29 = int_to_ptr.hbm [resolvable:$true] %s384_s29 }
  0x10   : > { %s1922_s30 = smov [#allocation7]   ;;  %s1924_s10 = smov 4  }
  0x11   : > { %s370_s14 = sshll.u32 %s2365_s4, 4  ;;  %p1515_p4 = pneg %p2036_p3  ;;  %s371_s14 = int_to_ptr.hbm [resolvable:$true] %s370_s14 }
  0x12   : > { %s400_s17 = sshll.u32 %s1922_s30, 4  ;;  %s1923_s4 = smov 64   ;;  %s401_s17 = int_to_ptr.vmem [resolvable:$true] %s400_s17 }
  0x13   : > { %p2047_p5 = pnand %p1515_p4, %p77_p1  ;;  %s1925_s9 = smov [#allocation6]  }
  0x14   : > { %s398_s21 = sshll.u32 %s2367_s6, 4  ;;  %s412_s6 = sshll.u32 %s2354_s7, 4  ;;  %s399_s21 = int_to_ptr.hbm [resolvable:$true] %s398_s21  ;;  %s413_s6 = int_to_ptr.hbm [resolvable:$true] %s412_s6 }
  0x15   : > { %1518 = dma.hbm_to_vmem [thread:$0]  (!%p2047_p5), %s371_s14, 192, %s373_s18, [#allocation5], %s1923_s4, %s1923_s4, %s1924_s10  }
  0x16   : > { %1524 = dma.hbm_to_vmem [thread:$0]  (!%p2047_p5), %s399_s21, 768, %s401_s17, [#allocation8], %s1923_s4, %s1923_s4, %s1924_s10  }
  0x17   : > { %s386_s23 = sshll.u32 %s1925_s9, 4  ;;  %s1926_s14 = smov [#allocation9]   ;;  %s387_s23 = int_to_ptr.vmem [resolvable:$true] %s386_s23 }
  0x18   : > { %1521 = dma.hbm_to_vmem [thread:$0]  (!%p2047_p5), %s385_s29, 768, %s387_s23, [#allocation5], %s1923_s4, %s1923_s4, %s1924_s10  }
  0x19   : > { %s414_s18 = sshll.u32 %s1926_s14, 4  ;;  %s436_s30 = sshll.u32 %s2358_s11, 4  ;;  %s415_s18 = int_to_ptr.vmem [resolvable:$true] %s414_s18  ;;  %s437_s30 = int_to_ptr.hbm [resolvable:$true] %s436_s30 }
  0x1a   : > { %1527 = dma.hbm_to_vmem [thread:$0]  (!%p2047_p5), %s413_s6, 256, %s415_s18, [#allocation8], %s1923_s4, %s1923_s4, %s1924_s10  }
  0x1b   : > { %s1927_s9 = smov [#allocation10]   ;;  %s2071_s29 = sadd.s32 1, %s1899_s28  }
  0x1c   : > { %s438_s17 = sshll.u32 %s1927_s9, 4  ;;  %s60_s19 = ssub.s32 %s1899_s28, %s2071_s29  ;;  %s439_s17 = int_to_ptr.vmem [resolvable:$true] %s438_s17 }
  0x1d   : > { %1530 = dma.hbm_to_vmem [thread:$0]  (!%p2047_p5), %s437_s30, 16, %s439_s17, [#allocation11]  }
  0x1e   : > { %s63_s20 = sadd.s32 1, %s1895_s27  ;;  %p61_p6 = scmp.eq.s32.totalorder %s60_s19, 0 }
  0x1f   : > { %p70_p7 = scmp.ne.s32.totalorder %s1895_s27, %s1891_s26  ;;  %p71_p8 = scmp.eq.s32.totalorder %s1899_s28, 0 }
  0x20   : > { %p76_p9 = scmp.ne.s32.totalorder %s1891_s26, %s1887_s25  ;;  %p1540_p12 = scmp.lt.s32.totalorder %s1899_s28, 2 }
  0x21   : > { %s2082_s23 = scalar_select %p61_p6, %s1895_s27, %s63_s20  }
  0x22   : > { %p72_p10 = por %p71_p8, %p70_p7  ;;  %p2086_p11 = por %p77_p1, %p76_p9 }
  0x23   : > { %s457_s6 = sand.u32 1, %s1895_s27   ;;  %s1476_s22 = sshll.u32 %s1899_s28, 4 }
  0x24   : > { %s1389_s10 = sshll.u32 %s457_s6, 4  ;;  %s466_s21 = scalar_lea.hbm %s2348_s1, %s1476_s22 }
  0x25   : > { %s461_s24 = scalar_lea.vmem [#allocation2], %s1389_s10  ;;  %s467_s9 = sshll.u32 %s466_s21, 4  ;;  %s468_s9 = int_to_ptr.hbm [resolvable:$true] %s467_s9 }
  0x26   : > { %s469_s30 = sshll.u32 %s461_s24, 4  ;;  %p2096_p13 = pnand %p1540_p12, %p72_p10  ;;  %s470_s30 = int_to_ptr.vmem [resolvable:$true] %s469_s30 }
  0x27   : > { %s458_s17 = scalar_lea.sflag [#allocation3], %s457_s6  ;;  %s1803_s19 = sshra.s32 %s468_s9, 4  ;;  %s1804_s19 = int_to_ptr.hbm [resolvable:$true] %s1803_s19 }
  0x28   : > { %s1805_s20 = scalar_lea.hbm %s1804_s19, 16  ;;  %p1807_p2 = pneg %p2096_p13 }
  0x29   : > { %p1806_p0 = scmp.ne.s32.totalorder %s1804_s19, %s1805_s20  ;;  %s1810_s22 = scalar_lea.hbm %s2348_s1, 32 }
  0x2a   : > { %p1811_p6 = scmp.lt.s32.totalorder %s1804_s19, %s2348_s1  ;;  %p1812_p7 = scmp.lt.s32.totalorder %s1810_s22, %s1805_s20 }
  0x2b   : > { %p1808_p4 = pnand %p1807_p2, %p1806_p0 }
  0x2c   : > { %p1813_p8 = por %p1812_p7, %p1811_p6 }
  0x2d   : > { %p1809_p5 = pneg %p1808_p4 }
  0x2f   : > { %p1814_p9 = pnand %p1813_p8, %p1809_p5 }
  0x31   : > { %1817 = shalt.err (!%p1814_p9)
}
  0x32   : > { %s1928_s6 = smov 128   ;;  %s1929_s21 = smov 8  }
  0x33   : > { %1534 = dma.hbm_to_vmem [thread:$0]  (!%p2096_p13), %s468_s9, 256, %s470_s30, %s458_s17, %s1928_s6, %s1928_s6, %s1929_s21  }
  0x34   : > { %497 = sbr.rel (%p2036_p3) target bundleno = 1176 (0x498), region = 68  ;;  %s499_s24 = sand.u32 (!%p2036_p3), 1, %s1891_s26  }
  0x35   : > { %s2113_s28 = sshll.u32 (!%p2036_p3), %s499_s24, 4  ;;  %s500_s10 = scalar_lea.sflag (!%p2036_p3), [#allocation3], %s499_s24 }
  0x36   : > { %s503_s19 = scalar_lea.vmem (!%p2036_p3), [#allocation2], %s2113_s28 }
  0x39   : > { %1870 = dma.done.wait (%p2086_p11), %s500_s10, 256  }
  0x3a   : > { %1872 = vsyncadd (%p2086_p11), %s500_s10, 4294967040 }
  0x3b   : > { %1874 = dma.done.wait (%p77_p1), [#allocation5], 960  }
  0x3c   : > { %1876 = vsyncadd (%p77_p1), [#allocation5], 4294966336 }
  0x3d   : > { %1878 = dma.done.wait (%p77_p1), [#allocation8], 1024  }
  0x3e   : > { %1880 = vsyncadd (%p77_p1), [#allocation8], 4294966272 }
  0x3f   : > { %1882 = dma.done.wait (%p77_p1), [#allocation11], 16  }
  0x40   : > { %1884 = vsyncadd (%p77_p1), [#allocation11], 4294967280  ;;  %p592_p3 = scmp.lt.s32.totalorder %s2031_s15, 1  ;;  %v618_v0 = vlaneseq  ;;  %vm681_vm0 = vcmask 1043456   ;;  %vm677_vm1 = vcmask 64512   ;;  %v1930_v8 = vmov 0.0  }
  0x41   : > { %v706_v5 = vld [vmem:[#allocation4 + $0x4] sm:$0xf]  ;;  %v676_v6 = vld [vmem:[#allocation4] sm:$0xf]  ;;  %v737_v19 = vld [vmem:[#allocation4 + $0x8] sm:$0xf] }
  0x42   : > { %s2380_s15 = smov (!%p592_p3, %s2031_s15), 1  ;;  %v2134_v1 = vshrl.u32 %v618_v0, 7  ;;  %v711_v10 = vsel %vm681_vm0, %v706_v5, 0  ;;  %v683_v11 = vsel %vm681_vm0, %v676_v6, 0  ;;  %v2170_v20 = vld [vmem:[%s503_s19] sm:$0xff]  ;;  %v742_v22 = vsel %vm681_vm0, %v737_v19, 0 }
  0x43   : > { %s1477_s16 = sshll.u32 %s2380_s15, 4  ;;  %720 = vmatpush.bf16.msra.mxu1 %v711_v10  ;;  %692 = vmatpush.bf16.msra.mxu0 %v683_v11  ;;  %v2175_v23 = vld [vmem:[%s503_s19 + $0x8] sm:$0xff]  ;;  %v650_v24 = vrot.slane %v2170_v20, 7  ;;  %v659_v31 = vrot.slane %v2170_v20, 1  ;;  %v2226_v59 = vmov 0.0   ;;  %v2228_v60 = vmov 0.0  }
  0x44   : > { %v633_v2 = vadd.s32 4294967295, %v2134_v1  ;;  %v620_v3 = vadd.s32 8, %v2134_v1  ;;  %s596_s9 = scalar_lea.vmem %s2347_s0, %s1477_s16  ;;  %s601_s20 = scalar_lea.vmem %s2349_s2, %s1477_s16  ;;  %vm652_vm3 = vcmp.lt.s32.totalorder %v2134_v1, 1  ;;  %vm661_vm5 = vcmp.lt.s32.totalorder %v2134_v1, 7  ;;  %751 = vmatpush.bf16.msra.mxu2 %v742_v22  ;;  %v2222_v46 = vld [vmem:[#allocation10] ss:$0 sm:$0xff] }
  0x45   : > { %s2147_s18 = scalar_lea.vmem %s2350_s3, %s1477_s16  ;;  %s2152_s21 = scalar_lea.vmem %s2359_s12, %s1477_s16  ;;  %v2160_v7 = vld [vmem:[%s601_s20] sm:$0xff]  ;;  %v2166_v12 = vld [vmem:[%s601_s20 + $0x8] sm:$0xff]  ;;  %v651_v25 = vrot.slane %v2175_v23, 7  ;;  %v658_v26 = vpack.c.bf16 %v2175_v23, %v2170_v20  ;;  %v660_v32 = vrot.slane %v2175_v23, 1 }
  0x46   : > { %vm635_vm2 = vcmp.ge.s32.totalorder %v633_v2, 0  ;;  %v622_v4 = vadd.s32 1, %v620_v3  ;;  %s2158_s4 = scalar_lea.vmem %s2360_s13, %s1477_s16  ;;  %v667_v13 = vld [vmem:[%s596_s9] sm:$0xff]  ;;  %v668_v14 = vld [vmem:[%s596_s9 + $0x8] sm:$0xff]  ;;  %s2234_s28 = smov 0  }
  0x47   : > { %v2162_v9 = vsel %vm635_vm2, 1.0, %v1930_v8  ;;  %v669_v15 = vrot.slane %v667_v13, 7  ;;  %v670_v16 = vrot.slane %v668_v14, 7  ;;  %v704_v17 = vpack.c.bf16 %v668_v14, %v667_v13 }
  0x48   : > { %vm626_vm4 = vcmp.lt.s32.totalorder %v622_v4, 16  ;;  %v729_v18 = vrot.slane %v667_v13, 1  ;;  %v730_v21 = vrot.slane %v668_v14, 1  ;;  %v2195_v33 = vsel %vm652_vm3, %v650_v24, %v651_v25 }
  0x49   : > { %v671_v27 = vsel %vm652_vm3, %v669_v15, %v670_v16  ;;  %v672_v28 = vsel %vm652_vm3, %v670_v16, %v669_v15  ;;  %1412 = vmatmul.msk.bf16.vlgmr.msra.gmra.mxu1 %vm677_vm1, %v704_v17  ;;  %v2189_v30 = vsel %vm626_vm4, 1.0, %v1930_v8  ;;  %v654_v34 = vsel %vm652_vm3, %v651_v25, %v650_v24 }
  0x4a   : > { %v673_v29 = vmul.f32 %v2162_v9, %v672_v28  ;;  %v731_v35 = vsel %vm661_vm5, %v729_v18, %v730_v21  ;;  %v732_v36 = vsel %vm661_vm5, %v730_v21, %v729_v18  ;;  %v2204_v37 = vmul.f32 %v2162_v9, %v654_v34 }
  0x4b   : > { %v2208_v39 = vsel %vm661_vm5, %v659_v31, %v660_v32  ;;  %v663_v40 = vsel %vm661_vm5, %v660_v32, %v659_v31  ;;  %v734_v42 = vmul.f32 %v2189_v30, %v732_v36 }
  0x4c   : > { %v675_v38 = vpack.c.bf16 %v671_v27, %v673_v29  ;;  %v2213_v41 = vmul.f32 %v2189_v30, %v663_v40  ;;  %v657_v43 = vpack.c.bf16 %v2195_v33, %v2204_v37 }
  0x4d   : > { %v735_v45 = vpack.c.bf16 %v734_v42, %v731_v35 }
  0x4e   : > { %1411 = vmatmul.msk.bf16.vlgmr.msra.gmra.mxu0 %vm677_vm1, %v675_v38  ;;  %v666_v44 = vpack.c.bf16 %v2213_v41, %v2208_v39 }
  0x4f   : > { %1413 = vmatmul.msk.bf16.vlgmr.msra.gmra.mxu2 %vm677_vm1, %v735_v45 }
  0xc6   : > { %v722_v49 = vpop.f32.mrf.mxu1 }
  0xcb   : > { %v694_v47 = vpop.f32.mrf.mxu0 }
  0xcc   : > { %v702_v48 = vadd.f32 %v2222_v46, %v694_v47 }
  0xce   : > { %v727_v50 = vadd.f32 %v722_v49, %v702_v48  ;;  %v724_v55 = vpop.f32.mrf.mxu1 }
  0xd2   : > { %v753_v51 = vpop.f32.mrf.mxu2 }
  0xd3   : > { %v696_v52 = vpop.f32.mrf.mxu0  ;;  %v758_v53 = vadd.f32 %v753_v51, %v727_v50  }
  0xd4   : > { %v703_v54 = vadd.f32 %v2222_v46, %v696_v52 }
  0xd6   : > { %v728_v56 = vadd.f32 %v724_v55, %v703_v54 }
  0xda   : > { %v755_v57 = vpop.f32.mrf.mxu2 }
  0xdb   : > { %v759_v58 = vadd.f32 %v755_v57, %v728_v56  }
  0xdc LB: >> { %s1482_s19 = smul.u32 24, %s1919_s28  ;;  %v772_v61 = vrot.slane %v1915_v53, 7  ;;  %v773_v62 = vrot.slane %v1911_v58, 7  ;;  %s770_s9 = scalar_lea.vmem %s2355_s8, %s1919_s28  ;;  %vm791_vm6 = vcmask 130048   ;;  %v843_v13 = vpack.c.bf16 %v1911_v58, %v1915_v53  ;;  %s1919_s28 = sphi %s2234_s28, %s765_s28   ;;  %v1915_v53 = vphi %v758_v53, %v1053_v53   ;;  %v1911_v58 = vphi %v759_v58, %v1054_v58   ;;  %v1907_v60 = vphi %v2228_v60, %v2372_v60   ;;  %v1903_v59 = vphi %v2226_v59, %v2371_v59  }
  0xdd   : >> { %v904_v14 = vrot.slane %v1915_v53, 1  ;;  %v905_v15 = vrot.slane %v1911_v58, 1  ;;  %v1635_v24 = vld [vmem:[%s770_s9] ss:$0 sm:$0xff]  ;;  %s1490_s14 = sshll.u32 %s1919_s28, 3  ;;  %s1931_s15 = smov 112  }
  0xde   : >> { %v774_v63 = vsel %vm652_vm3, %v772_v61, %v773_v62  ;;  %v775_v0 = vsel %vm652_vm3, %v773_v62, %v772_v61  ;;  %s782_s25 = scalar_lea.vmem [#allocation7], %s1482_s19  ;;  %s815_s17 = scalar_lea.vmem [#allocation6], %s1482_s19 }
  0xdf   : >> { %v1483_v2 = vld [vmem:[%s782_s25] sm:$0xff]  ;;  %v1486_v4 = vld [vmem:[%s782_s25 + $0x8] sm:$0xff]  ;;  %v776_v5 = vmul.f32 %v2162_v9, %v775_v0  ;;  %v1488_v8 = vld [vmem:[%s782_s25 + $0x10] sm:$0xff]  ;;  %v907_v16 = vsel %vm661_vm5, %v905_v15, %v904_v14  ;;  %v906_v18 = vsel %vm661_vm5, %v904_v14, %v905_v15  ;;  %s1024_s6 = scalar_lea.vmem [#allocation9], %s1490_s14  ;;  %s1932_s24 = smov 96  }
  0xe0   : >> { %v1485_v3 = vld [vmem:[%s815_s17] sm:$0xff]  ;;  %v1487_v6 = vld [vmem:[%s815_s17 + $0x8] sm:$0xff]  ;;  %v1489_v10 = vld [vmem:[%s815_s17 + $0x10] sm:$0xff]  ;;  %802 = vmatpush.bf16.msra.mxu0 %v1483_v2  ;;  %866 = vmatpush.bf16.msra.mxu2 %v1486_v4  ;;  %v909_v17 = vmul.f32 %v2189_v30, %v907_v16  ;;  %s765_s28 = sadd.s32 1, %s1919_s28  }
  0xe1   : >> { %834 = vmatpush.bf16.msra.mxu1 %v1485_v3  ;;  %v778_v11 = vpack.c.bf16 %v774_v63, %v776_v5  ;;  %895 = vmatpush.bf16.msra.mxu3 %v1487_v6  ;;  %v1491_v56 = vld [vmem:[%s1024_s6] sm:$0xff]  ;;  %p762_p1 = scmp.ge.s32.totalorder %s765_s28, 2  }
  0xe2   : >> { %v910_v19 = vpack.c.bf16 %v909_v17, %v906_v18  ;;  %1033 = vrot.lane.b32.xlu1 %v1635_v24, %s1932_s24  ;;  %s2373_s16 = sld [smem:[#allocation18_spill]] (%p762_p1)  ;;  %s1934_s30 = smov (%p762_p1), 112  }
  0xe3   : >> { %1420 = vmatmul.msk.bf16.vlgmr.msra.gmra.mxu0 %vm791_vm6, %v778_v11  ;;  %1434 = vmatmul.msk.bf16.vlgmr.msra.gmra.mxu2 %vm791_vm6, %v843_v13  ;;  %s1935_s28 = smov (%p762_p1), 96   ;;  %s1936_s9 = smov (%p762_p1), 120  }
  0xe4   : >> { %933 = vmatpush.bf16.msrb.mxu0 %v1488_v8  ;;  %1426 = vmatmul.msk.bf16.vlgmr.msra.gmra.mxu1 %vm791_vm6, %v657_v43  ;;  %s2374_s20 = sld [smem:[#allocation19_spill]] (%p762_p1) }
  0xe5   : >> { %962 = vmatpush.bf16.msrb.mxu1 %v1489_v10  ;;  %1442 = vmatmul.msk.bf16.vlgmr.msra.gmra.mxu3 %vm791_vm6, %v658_v26 }
  0xe6   : >> { %1046 = vmatpush.bf16.msrb.mxu2 %v1491_v56 }
  0xf3   : >> { %1450 = vmatmul.msk.bf16.vlgmr.msrb.gmra.mxu0 %vm791_vm6, %v910_v19 }
  0xf4   : >> { %1458 = vmatmul.msk.bf16.vlgmr.msrb.gmra.mxu1 %vm791_vm6, %v666_v44 }
 0x160   : >> { %v804_v21 = vpop.f32.mrf.mxu0 }
 0x161   : >> { %v836_v22 = vpop.f32.mrf.mxu1  ;;  %v812_v25 = vadd.f32 %v1635_v24, %v804_v21 }
 0x163   : >> { %v841_v31 = vadd.f32 %v836_v22, %v812_v25 }
 0x166   : >> { %v868_v27 = vpop.f32.mrf.mxu2 }
 0x167   : >> { %v873_v32 = vadd.f32 %v868_v27, %v841_v31 }
 0x168   : >> { %v806_v28 = vpop.f32.mrf.mxu0  ;;  %v897_v34 = vpop.f32.mrf.mxu3 }
 0x169   : >> { %v838_v29 = vpop.f32.mrf.mxu1  ;;  %v813_v35 = vadd.f32 %v1635_v24, %v806_v28  ;;  %v902_v36 = vadd.f32 %v897_v34, %v873_v32 }
 0x16b   : >> { %v842_v45 = vadd.f32 %v838_v29, %v813_v35 }
 0x16e   : >> { %v870_v38 = vpop.f32.mrf.mxu2 }
 0x16f   : >> { %v874_v48 = vadd.f32 %v870_v38, %v842_v45 }
 0x170   : >> { %v935_v40 = vpop.f32.mrf.mxu0  ;;  %v899_v51 = vpop.f32.mrf.mxu3 }
 0x171   : >> { %v964_v42 = vpop.f32.mrf.mxu1  ;;  %v940_v47 = vadd.f32 %v935_v40, %v902_v36  ;;  %v903_v52 = vadd.f32 %v899_v51, %v874_v48 }
 0x173   : >> { %v969_v49 = vadd.f32 %v964_v42, %v940_v47  ;;  %v1034_v42 = vpop.permute.xlu1 %1033 }
 0x175   : >> { %v1459_v50 = vmul.f32 -1.442695, %v969_v49 }
 0x177   : >> { %1636 = vpow2.f32 %v1459_v50 }
 0x178   : >> { %v937_v54 = vpop.f32.mrf.mxu0 }
 0x179   : >> { %v941_v55 = vadd.f32 %v937_v54, %v903_v52  ;;  %v966_v57 = vpop.f32.mrf.mxu1  ;;  %v1933_v52 = vmov (%p762_p1), 0   ;;  %v1492_v54 = vld [vmem:[%s2373_s16] sm:$0xff] (%p762_p1) }
 0x17a   : > { %1648 = vset.pattern.permute.xlu0 (%p762_p1), %v1933_v52  ;;  %1095 = vmatpush.bf16.msra.mxu0 (%p762_p1), %v1492_v54 }
 0x17b   : >> { %v970_v61 = vadd.f32 %v966_v57, %v941_v55 }
 0x17d   : >> { %v1637_v62 = vpop.eup %1636  ;;  %v1460_v63 = vmul.f32 -1.442695, %v970_v61 }
 0x17e   : >> { %v979_v0 = vadd.f32 1.0, %v1637_v62 }
 0x17f   : >> { %1638 = vpow2.f32 %v1460_v63 }
 0x180   : >> { %1640 = vrcp.f32 %v979_v0  ;;  %v992_v8 = vand.u32 2147483648, %v979_v0  ;;  %v990_v11 = vand.u32 2147483647, %v979_v0  ;;  %vm986_vm8 = vweird.f32 %v979_v0 }
 0x182   : >> { %v993_v15 = vor.u32 1.1754944e-38, %v992_v8  ;;  %vm991_vm10 = vcmp.eq.f32.partialorder %v990_v11, 8.507059e+37 }
 0x185   : >> { %v1639_v2 = vpop.eup %1638 }
 0x186   : >> { %v1641_v3 = vpop.eup %1640  ;;  %v980_v4 = vadd.f32 1.0, %v1639_v2  ;;  %v1105_v2 = vld [vmem:[%s2147_s18 + $0x8] sm:$0xff] (%p762_p1) }
 0x187   : >> { %v982_v5 = vmul.f32 %v1641_v3, %v979_v0  ;;  %vm987_vm7 = vweird.f32 %v1641_v3 }
 0x188   : >> { %1642 = vrcp.f32 %v980_v4  ;;  %vm988_vm9 = vmor %vm986_vm8, %vm987_vm7  ;;  %v1007_v21 = vand.u32 2147483648, %v980_v4  ;;  %v1005_v25 = vand.u32 2147483647, %v980_v4  ;;  %vm1001_vm12 = vweird.f32 %v980_v4 }
 0x189   : >> { %v983_v6 = vsub.f32 1.0, %v982_v5  ;;  %1644 = vtanh.f32 %v969_v49 }
 0x18a   : >> { %v1008_v28 = vor.u32 1.1754944e-38, %v1007_v21  ;;  %vm1006_vm14 = vcmp.eq.f32.partialorder %v1005_v25, 8.507059e+37  ;;  %1646 = vtanh.f32 %v970_v61 }
 0x18b   : >> { %v984_v10 = vmul.f32 %v1641_v3, %v983_v6 }
 0x18d   : >> { %v985_v13 = vadd.f32 %v1641_v3, %v984_v10 }
 0x18e   : >> { %v1643_v14 = vpop.eup %1642 }
 0x18f   : >> { %v989_v16 = vsel %vm988_vm9, %v1641_v3, %v985_v13  ;;  %v997_v17 = vmul.f32 %v1643_v14, %v980_v4  ;;  %vm1002_vm11 = vweird.f32 %v1643_v14  ;;  %v1645_v34 = vpop.eup %1644 }
 0x190   : >> { %v994_v18 = vsel %vm991_vm10, %v993_v15, %v989_v16  ;;  %vm1003_vm13 = vmor %vm1001_vm12, %vm1002_vm11  ;;  %v1647_v35 = vpop.eup %1646 }
 0x191   : >> { %1013 = vrot.lane.b32.xlu0 %v994_v18, %s1931_s15  ;;  %v998_v19 = vsub.f32 1.0, %v997_v17 }
 0x193   : >> { %v999_v22 = vmul.f32 %v1643_v14, %v998_v19 }
 0x195   : >> { %v1000_v27 = vadd.f32 %v1643_v14, %v999_v22 }
 0x197   : >> { %v1004_v29 = vsel %vm1003_vm13, %v1643_v14, %v1000_v27 }
 0x198   : >> { %v1009_v31 = vsel %vm1006_vm14, %v1008_v28, %v1004_v29 }
 0x199   : >> { %1015 = vrot.lane.b32.xlu0 %v1009_v31, %s1931_s15 }
 0x1a1   : > { %1059 = vperm.xlu0 (%p762_p1), %1648, %v2160_v7  }
 0x1a9   : > { %1064 = vperm.xlu0 (%p762_p1), %1648, %v2166_v12  }
 0x1b1   : > { %1132 = vrot.lane.b32.xlu0 (%p762_p1), %v2222_v46, %s1935_s28 }
 0x203   : >> { %v1014_v32 = vpop.permute.xlu0 %1013 }
 0x204   : >> { %v1019_v38 = vmul.f32 %v1645_v34, %v1014_v32 }
 0x20b   : >> { %v1016_v36 = vpop.permute.xlu0 %1015 }
 0x20c   : >> { %v1020_v24 = vmul.f32 %v1647_v35, %v1016_v36 }
 0x20e   : >> { %v1021_v40 = vpack.c.bf16 %v1020_v24, %v1019_v38 }
 0x210   : >> { %1467 = vmatmul.msk.bf16.vlgmr.msrb.gmra.mxu2 %vm791_vm6, %v1021_v40 }
 0x213   : > { %v1060_v55 = vpop.permute.xlu0 (%p762_p1), %1059 }
 0x21b   : > { %v1065_v56 = vpop.permute.xlu0 (%p762_p1), %1064 }
 0x223   : > { %v1133_v13 = vpop.permute.xlu0 (%p762_p1), %1132 }
 0x293   : >> { %v1048_v45 = vpop.f32.mrf.mxu2 }
 0x294   : >> { %v1049_v47 = vadd.f32 %v1048_v45, %v1034_v42 }
 0x296   : >> { %v1053_v53 = vadd.f32 %v1915_v53, %v1049_v47   ;;  %v1055_v48 = vadd.f32 %v1907_v60, %v1049_v47  }
 0x298   : >> { %v2372_v60 = vmov %v1055_v48  ;;  %v1067_v57 = vmul.f32 (%p762_p1), %v1060_v55, %v1055_v48 }
 0x29b   : >> { %v1050_v50 = vpop.f32.mrf.mxu2 }
 0x29c   : >> { %v1051_v51 = vadd.f32 %v1050_v50, %v1034_v42  ;;  %764 = sbr.rel (!%p762_p1) target bundleno = 220 (0xdc), region = 166 }
 0x29e   : >> { %v1054_v58 = vadd.f32 %v1911_v58, %v1051_v51   ;;  %v1056_v49 = vadd.f32 %v1903_v59, %v1051_v51  }
 0x29f   : > { %v1104_v58 = vld [vmem:[%s2147_s18] sm:$0xff] (%p762_p1) }
 0x2a0   : >> { %v2371_v59 = vmov %v1056_v49  ;;  %v1068_v61 = vmul.f32 (%p762_p1), %v1065_v56, %v1056_v49 }
 0x2a2   : > { %v1069_v62 = vpack.c.bf16 %v1068_v61, %v1067_v57 }
 0x2a4   : > { %1073 = vrot.lane.b32.xlu1 %v1069_v62, %s1934_s30 }
 0x2ac   : > { %1081 = vrot.lane.b32.xlu1 %v2222_v46, %s1934_s30  ;;  %v1131_v46 = vld [vmem:[%s2374_s20] sm:$0xf] }
 0x2ad   : > { %v1139_v53 = vsel %vm681_vm0, %v1131_v46, 0 }
 0x2ae   : > { %1148 = vmatpush.bf16.msra.mxu1 %v1139_v53 }
 0x316   : > { %v1074_v1 = vpop.permute.xlu1 %1073 }
 0x317   : > { %1472 = vmatmul.msk.bf16.vlgmr.msra.gmra.mxu0 %vm791_vm6, %v1074_v1 }
 0x31e   : > { %v1082_v7 = vpop.permute.xlu1 %1081 }
 0x394   : > { %v1097_v9 = vpop.f32.mrf.mxu0 }
 0x395   : > { %v1098_v12 = vadd.f32 %v1097_v9, %v1082_v7 }
 0x397   : > { %v1102_v20 = vmul.f32 %v1098_v12, %v1060_v55 }
 0x399   : > { %v1106_v23 = vmul.f32 0.5, %v1102_v20 }
 0x39b   : > { %v1108_v26 = vmul.f32 1.442695, %v1106_v23 }
 0x39c   : > { %v1099_v30 = vpop.f32.mrf.mxu0 }
 0x39d   : > { %v1100_v33 = vadd.f32 %v1099_v30, %v1082_v7  ;;  %1649 = vpow2.f32 %v1108_v26 }
 0x39f   : > { %v1103_v37 = vmul.f32 %v1100_v33, %v1065_v56 }
 0x3a1   : > { %v1107_v39 = vmul.f32 0.5, %v1103_v37 }
 0x3a3   : > { %v1650_v41 = vpop.eup %1649  ;;  %v1110_v43 = vmul.f32 1.442695, %v1107_v39 }
 0x3a4   : > { %1114 = vrot.lane.b32.xlu2 %v1650_v41, %s1936_s9 }
 0x3a5   : > { %1651 = vpow2.f32 %v1110_v43 }
 0x3ab   : > { %v1652_v44 = vpop.eup %1651 }
 0x3ac   : > { %1116 = vrot.lane.b32.xlu2 %v1652_v44, %s1936_s9 }
 0x3fe   : > { %v1115_v59 = vpop.permute.xlu2 %1114 }
 0x3ff   : > { %v1120_v60 = vmul.f32 %v1115_v59, %v1104_v58 }
 0x401   : > { %v1122_v63 = vadd.f32 %v1120_v60, %v1102_v20 }
 0x403   : > { %v1124_v0 = vmul.f32 %v1122_v63, %v1060_v55 }
 0x405   : > { %v1126_v3 = vsel %vm677_vm1, %v1124_v0, %v1102_v20 }
 0x406   : > { %v1117_v4 = vpop.permute.xlu2 %1116  ;;  %1128 = vst.msk [vmem:[%s2152_s21] sm:$0xff] %vm791_vm6, %v1126_v3 }
 0x407   : > { %v1121_v5 = vmul.f32 %v1117_v4, %v1105_v2 }
 0x409   : > { %v1123_v6 = vadd.f32 %v1121_v5, %v1103_v37 }
 0x40b   : > { %v1125_v8 = vmul.f32 %v1123_v6, %v1065_v56 }
 0x40d   : > { %v1127_v10 = vsel %vm677_vm1, %v1125_v8, %v1103_v37  ;;  %v1130_v11 = vpack.c.bf16 %v1125_v8, %v1124_v0 }
 0x40e   : > { %1129 = vst.msk [vmem:[%s2152_s21 + $0x8] sm:$0xff] %vm791_vm6, %v1127_v10 }
 0x40f   : > { %1473 = vmatmul.msk.bf16.vlgmr.msra.gmra.mxu1 %vm677_vm1, %v1130_v11 }
 0x48c   : > { %v1150_v14 = vpop.f32.mrf.mxu1 }
 0x48d   : > { %v1151_v15 = vadd.f32 %v1150_v14, %v1133_v13 }
 0x48f   : > { %1155 = vst.msk [vmem:[%s2158_s4] sm:$0xff] %vm791_vm6, %v1151_v15 }
 0x494   : > { %v1152_v16 = vpop.f32.mrf.mxu1 }
 0x495   : > { %v1153_v17 = vadd.f32 %v1152_v16, %v1133_v13 }
 0x497   : > { %1156 = vst.msk [vmem:[%s2158_s4 + $0x8] sm:$0xff] %vm791_vm6, %v1153_v17 }
 0x498 PF: > { %p27_p10 = scmp.ge.s32.totalorder %s2071_s29, 4   ;;  %s2375_s25 = smov %s1891_s26 }
 0x499   : > { %s2376_s26 = smov %s1895_s27  ;;  %s2377_s27 = smov %s2082_s23 }
 0x49a   : > { %s2378_s28 = smov %s2071_s29  ;;  %29 = sbr.rel (!%p27_p10) target bundleno = 11 (0xb), region = 177 }
 0x49f   :  { %1194 = vsyncpa [#allocation3], 1 }
 0x4a0   :  { %1196 = vsyncpa [#allocation3 + $0x1], 1 }
 0x4a1   :  { %1197 = vsyncpa [#allocation5], 1 }
 0x4a2   :  { %1198 = vsyncpa [#allocation8], 1 }
 0x4a3   :  { %1199 = vsyncpa [#allocation11], 1 }

// kernel: variational_generator_forward.5
= control target key start
LH: loop header
LB: loop body
LE: loop exit
PB: predicated region body
PF: predicated region fallthrough
CT: control target
= control target key end

     0   :  { %s2225_s0 = inlined_call_operand.vmem [shape: f32[2,16,16], index: 0, kind: input, shape index: {}]   ;;  %s2226_s1 = inlined_call_operand.hbm [shape: f32[2,16,16], index: 1, kind: input, shape index: {}]   ;;  %s2227_s2 = inlined_call_operand.vmem [shape: f32[2,16,1], index: 2, kind: input, shape index: {}]   ;;  %s2228_s3 = inlined_call_operand.vmem [shape: bf16[6,16,32], index: 3, kind: input, shape index: {}]   ;;  %s2229_s4 = inlined_call_operand.hbm [shape: bf16[6,16,32], index: 4, kind: input, shape index: {}]   ;;  %s2230_s5 = inlined_call_operand.hbm [shape: bf16[2,16,32], index: 5, kind: input, shape index: {}]   ;;  %s2231_s6 = inlined_call_operand.vmem [shape: f32[2,1,64], index: 6, kind: input, shape index: {}]   ;;  %s2232_s7 = inlined_call_operand.vmem [shape: bf16[3,16,8], index: 7, kind: input, shape index: {}]   ;;  %s2233_s8 = inlined_call_operand.hbm [shape: bf16[8,16], index: 8, kind: input, shape index: {}]   ;;  %s2234_s9 = inlined_call_operand.hbm [shape: f32[1,24], index: 9, kind: input, shape index: {}]   ;;  %s2235_s10 = inlined_call_operand.vmem [shape: f32[2,16,8], index: 10, kind: output, shape index: {0}]   ;;  %s2236_s11 = inlined_call_operand.hbm [shape: f32[2,16,16], index: 11, kind: output, shape index: {1}]  }
   0x1   :  { %2238 = sst [smem:[#allocation17_spill]] %s2229_s4 }
   0x2   :  { %2239 = sst [smem:[#allocation18_spill]] %s2230_s5 }
   0x3   :  { %2240 = sst [smem:[#allocation19_spill]] %s2233_s8 }
   0x4   :  { %2241 = sst [smem:[#allocation20_spill]] %s2234_s9 }
   0x5   :  { %17 = vsyncpa [#allocation3], 0 }
   0x6   :  { %19 = vsyncpa [#allocation3 + $0x1], 0 }
   0x7   :  { %20 = vsyncpa [#allocation6], 0 }
   0x8   :  { %21 = vsyncpa [#allocation9], 0 }
   0x9   :  { %22 = vsyncpa [#allocation4], 0 }
   0xa   :  { %24 = vsyncpa [#allocation4 + $0x1], 0  ;;  %s1872_s17 = smov 0   ;;  %s1874_s18 = smov 0  }
   0xb   :  { %s1876_s19 = smov 0   ;;  %s1878_s20 = smov 0  }
   0xc LB: > { %s1893_s21 = sadd.s32 4294967295, %s1774_s20   ;;  %s1255_s22 = sadd.s32 4294967294, %s1774_s20   ;;  %s1774_s20 = sphi %s1878_s20, %s2260_s20   ;;  %s1770_s19 = sphi %s1876_s19, %s2259_s19   ;;  %s1766_s18 = sphi %s1874_s18, %s2258_s18   ;;  %s1762_s17 = sphi %s1872_s17, %s2257_s17  }
   0xd   : > { %p76_p0 = scmp.ne.s32.totalorder %s1766_s18, %s1762_s17  ;;  %p77_p1 = scmp.eq.s32.totalorder %s1893_s21, 0 }
   0xe   : > { %p299_p2 = scmp.eq.s32.totalorder %s1893_s21, 1  ;;  %p305_p3 = scmp.eq.s32.totalorder %s1255_s22, 1 }
   0xf   : > { %p1902_p4 = por %p77_p1, %p76_p0  ;;  %p1256_p5 = scmp.ge.s32.totalorder %s1774_s20, 1 }
  0x10   : > { %p1907_p6 = por %p305_p3, %p76_p0  ;;  %p312_p7 = scmp.lt.s32.totalorder %s1774_s20, 3 }
  0x11   : > { %s2245_s4 = sld [smem:[#allocation17_spill]]  ;;  %s1796_s29 = smov [#allocation5]  }
  0x12   : > { %s2243_s24 = scalar_select %p1907_p6, 1, 0 }
  0x13   : > { %p1915_p8 = pnand %p1256_p5, %p312_p7  ;;  %s328_s30 = sshll.u32 %s1796_s29, 4  ;;  %s329_s30 = int_to_ptr.vmem [resolvable:$true] %s328_s30 }
  0x14   : > { %2244 = sst [smem:[#allocation16_spill]] %s2243_s24  ;;  %s1797_s16 = smov 64  }
  0x15   : > { %p1397_p9 = pneg %p1915_p8  ;;  %s2248_s8 = sld [smem:[#allocation19_spill]] }
  0x16   : > { %s1798_s22 = smov 4   ;;  %s1799_s25 = smov [#allocation8]  }
  0x17   : > { %s326_s27 = sshll.u32 %s2245_s4, 4  ;;  %p1923_p10 = pnand %p1397_p9, %p77_p1  ;;  %s327_s27 = int_to_ptr.hbm [resolvable:$true] %s326_s27 }
  0x18   : > { %s363_s26 = sshll.u32 %s1799_s25, 4  ;;  %s2249_s5 = sld [smem:[#allocation18_spill]]  ;;  %s364_s26 = int_to_ptr.vmem [resolvable:$true] %s363_s26 }
  0x19   : > { %1400 = dma.hbm_to_vmem [thread:$0]  (!%p1923_p10), %s327_s27, 768, %s329_s30, [#allocation6], %s1797_s16, %s1797_s16, %s1798_s22  }
  0x1a   : > { %s2250_s9 = sld [smem:[#allocation20_spill]]  ;;  %s1800_s30 = smov [#allocation7]  }
  0x1b   : > { %s361_s15 = sshll.u32 %s2248_s8, 4  ;;  %s342_s25 = sshll.u32 %s1800_s30, 4  ;;  %s362_s15 = int_to_ptr.hbm [resolvable:$true] %s361_s15  ;;  %s343_s25 = int_to_ptr.vmem [resolvable:$true] %s342_s25 }
  0x1c   : > { %1406 = dma.hbm_to_vmem [thread:$0]  (!%p1923_p10), %s362_s15, 64, %s364_s26, [#allocation9]  }
  0x1d   : > { %s1801_s4 = smov [#allocation10]   ;;  %s1946_s15 = sadd.s32 1, %s1774_s20  }
  0x1e   : > { %s340_s24 = sshll.u32 %s2249_s5, 4  ;;  %s375_s29 = sshll.u32 %s1801_s4, 4  ;;  %s341_s24 = int_to_ptr.hbm [resolvable:$true] %s340_s24  ;;  %s376_s29 = int_to_ptr.vmem [resolvable:$true] %s375_s29 }
  0x1f   : > { %1403 = dma.hbm_to_vmem [thread:$0]  (!%p1923_p10), %s341_s24, 256, %s343_s25, [#allocation6], %s1797_s16, %s1797_s16, %s1798_s22  }
  0x20   : > { %s373_s27 = sshll.u32 %s2250_s9, 4  ;;  %s63_s26 = sadd.s32 1, %s1770_s19  ;;  %s374_s27 = int_to_ptr.hbm [resolvable:$true] %s373_s27 }
  0x21   : > { %1409 = dma.hbm_to_vmem [thread:$0]  (!%p1923_p10), %s374_s27, 16, %s376_s29, [#allocation9]  }
  0x22   : > { %s60_s13 = ssub.s32 %s1774_s20, %s1946_s15  ;;  %p70_p12 = scmp.ne.s32.totalorder %s1770_s19, %s1766_s18 }
  0x23   : > { %p61_p13 = scmp.eq.s32.totalorder %s60_s13, 0  ;;  %p71_p0 = scmp.eq.s32.totalorder %s1774_s20, 0 }
  0x24   : > { %p1956_p3 = por %p299_p2, %p70_p12  ;;  %p1422_p5 = scmp.lt.s32.totalorder %s1774_s20, 2 }
  0x25   : > { %s1962_s24 = scalar_select %p61_p13, %s1770_s19, %s63_s26  }
  0x26   : > { %p72_p7 = por %p71_p0, %p70_p12  ;;  %s394_s16 = sand.u32 1, %s1770_s19  }
  0x27   : > { %s1262_s12 = sshll.u32 %s394_s16, 4  ;;  %s1359_s22 = sshll.u32 %s1774_s20, 4 }
  0x28   : > { %s403_s25 = scalar_lea.hbm %s2226_s1, %s1359_s22  ;;  %s398_s4 = scalar_lea.vmem [#allocation2], %s1262_s12 }
  0x29   : > { %s406_s29 = sshll.u32 %s398_s4, 4  ;;  %s404_s13 = sshll.u32 %s403_s25, 4  ;;  %s407_s29 = int_to_ptr.vmem [resolvable:$true] %s406_s29  ;;  %s405_s13 = int_to_ptr.hbm [resolvable:$true] %s404_s13 }
  0x2a   : > { %p1969_p2 = pnand %p1422_p5, %p72_p7  ;;  %s395_s26 = scalar_lea.sflag [#allocation3], %s394_s16 }
  0x2b   : > { %s1650_s8 = sshra.s32 %s405_s13, 4  ;;  %s1657_s27 = scalar_lea.hbm %s2226_s1, 32  ;;  %s1651_s8 = int_to_ptr.hbm [resolvable:$true] %s1650_s8 }
  0x2c   : > { %s1652_s9 = scalar_lea.hbm %s1651_s8, 16  ;;  %p1654_p10 = pneg %p1969_p2 }
  0x2d   : > { %p1653_p9 = scmp.ne.s32.totalorder %s1651_s8, %s1652_s9  ;;  %p1658_p0 = scmp.lt.s32.totalorder %s1651_s8, %s2226_s1 }
  0x2e   : > { %p1659_p5 = scmp.lt.s32.totalorder %s1657_s27, %s1652_s9 }
  0x2f   : > { %p1655_p12 = pnand %p1654_p10, %p1653_p9 }
  0x30   : > { %p1660_p7 = por %p1659_p5, %p1658_p0 }
  0x31   : > { %p1656_p13 = pneg %p1655_p12 }
  0x33   : > { %p1661_p11 = pnand %p1660_p7, %p1656_p13 }
  0x35   : > { %1664 = shalt.err (!%p1661_p11)
}
  0x36   : > { %s1802_s16 = smov 128   ;;  %s1803_s4 = smov 8  }
  0x37   : > { %1413 = dma.hbm_to_vmem [thread:$0]  (!%p1969_p2), %s405_s13, 256, %s407_s29, %s395_s26, %s1802_s16, %s1802_s16, %s1803_s4  }
  0x38   : > { %426 = sbr.rel (%p1915_p8) target bundleno = 949 (0x3b5), region = 60  ;;  %s1986_s22 = sand.u32 (!%p1915_p8), 1, %s1766_s18  }
  0x39   : > { %s1266_s8 = sshll.u32 (!%p1915_p8), %s1986_s22, 4  ;;  %s429_s9 = scalar_lea.sflag (!%p1915_p8), [#allocation3], %s1986_s22 }
  0x3a   : > { %s432_s12 = scalar_lea.vmem (!%p1915_p8), [#allocation2], %s1266_s8 }
  0x3d   : > { %1745 = dma.done.wait (%p1902_p4), %s429_s9, 256  }
  0x3e   : > { %1747 = vsyncadd (%p1902_p4), %s429_s9, 4294967040 }
  0x3f   : > { %1749 = dma.done.wait (%p77_p1), [#allocation6], 1024  }
  0x40   : > { %1751 = vsyncadd (%p77_p1), [#allocation6], 4294966272 }
  0x41   : > { %1753 = dma.done.wait (%p77_p1), [#allocation9], 80  }
  0x42   : > { %1755 = vsyncadd (%p77_p1), [#allocation9], 4294967216  ;;  %p507_p8 = scmp.lt.s32.totalorder %s1893_s21, 1  ;;  %v523_v0 = vlaneseq  ;;  %v2025_v7 = vld [vmem:[#allocation10] sm:$0x1]  ;;  %v2029_v9 = vld [vmem:[%s432_s12 + $0x8] sm:$0xff] }
  0x43   : > { %v2027_v8 = vld [vmem:[%s432_s12] sm:$0xff]  ;;  %v1804_v11 = vmov 0.0   ;;  %v556_v14 = vrot.slane %v2029_v9, 7  ;;  %v565_v19 = vrot.slane %v2029_v9, 1  ;;  %s2067_s9 = scalar_lea.vmem [#allocation11], %s1266_s8  ;;  %v2069_v28 = vmov 0.0  }
  0x44   : > { %s508_s5 = scalar_select %p507_p8, %s1893_s21, 1  ;;  %v2006_v1 = vshrl.u32 %v523_v0, 7  ;;  %v555_v13 = vrot.slane %v2027_v8, 7  ;;  %v563_v15 = vpack.c.bf16 %v2029_v9, %v2027_v8  ;;  %v564_v18 = vrot.slane %v2027_v8, 1 }
  0x45   : > { %v2071_v29 = vmov 0.0   ;;  %s2077_s12 = smov 0  }
  0x46   : > { %s1360_s23 = sshll.u32 %s508_s5, 4  ;;  %v525_v2 = vadd.s32 8, %v2006_v1  ;;  %v538_v3 = vadd.s32 4294967295, %v2006_v1  ;;  %vm557_vm2 = vcmp.lt.s32.totalorder %v2006_v1, 1  ;;  %vm566_vm3 = vcmp.lt.s32.totalorder %v2006_v1, 7 }
  0x47   : > { %s511_s13 = scalar_lea.vmem %s2225_s0, %s1360_s23  ;;  %s516_s30 = scalar_lea.vmem %s2227_s2, %s1360_s23  ;;  %v2045_v20 = vsel %vm557_vm2, %v555_v13, %v556_v14  ;;  %v559_v21 = vsel %vm557_vm2, %v556_v14, %v555_v13  ;;  %v2054_v23 = vsel %vm566_vm3, %v564_v18, %v565_v19  ;;  %v568_v24 = vsel %vm566_vm3, %v565_v19, %v564_v18 }
  0x48   : > { %s2019_s4 = scalar_lea.vmem %s2235_s10, %s1360_s23  ;;  %v527_v4 = vadd.s32 1, %v525_v2  ;;  %vm540_vm0 = vcmp.ge.s32.totalorder %v538_v3, 0  ;;  %v2021_v5 = vld [vmem:[%s516_s30] sm:$0xff]  ;;  %v2023_v6 = vld [vmem:[%s516_s30 + $0x8] sm:$0xff] }
  0x49   : > { %v572_v10 = vld [vmem:[%s511_s13] sm:$0xff]   ;;  %v2033_v12 = vsel %vm540_vm0, 1.0, %v1804_v11  ;;  %v573_v16 = vld [vmem:[%s511_s13 + $0x8] sm:$0xff]  }
  0x4a   : > { %vm531_vm1 = vcmp.lt.s32.totalorder %v527_v4, 16  ;;  %v2050_v22 = vmul.f32 %v2033_v12, %v559_v21 }
  0x4b   : > { %v2039_v17 = vsel %vm531_vm1, 1.0, %v1804_v11 }
  0x4c   : > { %v2059_v25 = vmul.f32 %v2039_v17, %v568_v24  ;;  %v562_v26 = vpack.c.bf16 %v2045_v20, %v2050_v22 }
  0x4e   : > { %v571_v27 = vpack.c.bf16 %v2059_v25, %v2054_v23 }
  0x4f LB: >> { %s1363_s8 = smul.u32 24, %s1794_s12  ;;  %v586_v30 = vrot.slane %v1790_v10, 7  ;;  %v587_v31 = vrot.slane %v1786_v16, 7  ;;  %s584_s28 = scalar_lea.vmem %s2231_s6, %s1794_s12  ;;  %vm605_vm4 = vcmask 130048   ;;  %v657_v42 = vpack.c.bf16 %v1786_v16, %v1790_v10  ;;  %s1794_s12 = sphi %s2077_s12, %s579_s12   ;;  %v1790_v10 = vphi %v572_v10, %v867_v10   ;;  %v1786_v16 = vphi %v573_v16, %v868_v16   ;;  %v1782_v29 = vphi %v2071_v29, %v2254_v29   ;;  %v1778_v28 = vphi %v2069_v28, %v2253_v28  }
  0x50   : >> { %v718_v43 = vrot.slane %v1790_v10, 1  ;;  %v719_v44 = vrot.slane %v1786_v16, 1  ;;  %v1516_v51 = vld [vmem:[%s584_s28] ss:$0 sm:$0xff]  ;;  %s1371_s16 = sshll.u32 %s1794_s12, 3  ;;  %s1805_s5 = smov 112  }
  0x51   : >> { %s629_s26 = scalar_lea.vmem %s2228_s3, %s1363_s8  ;;  %v588_v32 = vsel %vm557_vm2, %v586_v30, %v587_v31  ;;  %v589_v33 = vsel %vm557_vm2, %v587_v31, %v586_v30  ;;  %s596_s27 = scalar_lea.vmem [#allocation5], %s1363_s8 }
  0x52   : >> { %v1364_v34 = vld [vmem:[%s596_s27] sm:$0xff]  ;;  %v1367_v36 = vld [vmem:[%s596_s27 + $0x8] sm:$0xff]  ;;  %v590_v37 = vmul.f32 %v2033_v12, %v589_v33  ;;  %v1369_v39 = vld [vmem:[%s596_s27 + $0x10] sm:$0xff]  ;;  %v721_v45 = vsel %vm566_vm3, %v719_v44, %v718_v43  ;;  %v720_v47 = vsel %vm566_vm3, %v718_v43, %v719_v44  ;;  %s838_s8 = scalar_lea.vmem [#allocation7], %s1371_s16  ;;  %s1806_s23 = smov 96  }
  0x53   : >> { %v1366_v35 = vld [vmem:[%s629_s26] sm:$0xff]  ;;  %v1368_v38 = vld [vmem:[%s629_s26 + $0x8] sm:$0xff]  ;;  %v1370_v40 = vld [vmem:[%s629_s26 + $0x10] sm:$0xff]  ;;  %616 = vmatpush.bf16.msra.mxu0 %v1364_v34  ;;  %680 = vmatpush.bf16.msra.mxu2 %v1367_v36  ;;  %v723_v46 = vmul.f32 %v2039_v17, %v721_v45  ;;  %s579_s12 = sadd.s32 1, %s1794_s12  }
  0x54   : >> { %648 = vmatpush.bf16.msra.mxu1 %v1366_v35  ;;  %v592_v41 = vpack.c.bf16 %v588_v32, %v590_v37  ;;  %709 = vmatpush.bf16.msra.mxu3 %v1368_v38  ;;  %v1372_v21 = vld [vmem:[%s838_s8] sm:$0xff]  ;;  %p576_p1 = scmp.ge.s32.totalorder %s579_s12, 2  }
  0x55   : >> { %v724_v48 = vpack.c.bf16 %v723_v46, %v720_v47  ;;  %847 = vrot.lane.b32.xlu1 %v1516_v51, %s1806_s23  ;;  %s1808_s13 = smov (%p576_p1), 112   ;;  %s1809_s25 = smov (%p576_p1), 120   ;;  %vm1009_vm13 = vcmask (%p576_p1), 1043456   ;;  %vm998_vm14 = vcmask (%p576_p1), 64512  }
  0x56   : >> { %1286 = vmatmul.msk.bf16.vlgmr.msra.gmra.mxu0 %vm605_vm4, %v592_v41  ;;  %1300 = vmatmul.msk.bf16.vlgmr.msra.gmra.mxu2 %vm605_vm4, %v657_v42  ;;  %s1376_s16 = sshll.u32 (%p576_p1), %s1893_s21, 4  ;;  %s1052_s28 = sshll.u32 (%p576_p1), %s2067_s9, 4  ;;  %s1053_s28 = int_to_ptr.vmem [resolvable:$true] %s1052_s28 }
  0x57   : >> { %747 = vmatpush.bf16.msrb.mxu0 %v1369_v39  ;;  %1292 = vmatmul.msk.bf16.vlgmr.msra.gmra.mxu1 %vm605_vm4, %v562_v26  ;;  %s1051_s23 = scalar_lea.hbm (%p576_p1), %s2236_s11, %s1376_s16  ;;  %s1700_s27 = scalar_lea.hbm (%p576_p1), %s2236_s11, 32 }
  0x58   : >> { %776 = vmatpush.bf16.msrb.mxu1 %v1370_v40  ;;  %1308 = vmatmul.msk.bf16.vlgmr.msra.gmra.mxu3 %vm605_vm4, %v563_v15  ;;  %s1054_s29 = sshll.u32 (%p576_p1), %s1051_s23, 4  ;;  %s1055_s29 = int_to_ptr.hbm [resolvable:$true] %s1054_s29 }
  0x59   : >> { %860 = vmatpush.bf16.msrb.mxu2 %v1372_v21  ;;  %s1694_s21 = sshra.s32 (%p576_p1), %s1055_s29, 4  ;;  %s1695_s21 = int_to_ptr.hbm [resolvable:$true] %s1694_s21 }
  0x5a   : > { %p1701_p9 = scmp.lt.s32.totalorder (%p576_p1), %s1695_s21, %s2236_s11 }
  0x66   : >> { %1316 = vmatmul.msk.bf16.vlgmr.msrb.gmra.mxu0 %vm605_vm4, %v724_v48 }
  0x67   : >> { %1324 = vmatmul.msk.bf16.vlgmr.msrb.gmra.mxu1 %vm605_vm4, %v571_v27 }
  0xd3   : >> { %v618_v49 = vpop.f32.mrf.mxu0 }
  0xd4   : >> { %v650_v50 = vpop.f32.mrf.mxu1  ;;  %v626_v52 = vadd.f32 %v1516_v51, %v618_v49 }
  0xd6   : >> { %v655_v56 = vadd.f32 %v650_v50, %v626_v52 }
  0xd9   : >> { %v682_v53 = vpop.f32.mrf.mxu2 }
  0xda   : >> { %v687_v57 = vadd.f32 %v682_v53, %v655_v56 }
  0xdb   : >> { %v620_v54 = vpop.f32.mrf.mxu0  ;;  %v711_v58 = vpop.f32.mrf.mxu3 }
  0xdc   : >> { %v652_v55 = vpop.f32.mrf.mxu1  ;;  %v627_v59 = vadd.f32 %v1516_v51, %v620_v54  ;;  %v716_v60 = vadd.f32 %v711_v58, %v687_v57 }
  0xde   : >> { %v656_v0 = vadd.f32 %v652_v55, %v627_v59 }
  0xe1   : >> { %v684_v61 = vpop.f32.mrf.mxu2 }
  0xe2   : >> { %v688_v3 = vadd.f32 %v684_v61, %v656_v0 }
  0xe3   : >> { %v749_v62 = vpop.f32.mrf.mxu0  ;;  %v713_v13 = vpop.f32.mrf.mxu3 }
  0xe4   : >> { %v778_v63 = vpop.f32.mrf.mxu1  ;;  %v754_v2 = vadd.f32 %v749_v62, %v716_v60  ;;  %v717_v14 = vadd.f32 %v713_v13, %v688_v3 }
  0xe6   : >> { %v783_v4 = vadd.f32 %v778_v63, %v754_v2  ;;  %v848_v63 = vpop.permute.xlu1 %847 }
  0xe8   : >> { %v1325_v11 = vmul.f32 -1.442695, %v783_v4 }
  0xea   : >> { %1517 = vpow2.f32 %v1325_v11 }
  0xeb   : >> { %v751_v18 = vpop.f32.mrf.mxu0 }
  0xec   : >> { %v755_v19 = vadd.f32 %v751_v18, %v717_v14  ;;  %v780_v24 = vpop.f32.mrf.mxu1  ;;  %v1807_v14 = vmov (%p576_p1), 0   ;;  %v1374_v18 = vld [vmem:[%s2232_s7 + $0x8] sm:$0xff] (%p576_p1) }
  0xed   : > { %1529 = vset.pattern.permute.xlu0 (%p576_p1), %v1807_v14  ;;  %952 = vmatpush.bf16.msra.mxu1 (%p576_p1), %v1374_v18 }
  0xee   : >> { %v784_v30 = vadd.f32 %v780_v24, %v755_v19 }
  0xf0   : >> { %v1518_v31 = vpop.eup %1517  ;;  %v1326_v32 = vmul.f32 -1.442695, %v784_v30 }
  0xf1   : >> { %v793_v33 = vadd.f32 1.0, %v1518_v31 }
  0xf2   : >> { %1519 = vpow2.f32 %v1326_v32 }
  0xf3   : >> { %1521 = vrcp.f32 %v793_v33  ;;  %v806_v39 = vand.u32 2147483648, %v793_v33  ;;  %v804_v41 = vand.u32 2147483647, %v793_v33  ;;  %vm800_vm6 = vweird.f32 %v793_v33 }
  0xf5   : >> { %v807_v44 = vor.u32 1.1754944e-38, %v806_v39  ;;  %vm805_vm8 = vcmp.eq.f32.partialorder %v804_v41, 8.507059e+37 }
  0xf8   : >> { %v1520_v34 = vpop.eup %1519 }
  0xf9   : >> { %v1522_v35 = vpop.eup %1521  ;;  %v794_v36 = vadd.f32 1.0, %v1520_v34  ;;  %v925_v34 = vperm.slane (%p576_p1), %v2025_v7, 0 }
  0xfa   : >> { %v796_v37 = vmul.f32 %v1522_v35, %v793_v33  ;;  %vm801_vm5 = vweird.f32 %v1522_v35 }
  0xfb   : >> { %1523 = vrcp.f32 %v794_v36  ;;  %vm802_vm7 = vmor %vm800_vm6, %vm801_vm5  ;;  %v821_v49 = vand.u32 2147483648, %v794_v36  ;;  %v819_v52 = vand.u32 2147483647, %v794_v36  ;;  %vm815_vm10 = vweird.f32 %v794_v36 }
  0xfc   : >> { %v797_v38 = vsub.f32 1.0, %v796_v37  ;;  %1525 = vtanh.f32 %v783_v4 }
  0xfd   : >> { %v822_v54 = vor.u32 1.1754944e-38, %v821_v49  ;;  %vm820_vm12 = vcmp.eq.f32.partialorder %v819_v52, 8.507059e+37  ;;  %1527 = vtanh.f32 %v784_v30 }
  0xfe   : >> { %v798_v40 = vmul.f32 %v1522_v35, %v797_v38 }
 0x100   : >> { %v799_v42 = vadd.f32 %v1522_v35, %v798_v40 }
 0x101   : >> { %v1524_v43 = vpop.eup %1523 }
 0x102   : >> { %v803_v45 = vsel %vm802_vm7, %v1522_v35, %v799_v42  ;;  %v811_v46 = vmul.f32 %v1524_v43, %v794_v36  ;;  %vm816_vm9 = vweird.f32 %v1524_v43  ;;  %v1526_v58 = vpop.eup %1525 }
 0x103   : >> { %v808_v47 = vsel %vm805_vm8, %v807_v44, %v803_v45  ;;  %vm817_vm11 = vmor %vm815_vm10, %vm816_vm9  ;;  %v1528_v59 = vpop.eup %1527 }
 0x104   : >> { %827 = vrot.lane.b32.xlu0 %v808_v47, %s1805_s5  ;;  %v812_v48 = vsub.f32 1.0, %v811_v46 }
 0x106   : >> { %v813_v50 = vmul.f32 %v1524_v43, %v812_v48 }
 0x108   : >> { %v814_v53 = vadd.f32 %v1524_v43, %v813_v50 }
 0x10a   : >> { %v818_v55 = vsel %vm817_vm11, %v1524_v43, %v814_v53 }
 0x10b   : >> { %v823_v56 = vsel %vm820_vm12, %v822_v54, %v818_v55 }
 0x10c   : >> { %829 = vrot.lane.b32.xlu0 %v823_v56, %s1805_s5 }
 0x114   : > { %873 = vperm.xlu0 (%p576_p1), %1529, %v2021_v5   ;;  %v1373_v5 = vld [vmem:[%s2232_s7] sm:$0xff] (%p576_p1) }
 0x115   : > { %917 = vmatpush.bf16.msra.mxu0 (%p576_p1), %v1373_v5 }
 0x11c   : > { %878 = vperm.xlu0 (%p576_p1), %1529, %v2023_v6   ;;  %v1375_v6 = vld [vmem:[%s2232_s7 + $0x10] sm:$0xff] (%p576_p1) }
 0x11d   : > { %987 = vmatpush.bf16.msra.mxu2 (%p576_p1), %v1375_v6 }
 0x176   : >> { %v828_v57 = vpop.permute.xlu0 %827 }
 0x177   : >> { %v833_v61 = vmul.f32 %v1526_v58, %v828_v57 }
 0x17e   : >> { %v830_v60 = vpop.permute.xlu0 %829 }
 0x17f   : >> { %v834_v51 = vmul.f32 %v1528_v59, %v830_v60 }
 0x181   : >> { %v835_v62 = vpack.c.bf16 %v834_v51, %v833_v61 }
 0x183   : >> { %1333 = vmatmul.msk.bf16.vlgmr.msrb.gmra.mxu2 %vm605_vm4, %v835_v62 }
 0x186   : > { %v874_v19 = vpop.permute.xlu0 (%p576_p1), %873 }
 0x18e   : > { %v2160_v24 = vpop.permute.xlu0 (%p576_p1), %878 }
 0x206   : >> { %v862_v0 = vpop.f32.mrf.mxu2 }
 0x207   : >> { %v863_v2 = vadd.f32 %v862_v0, %v848_v63 }
 0x209   : >> { %v867_v10 = vadd.f32 %v1790_v10, %v863_v2   ;;  %v869_v3 = vadd.f32 %v1782_v29, %v863_v2  }
 0x20b   : >> { %v2254_v29 = vmov %v869_v3  ;;  %v881_v21 = vmul.f32 (%p576_p1), %v874_v19, %v869_v3 }
 0x20d   : > { %885 = vrot.lane.b32.xlu1 (%p576_p1), %v881_v21, %s1808_s13 }
 0x20e   : >> { %v864_v11 = vpop.f32.mrf.mxu2 }
 0x20f   : >> { %v865_v13 = vadd.f32 %v864_v11, %v848_v63  ;;  %578 = sbr.rel (!%p576_p1) target bundleno = 79 (0x4f), region = 156 }
 0x211   : >> { %v868_v16 = vadd.f32 %v1786_v16, %v865_v13   ;;  %v870_v4 = vadd.f32 %v1778_v28, %v865_v13  }
 0x213   : >> { %v2253_v28 = vmov %v870_v4  ;;  %v882_v10 = vmul.f32 (%p576_p1), %v2160_v24, %v870_v4 }
 0x215   : > { %887 = vrot.lane.b32.xlu1 %v882_v10, %s1808_s13  ;;  %v929_v8 = vpack.c.bf16 %v882_v10, %v881_v21 }
 0x217   : > { %934 = vrot.lane.b32.xlu2 %v929_v8, %s1808_s13  ;;  %s1696_s13 = scalar_lea.hbm %s1695_s21, 16 }
 0x218   : > { %p1697_p4 = scmp.ne.s32.totalorder %s1695_s21, %s1696_s13  ;;  %p1702_p10 = scmp.lt.s32.totalorder %s1700_s27, %s1696_s13 }
 0x21a   : > { %p1698_p11 = pnand %p1697_p4, %p1956_p3  ;;  %p1703_p12 = por %p1702_p10, %p1701_p9 }
 0x21c   : > { %p1699_p2 = pneg %p1698_p11 }
 0x21e   : > { %p1704_p13 = pnand %p1703_p12, %p1699_p2 }
 0x21f   : > { %1003 = vrot.lane.b32.xlu2 %v925_v34, %s1809_s25 }
 0x271   : > { %v935_v9 = vpop.permute.xlu2 %934 }
 0x272   : > { %1345 = vmatmul.msk.bf16.vlgmr.msra.gmra.mxu1 %vm605_vm4, %v935_v9 }
 0x279   : > { %v1004_v48 = vpop.permute.xlu2 %1003 }
 0x27f   : > { %v886_v15 = vpop.permute.xlu1 %885 }
 0x280   : > { %v891_v20 = vrot.slane %v886_v15, 7  ;;  %v961_v22 = vrot.slane %v886_v15, 1 }
 0x287   : > { %v888_v16 = vpop.permute.xlu1 %887 }
 0x288   : > { %v892_v23 = vrot.slane %v888_v16, 7  ;;  %v962_v25 = vrot.slane %v888_v16, 1 }
 0x28a   : > { %v894_v26 = vsel %vm557_vm2, %v892_v23, %v891_v20  ;;  %v964_v27 = vsel %vm566_vm3, %v962_v25, %v961_v22  ;;  %v893_v30 = vsel %vm557_vm2, %v891_v20, %v892_v23  ;;  %v963_v31 = vsel %vm566_vm3, %v961_v22, %v962_v25 }
 0x28b   : > { %v895_v28 = vmul.f32 %v2033_v12, %v894_v26  ;;  %v966_v29 = vmul.f32 %v2039_v17, %v964_v27  ;;  %v1002_v12 = vld [vmem:[#allocation8] sm:$0xf] }
 0x28c   : > { %v1011_v17 = vsel %vm1009_vm13, %v1002_v12, 0 }
 0x28d   : > { %v897_v32 = vpack.c.bf16 %v893_v30, %v895_v28  ;;  %v967_v33 = vpack.c.bf16 %v966_v29, %v963_v31  ;;  %1020 = vmatpush.bf16.msra.mxu3 %v1011_v17 }
 0x28f   : > { %1338 = vmatmul.msk.bf16.vlgmr.msra.gmra.mxu0 %vm605_vm4, %v897_v32  ;;  %1352 = vmatmul.msk.bf16.vlgmr.msra.gmra.mxu2 %vm605_vm4, %v967_v33 }
 0x2ef   : > { %v954_v1 = vpop.f32.mrf.mxu1 }
 0x2f7   : > { %v956_v7 = vpop.f32.mrf.mxu1 }
 0x30c   : > { %v919_v35 = vpop.f32.mrf.mxu0 }
 0x30d   : > { %v927_v36 = vadd.f32 %v925_v34, %v919_v35 }
 0x30f   : > { %v959_v37 = vadd.f32 %v954_v1, %v927_v36 }
 0x312   : > { %v989_v38 = vpop.f32.mrf.mxu2 }
 0x313   : > { %v994_v39 = vadd.f32 %v989_v38, %v959_v37 }
 0x314   : > { %v921_v40 = vpop.f32.mrf.mxu0 }
 0x315   : > { %v996_v41 = vmul.f32 %v994_v39, %v874_v19  ;;  %v928_v42 = vadd.f32 %v925_v34, %v921_v40 }
 0x317   : > { %999 = vst.msk [vmem:[%s2019_s4] sm:$0xff] %vm998_vm14, %v996_v41  ;;  %v960_v43 = vadd.f32 %v956_v7, %v928_v42 }
 0x31a   : > { %v991_v44 = vpop.f32.mrf.mxu2 }
 0x31b   : > { %v995_v45 = vadd.f32 %v991_v44, %v960_v43 }
 0x31d   : > { %v997_v46 = vmul.f32 %v995_v45, %v2160_v24 }
 0x31f   : > { %1000 = vst.msk [vmem:[%s2019_s4 + $0x8] sm:$0xff] %vm998_vm14, %v997_v46  ;;  %v1001_v47 = vpack.c.bf16 %v997_v46, %v996_v41  ;;  %s1037_s4 = scalar_lea.sflag [#allocation4], %s1986_s22 }
 0x321   : > { %1353 = vmatmul.msk.bf16.vlgmr.msra.gmra.mxu3 %vm998_vm14, %v1001_v47 }
 0x3a4   : > { %v1022_v49 = vpop.f32.mrf.mxu3 }
 0x3a5   : > { %v1023_v50 = vadd.f32 %v1022_v49, %v1004_v48 }
 0x3a7   : > { %v1027_v52 = vmul.f32 %v1023_v50, %v874_v19 }
 0x3a9   : > { %1029 = vst.msk [vmem:[%s2067_s9] sm:$0xff] %vm605_vm4, %v1027_v52 }
 0x3ac   : > { %v1024_v53 = vpop.f32.mrf.mxu3 }
 0x3ad   : > { %v1025_v54 = vadd.f32 %v1024_v53, %v1004_v48 }
 0x3af   : > { %v1028_v55 = vmul.f32 %v1025_v54, %v2160_v24 }
 0x3b1   : > { %1030 = vst.msk [vmem:[%s2067_s9 + $0x8] sm:$0xff] %vm605_vm4, %v1028_v55 }
 0x3b2   : > { %1707 = shalt.err (!%p1704_p13)
}
 0x3b3   : > { %s1810_s22 = smov 128   ;;  %s1811_s9 = smov 8  }
 0x3b4   : > { %1395 = dma.vmem_to_hbm [thread:$0]  (%p1956_p3), %s1053_s28, 256, %s1055_s29, %s1037_s4, %s1810_s22, %s1810_s22, %s1811_s9  }
 0x3b5 PF: > { %s1077_s8 = sand.u32 1, %s1762_s17   ;;  %p2256_p0 = scmp.ge.s32.totalorder %s1774_s20, 2 }
 0x3b6   : > { %s1078_s5 = scalar_lea.sflag [#allocation4], %s1077_s8 }
 0x3b7   : > { %p1415_p5 = pnand %p2256_p0, %p1907_p6 }
 0x3b9   : > { %p1416_p7 = pneg %p1415_p5 }
 0x3bb   : > { %1757 = dma.done.wait (%p1416_p7), %s1078_s5, 256  }
 0x3bc   : > { %1759 = vsyncadd (%p1416_p7), %s1078_s5, 4294967040  ;;  %p27_p8 = scmp.ge.s32.totalorder %s1946_s15, 4   ;;  %s2257_s17 = smov %s1766_s18 }
 0x3bd   : > { %s2258_s18 = smov %s1770_s19  ;;  %s2259_s19 = smov %s1962_s24 }
 0x3be   : > { %s2260_s20 = smov %s1946_s15  ;;  %29 = sbr.rel (!%p27_p8) target bundleno = 12 (0xc), region = 167 }
 0x3c3   :  { %1084 = vsyncpa [#allocation3], 1 }
 0x3c4   :  { %1086 = vsyncpa [#allocation3 + $0x1], 1 }
 0x3c5   :  { %1087 = vsyncpa [#allocation6], 1 }
 0x3c6   :  { %1088 = vsyncpa [#allocation9], 1 }
 0x3c7   :  { %1089 = vsyncpa [#allocation4], 1 }
 0x3c8   :  { %1091 = vsyncpa [#allocation4 + $0x1], 1 }

// kernel: variational_generator_forward.4
= control target key start
LH: loop header
LB: loop body
LE: loop exit
PB: predicated region body
PF: predicated region fallthrough
CT: control target
= control target key end

     0   :  { %s3765_s0 = inlined_call_operand.vmem [shape: f32[2,16,16], index: 0, kind: input, shape index: {}]   ;;  %s3766_s1 = inlined_call_operand.vmem [shape: f32[2,16,16], index: 1, kind: input, shape index: {}]   ;;  %s3767_s2 = inlined_call_operand.vmem [shape: f32[2,16,1], index: 2, kind: input, shape index: {}]   ;;  %s3768_s3 = inlined_call_operand.hbm [shape: bf16[3,16,16], index: 3, kind: input, shape index: {}]   ;;  %s3769_s4 = inlined_call_operand.vmem [shape: bf16[4,4,16], index: 4, kind: input, shape index: {}]   ;;  %s3770_s5 = inlined_call_operand.vmem [shape: bf16[4,16,4], index: 5, kind: input, shape index: {}]   ;;  %s3771_s6 = inlined_call_operand.hbm [shape: f32[4,1,20], index: 6, kind: input, shape index: {}]   ;;  %s3772_s7 = inlined_call_operand.vmem [shape: bf16[8,16,32], index: 7, kind: input, shape index: {}]   ;;  %s3773_s8 = inlined_call_operand.hbm [shape: bf16[24,16,32], index: 8, kind: input, shape index: {}]   ;;  %s3774_s9 = inlined_call_operand.vmem [shape: bf16[8,16,32], index: 9, kind: input, shape index: {}]   ;;  %s3775_s10 = inlined_call_operand.hbm [shape: f32[8,1,64], index: 10, kind: input, shape index: {}]   ;;  %s3776_s11 = inlined_call_operand.hbm [shape: f32[1,16], index: 11, kind: input, shape index: {}]   ;;  %s3777_s12 = inlined_call_operand.vmem [shape: f32[2,16,8], index: 12, kind: output, shape index: {}]  }
   0x1   :  { %3778 = sst [smem:[#allocation13_spill]] %s3768_s3 }
   0x2   :  { %3779 = sst [smem:[#allocation14_spill]] %s3771_s6 }
   0x3   :  { %17 = vsyncpa [#allocation3], 0 }
   0x4   :  { %18 = vsyncpa [#allocation5], 0 }
   0x5   :  { %19 = vsyncpa [#allocation8], 0  ;;  %s3203_s21 = smov 0  }
   0x6 LB: > { %s3780_s6 = sld [smem:[#allocation14_spill]]  ;;  %s3212_s25 = sadd.s32 4294967295, %s3034_s21   ;;  %s3034_s21 = sphi %s3203_s21, %s25_s21  }
   0x7   : > { %p2221_p0 = scmp.ge.s32.totalorder %s3034_s21, 1  ;;  %p323_p1 = scmp.lt.s32.totalorder %s3034_s21, 3 }
   0x8   : > { %p2528_p2 = scmp.eq.s32.totalorder %s3212_s25, 0  ;;  %s3116_s27 = smov [#allocation4]  }
   0x9   : > { %p3217_p3 = pnand %p2221_p0, %p323_p1  ;;  %s356_s28 = sshll.u32 %s3116_s27, 4  ;;  %s357_s28 = int_to_ptr.vmem [resolvable:$true] %s356_s28 }
   0xa   : > { %s388_s13 = sshll.u32 %s3775_s10, 4  ;;  %s3117_s15 = smov [#allocation7]   ;;  %s389_s13 = int_to_ptr.hbm [resolvable:$true] %s388_s13 }
   0xb   : > { %p2512_p4 = pneg %p3217_p3  ;;  %s390_s16 = sshll.u32 %s3117_s15, 4  ;;  %s391_s16 = int_to_ptr.vmem [resolvable:$true] %s390_s16 }
   0xc   : > { %s354_s24 = sshll.u32 %s3780_s6, 4  ;;  %s3783_s3 = sld [smem:[#allocation13_spill]]  ;;  %s355_s24 = int_to_ptr.hbm [resolvable:$true] %s354_s24 }
   0xd   : > { %p3228_p5 = pnand %p2528_p2, %p2512_p4  ;;  %s3118_s20 = smov 16  }
   0xe   : > { %s3119_s22 = smov 1   ;;  %s3120_s23 = smov [#allocation2]  }
   0xf   : > { %2518 = dma.hbm_to_vmem [thread:$0]  (!%p3228_p5), %s355_s24, 64, %s357_s28, [#allocation5], %s3118_s20, %s3118_s20, %s3119_s22  }
  0x10   : > { %2524 = dma.hbm_to_vmem [thread:$0]  (!%p3228_p5), %s389_s13, 128, %s391_s16, [#allocation8], %s3118_s20, %s3118_s20, %s3119_s22  }
  0x11   : > { %s336_s27 = sshll.u32 %s3120_s23, 4  ;;  %s3121_s29 = smov 64   ;;  %s337_s27 = int_to_ptr.vmem [resolvable:$true] %s336_s27 }
  0x12   : > { %s334_s19 = sshll.u32 %s3783_s3, 4  ;;  %s3122_s30 = smov 4   ;;  %s335_s19 = int_to_ptr.hbm [resolvable:$true] %s334_s19 }
  0x13   : > { %2515 = dma.hbm_to_vmem [thread:$0]  (!%p3228_p5), %s335_s19, 384, %s337_s27, [#allocation3], %s3121_s29, %s3121_s29, %s3122_s30  }
  0x14   : > { %s371_s18 = sshll.u32 %s3773_s8, 4  ;;  %s3123_s3 = smov [#allocation6]   ;;  %s372_s18 = int_to_ptr.hbm [resolvable:$true] %s371_s18 }
  0x15   : > { %s373_s6 = sshll.u32 %s3123_s3, 4  ;;  %s403_s13 = sshll.u32 %s3776_s11, 4  ;;  %s374_s6 = int_to_ptr.vmem [resolvable:$true] %s373_s6  ;;  %s404_s13 = int_to_ptr.hbm [resolvable:$true] %s403_s13 }
  0x16   : > { %2521 = dma.hbm_to_vmem [thread:$0]  (!%p3228_p5), %s372_s18, 3072, %s374_s6, [#allocation5], %s3121_s29, %s3121_s29, %s3122_s30  }
  0x17   : > { %s3124_s16 = smov [#allocation9]   ;;  %442 = sbr.rel (%p3217_p3) target bundleno = 3390 (0xd3e), region = 68 }
  0x18   : > { %s405_s20 = sshll.u32 %s3124_s16, 4  ;;  %s406_s20 = int_to_ptr.vmem [resolvable:$true] %s405_s20 }
  0x19   : > { %2527 = dma.hbm_to_vmem [thread:$0]  (!%p3228_p5), %s404_s13, 16, %s406_s20, [#allocation8]  }
  0x1c   : > { %3021 = dma.done.wait (%p2528_p2), [#allocation3], 384  }
  0x1d   : > { %3023 = vsyncadd (%p2528_p2), [#allocation3], 4294966912 }
  0x1e   : > { %3025 = dma.done.wait (%p2528_p2), [#allocation5], 3136  }
  0x1f   : > { %3027 = vsyncadd (%p2528_p2), [#allocation5], 4294964160 }
  0x20   : > { %3029 = dma.done.wait (%p2528_p2), [#allocation8], 144  }
  0x21   : > { %3031 = vsyncadd (%p2528_p2), [#allocation8], 4294967152  ;;  %p515_p6 = scmp.lt.s32.totalorder %s3212_s25, 1  ;;  %v536_v0 = vlaneseq  ;;  %v3125_v2 = vmov 0   ;;  %vm695_vm0 = vcmask 1041408   ;;  %v2463_v7 = vld [vmem:[#allocation2 + $0x8] sm:$0xff] }
  0x22   : > { %2728 = vset.pattern.permute.xlu0 %v3125_v2  ;;  %v687_v6 = vld [vmem:[%s3769_s4] sm:$0x3]  ;;  %vm691_vm2 = vcmask 31744   ;;  %v2464_v10 = vld [vmem:[#allocation2 + $0x10] sm:$0xff]  ;;  %vm594_vm3 = vcmask 130048   ;;  %637 = vmatpush.bf16.msra.mxu1 %v2463_v7  ;;  %v3126_v16 = vmov 0.0  }
  0x23   : > { %s3793_s25 = smov (!%p515_p6, %s3212_s25), 1  ;;  %v3267_v1 = vshrl.u32 %v536_v0, 7  ;;  %v2462_v8 = vld [vmem:[#allocation2] sm:$0xff]  ;;  %v697_v9 = vsel %vm695_vm0, %v687_v6, 0  ;;  %673 = vmatpush.bf16.msra.mxu2 %v2464_v10  ;;  %v3321_v34 = vld [vmem:[#allocation4] ss:$0 sm:$0xff] }
  0x24   : > { %s2458_s3 = sshll.u32 %s3793_s25, 4  ;;  %706 = vmatpush.bf16.msra.mxu3 %v697_v9  ;;  %605 = vmatpush.bf16.msra.mxu0 %v2462_v8  ;;  %v2729_v40 = vld [vmem:[#allocation9] ss:$0 sm:$0xff]  ;;  %v3333_v57 = vmov 0.0   ;;  %v3335_v58 = vmov 0.0   ;;  %s3341_s28 = smov 0  }
  0x25   : > { %v551_v3 = vadd.s32 4294967295, %v3267_v1  ;;  %v538_v4 = vadd.s32 8, %v3267_v1  ;;  %s519_s14 = scalar_lea.vmem %s3765_s0, %s2458_s3  ;;  %s3277_s23 = scalar_lea.vmem %s3777_s12, %s2458_s3  ;;  %vm580_vm5 = vcmp.lt.s32.totalorder %v3267_v1, 1  ;;  %vm648_vm6 = vcmp.lt.s32.totalorder %v3267_v1, 7 }
  0x26   : > { %s524_s30 = scalar_lea.vmem %s3766_s1, %s2458_s3  ;;  %s3285_s17 = scalar_lea.vmem %s3767_s2, %s2458_s3  ;;  %v3291_v11 = vld [vmem:[%s519_s14] sm:$0xff]  ;;  %v3293_v12 = vld [vmem:[%s519_s14 + $0x8] sm:$0xff] }
  0x27   : > { %vm553_vm1 = vcmp.ge.s32.totalorder %v551_v3, 0  ;;  %v540_v5 = vadd.s32 1, %v538_v4  ;;  %v686_v13 = vpack.c.bf16 %v3293_v12, %v3291_v11  ;;  %v575_v14 = vld [vmem:[%s524_s30] sm:$0xff]  ;;  %v576_v15 = vld [vmem:[%s524_s30 + $0x8] sm:$0xff] }
  0x28   : > { %v3298_v17 = vsel %vm553_vm1, 1.0, %v3126_v16  ;;  %v563_v18 = vld [vmem:[%s3285_s17] sm:$0xff]  ;;  %v578_v19 = vrot.slane %v575_v14, 7  ;;  %v579_v20 = vrot.slane %v576_v15, 7  ;;  %v617_v21 = vpack.c.bf16 %v576_v15, %v575_v14  ;;  %v564_v33 = vld [vmem:[%s3285_s17 + $0x8] sm:$0xff] }
  0x29   : > { %vm544_vm4 = vcmp.lt.s32.totalorder %v540_v5, 16  ;;  %v646_v22 = vrot.slane %v575_v14, 1  ;;  %v647_v23 = vrot.slane %v576_v15, 1  ;;  %567 = vperm.xlu0 %2728, %v563_v18   ;;  %2259 = vmatmul.msk.bf16.vlgmr.msra.gmra.mxu3 %vm691_vm2, %v686_v13 }
  0x2a   : > { %v3304_v24 = vsel %vm544_vm4, 1.0, %v3126_v16  ;;  %2253 = vmatmul.msk.bf16.vlgmr.msra.gmra.mxu1 %vm594_vm3, %v617_v21  ;;  %v581_v25 = vsel %vm580_vm5, %v578_v19, %v579_v20  ;;  %v582_v26 = vsel %vm580_vm5, %v579_v20, %v578_v19 }
  0x2b   : > { %v583_v27 = vmul.f32 %v3298_v17, %v582_v26  ;;  %v649_v28 = vsel %vm648_vm6, %v646_v22, %v647_v23  ;;  %v650_v29 = vsel %vm648_vm6, %v647_v23, %v646_v22 }
  0x2c   : > { %v652_v30 = vmul.f32 %v3304_v24, %v650_v29 }
  0x2d   : > { %v585_v31 = vpack.c.bf16 %v581_v25, %v583_v27 }
  0x2e   : > { %v653_v32 = vpack.c.bf16 %v652_v30, %v649_v28 }
  0x2f   : > { %2248 = vmatmul.msk.bf16.vlgmr.msra.gmra.mxu0 %vm594_vm3, %v585_v31 }
  0x30   : > { %2258 = vmatmul.msk.bf16.vlgmr.msra.gmra.mxu2 %vm594_vm3, %v653_v32 }
  0x31   : > { %572 = vperm.xlu0 %2728, %v564_v33  }
  0x9b   : > { %v3323_v36 = vpop.permute.xlu0 %567 }
  0xa3   : > { %v3328_v48 = vpop.permute.xlu0 %572 }
  0xa7   : > { %v639_v39 = vpop.f32.mrf.mxu1 }
  0xac   : > { %v607_v35 = vpop.f32.mrf.mxu0  ;;  %v708_v37 = vpop.f32.mrf.mxu3 }
  0xad   : > { %v709_v38 = vadd.f32 %v3321_v34, %v708_v37  ;;  %v615_v43 = vadd.f32 %v2729_v40, %v607_v35 }
  0xaf   : > { %v713_v41 = vmul.f32 %v709_v38, %v3323_v36   ;;  %v644_v49 = vadd.f32 %v639_v39, %v615_v43  ;;  %v641_v51 = vpop.f32.mrf.mxu1 }
  0xb3   : > { %v675_v42 = vpop.f32.mrf.mxu2 }
  0xb4   : > { %v609_v44 = vpop.f32.mrf.mxu0  ;;  %v710_v45 = vpop.f32.mrf.mxu3  ;;  %v680_v54 = vadd.f32 %v675_v42, %v644_v49 }
  0xb5   : > { %v616_v46 = vadd.f32 %v2729_v40, %v609_v44  ;;  %v711_v47 = vadd.f32 %v3321_v34, %v710_v45 }
  0xb7   : > { %v714_v50 = vmul.f32 %v711_v47, %v3328_v48   ;;  %v645_v52 = vadd.f32 %v641_v51, %v616_v46 }
  0xbb   : > { %v677_v53 = vpop.f32.mrf.mxu2 }
  0xbc   : > { %v681_v55 = vadd.f32 %v677_v53, %v645_v52 }
  0xbe   : > { %v3331_v56 = vpack.c.bf16 %v681_v55, %v680_v54 }
  0xbf LB: >> { %s2465_s13 = sshll.u32 %s3054_s28, 3  ;;  %s2467_s16 = smul.u32 24, %s3054_s28  ;;  %v760_v59 = vrot.slane %v3050_v41, 7  ;;  %v761_v60 = vrot.slane %v3046_v50, 7  ;;  %v830_v61 = vrot.slane %v3050_v41, 1  ;;  %v831_v62 = vrot.slane %v3046_v50, 1  ;;  %s3054_s28 = sphi %s3341_s28, %s720_s28   ;;  %v3050_v41 = vphi %v713_v41, %v951_v41   ;;  %v3046_v50 = vphi %v714_v50, %v952_v50   ;;  %v3042_v58 = vphi %v3335_v58, %v3785_v58   ;;  %v3038_v57 = vphi %v3333_v57, %v3784_v57  }
  0xc0   : >> { %s729_s6 = scalar_lea.vmem %s3772_s7, %s2465_s13  ;;  %s725_s26 = scalar_lea.vmem [#allocation7], %s3054_s28  ;;  %v798_v9 = vpack.c.bf16 %v3046_v50, %v3050_v41 }
  0xc1   : >> { %v2466_v63 = vld [vmem:[%s729_s6] sm:$0xff]  ;;  %v762_v0 = vsel %vm580_vm5, %v760_v59, %v761_v60  ;;  %v763_v2 = vsel %vm580_vm5, %v761_v60, %v760_v59  ;;  %s770_s14 = scalar_lea.vmem [#allocation6], %s2467_s16  ;;  %v832_v7 = vsel %vm648_vm6, %v830_v61, %v831_v62  ;;  %v833_v8 = vsel %vm648_vm6, %v831_v62, %v830_v61  ;;  %s920_s27 = scalar_lea.vmem %s3774_s9, %s2465_s13 }
  0xc2   : >> { %v2468_v3 = vld [vmem:[%s770_s14] sm:$0xff]  ;;  %v2469_v4 = vld [vmem:[%s770_s14 + $0x8] sm:$0xff]  ;;  %v2470_v5 = vld [vmem:[%s770_s14 + $0x10] sm:$0xff]  ;;  %v764_v6 = vmul.f32 %v3298_v17, %v763_v2  ;;  %748 = vmatpush.bf16.msra.mxu0 %v2466_v63  ;;  %v835_v10 = vmul.f32 %v3304_v24, %v833_v8  ;;  %s3127_s29 = smov 112   ;;  %s3128_s30 = smov 96  }
  0xc3   : >> { %789 = vmatpush.bf16.msra.mxu1 %v2468_v3  ;;  %821 = vmatpush.bf16.msra.mxu2 %v2469_v4  ;;  %v2731_v15 = vld [vmem:[%s725_s26] ss:$0 sm:$0xff]  ;;  %s720_s28 = sadd.s32 1, %s3054_s28  }
  0xc4   : >> { %v766_v13 = vpack.c.bf16 %v762_v0, %v764_v6  ;;  %859 = vmatpush.bf16.msra.mxu3 %v2470_v5  ;;  %v836_v14 = vpack.c.bf16 %v835_v10, %v832_v7  ;;  %v2472_v33 = vld [vmem:[%s920_s27] sm:$0xff]  ;;  %929 = vrot.lane.b32.xlu1 %v2731_v15, %s3128_s30  ;;  %p717_p7 = scmp.ge.s32.totalorder %s720_s28, 2  }
  0xc5   : >> { %2266 = vmatmul.msk.bf16.vlgmr.msra.gmra.mxu0 %vm594_vm3, %v3331_v56  ;;  %s3129_s17 = smov (%p717_p7), 112   ;;  %s3130_s18 = smov (%p717_p7), 124  }
  0xc6   : >> { %2273 = vmatmul.msk.bf16.vlgmr.msra.gmra.mxu1 %vm594_vm3, %v766_v13  ;;  %2281 = vmatmul.msk.bf16.vlgmr.msra.gmra.mxu2 %vm594_vm3, %v798_v9  ;;  %s3456_s13 = smov (%p717_p7), 0  }
  0xc7   : >> { %2289 = vmatmul.msk.bf16.vlgmr.msra.gmra.mxu3 %vm594_vm3, %v836_v14  ;;  %942 = vmatpush.bf16.msrb.mxu0 %v2472_v33 }
 0x142   : >> { %v750_v16 = vpop.f32.mrf.mxu0 }
 0x143   : >> { %v758_v18 = vadd.f32 %v2731_v15, %v750_v16  ;;  %v791_v19 = vpop.f32.mrf.mxu1 }
 0x145   : >> { %v796_v20 = vadd.f32 %v791_v19, %v758_v18 }
 0x149   : >> { %v823_v21 = vpop.f32.mrf.mxu2 }
 0x14a   : >> { %v828_v22 = vadd.f32 %v823_v21, %v796_v20  ;;  %v861_v23 = vpop.f32.mrf.mxu3  ;;  %v752_v25 = vpop.f32.mrf.mxu0 }
 0x14b   : >> { %v759_v27 = vadd.f32 %v2731_v15, %v752_v25  ;;  %v793_v28 = vpop.f32.mrf.mxu1  ;;  %v930_v15 = vpop.permute.xlu1 %929 }
 0x14c   : >> { %v866_v26 = vadd.f32 %v861_v23, %v828_v22 }
 0x14d   : >> { %v797_v30 = vadd.f32 %v793_v28, %v759_v27  ;;  %v2473_v28 = vld [vmem:[%s3770_s5] sm:$0xff] (%p717_p7) }
 0x14e   : >> { %v2290_v29 = vmul.f32 -1.442695, %v866_v26  ;;  %982 = vmatpush.bf16.msra.mxu0 (%p717_p7), %v2473_v28 }
 0x150   : >> { %2732 = vpow2.f32 %v2290_v29 }
 0x151   : >> { %v825_v31 = vpop.f32.mrf.mxu2 }
 0x152   : >> { %v829_v32 = vadd.f32 %v825_v31, %v797_v30  ;;  %v863_v35 = vpop.f32.mrf.mxu3 }
 0x154   : >> { %v867_v37 = vadd.f32 %v863_v35, %v829_v32 }
 0x156   : >> { %v2733_v38 = vpop.eup %2732  ;;  %v2291_v39 = vmul.f32 -1.442695, %v867_v37 }
 0x157   : >> { %v876_v40 = vadd.f32 1.0, %v2733_v38 }
 0x158   : >> { %2734 = vpow2.f32 %v2291_v39 }
 0x159   : >> { %2736 = vrcp.f32 %v876_v40  ;;  %v889_v47 = vand.u32 2147483648, %v876_v40  ;;  %v887_v51 = vand.u32 2147483647, %v876_v40  ;;  %vm883_vm8 = vweird.f32 %v876_v40 }
 0x15b   : >> { %v890_v54 = vor.u32 1.1754944e-38, %v889_v47  ;;  %vm888_vm10 = vcmp.eq.f32.partialorder %v887_v51, 8.507059e+37 }
 0x15e   : >> { %v2735_v42 = vpop.eup %2734 }
 0x15f   : >> { %v2737_v43 = vpop.eup %2736  ;;  %v877_v44 = vadd.f32 1.0, %v2735_v42 }
 0x160   : >> { %v879_v45 = vmul.f32 %v2737_v43, %v876_v40  ;;  %vm884_vm7 = vweird.f32 %v2737_v43 }
 0x161   : >> { %2738 = vrcp.f32 %v877_v44  ;;  %vm885_vm9 = vmor %vm883_vm8, %vm884_vm7  ;;  %v904_v62 = vand.u32 2147483648, %v877_v44  ;;  %v902_v0 = vand.u32 2147483647, %v877_v44  ;;  %vm898_vm12 = vweird.f32 %v877_v44 }
 0x162   : >> { %v880_v46 = vsub.f32 1.0, %v879_v45  ;;  %2740 = vtanh.f32 %v866_v26 }
 0x163   : >> { %v905_v3 = vor.u32 1.1754944e-38, %v904_v62  ;;  %vm903_vm14 = vcmp.eq.f32.partialorder %v902_v0, 8.507059e+37  ;;  %2742 = vtanh.f32 %v867_v37 }
 0x164   : >> { %v881_v49 = vmul.f32 %v2737_v43, %v880_v46 }
 0x166   : >> { %v882_v52 = vadd.f32 %v2737_v43, %v881_v49 }
 0x167   : >> { %v2739_v53 = vpop.eup %2738 }
 0x168   : >> { %v886_v55 = vsel %vm885_vm9, %v2737_v43, %v882_v52  ;;  %v894_v59 = vmul.f32 %v2739_v53, %v877_v44  ;;  %vm899_vm11 = vweird.f32 %v2739_v53  ;;  %v2741_v7 = vpop.eup %2740  ;;  %v3442_v43 = vld [vmem:[#allocation4 + $0x1] ss:$0 sm:$0xff] (%p717_p7)  ;;  %v3448_v52 = vmov (%p717_p7), 0.0  }
 0x169   : >> { %v891_v60 = vsel %vm888_vm10, %v890_v54, %v886_v55  ;;  %vm900_vm13 = vmor %vm898_vm12, %vm899_vm11  ;;  %v2743_v8 = vpop.eup %2742 }
 0x16a   : >> { %910 = vrot.lane.b32.xlu0 %v891_v60, %s3127_s29  ;;  %v895_v61 = vsub.f32 1.0, %v894_v59 }
 0x16c   : >> { %v896_v63 = vmul.f32 %v2739_v53, %v895_v61 }
 0x16e   : >> { %v897_v2 = vadd.f32 %v2739_v53, %v896_v63 }
 0x170   : >> { %v901_v4 = vsel %vm900_vm13, %v2739_v53, %v897_v2  ;;  %v3450_v53 = vmov (%p717_p7), 0.0  }
 0x171   : >> { %v906_v5 = vsel %vm903_vm14, %v905_v3, %v901_v4 }
 0x172   : >> { %912 = vrot.lane.b32.xlu0 %v906_v5, %s3127_s29 }
 0x1dc   : >> { %v911_v6 = vpop.permute.xlu0 %910 }
 0x1dd   : >> { %v916_v10 = vmul.f32 %v2741_v7, %v911_v6 }
 0x1e4   : >> { %v913_v9 = vpop.permute.xlu0 %912 }
 0x1e5   : >> { %v917_v13 = vmul.f32 %v2743_v8, %v913_v9 }
 0x1e7   : >> { %v918_v14 = vpack.c.bf16 %v917_v13, %v916_v10 }
 0x1e9   : >> { %2297 = vmatmul.msk.bf16.vlgmr.msrb.gmra.mxu0 %vm594_vm3, %v918_v14 }
 0x266   : >> { %v944_v16 = vpop.f32.mrf.mxu0 }
 0x267   : >> { %v945_v18 = vadd.f32 %v944_v16, %v930_v15 }
 0x269   : >> { %v949_v19 = vadd.f32 %v3050_v41, %v945_v18  ;;  %v953_v20 = vadd.f32 %v3042_v58, %v945_v18  }
 0x26b   : >> { %v951_v41 = vmul.f32 %v949_v19, %v3323_v36   ;;  %v3785_v58 = vmov %v953_v20  ;;  %v955_v26 = vmul.f32 (%p717_p7), %v953_v20, %v3323_v36 }
 0x26c   : > { %v3420_v41 = vmul.f32 (%p717_p7), %v3291_v11, %v3323_v36 }
 0x26e   : >> { %v946_v21 = vpop.f32.mrf.mxu0  ;;  %995 = vrot.lane.b32.xlu1 (%p717_p7), %v3420_v41, %s3130_s18 }
 0x26f   : >> { %v947_v22 = vadd.f32 %v946_v21, %v930_v15  ;;  %719 = sbr.rel (!%p717_p7) target bundleno = 191 (0xbf), region = 188 }
 0x271   : >> { %v950_v23 = vadd.f32 %v3046_v50, %v947_v22  ;;  %v954_v25 = vadd.f32 %v3038_v57, %v947_v22  }
 0x273   : >> { %v952_v50 = vmul.f32 %v950_v23, %v3328_v48   ;;  %v3784_v57 = vmov %v954_v25  ;;  %v956_v27 = vmul.f32 (%p717_p7), %v954_v25, %v3328_v48 }
 0x274   : > { %v3425_v50 = vmul.f32 %v3293_v12, %v3328_v48 }
 0x275   : > { %v957_v29 = vpack.c.bf16 %v956_v27, %v955_v26 }
 0x276   : > { %997 = vrot.lane.b32.xlu1 %v3425_v50, %s3130_s18 }
 0x277   : > { %961 = vrot.lane.b32.xlu0 %v957_v29, %s3129_s17 }
 0x27f   : > { %969 = vrot.lane.b32.xlu0 %v3321_v34, %s3129_s17  ;;  %v2303_v34 = vld [vmem:[%s3769_s4 + $0x2] sm:$0x3] }
 0x280   : > { %v1015_v58 = vsel %vm695_vm0, %v2303_v34, 0 }
 0x281   : > { %1024 = vmatpush.bf16.msra.mxu1 %v1015_v58 }
 0x2e0   : > { %v996_v30 = vpop.permute.xlu1 %995 }
 0x2e8   : > { %v998_v37 = vpop.permute.xlu1 %997 }
 0x2e9   : > { %v962_v57 = vpop.permute.xlu0 %961 }
 0x2ea   : > { %2302 = vmatmul.msk.bf16.vlgmr.msra.gmra.mxu0 %vm594_vm3, %v962_v57 }
 0x2f1   : > { %v970_v31 = vpop.permute.xlu0 %969 }
 0x367   : > { %v984_v11 = vpop.f32.mrf.mxu0 }
 0x368   : > { %v985_v32 = vadd.f32 %v984_v11, %v970_v31 }
 0x36a   : > { %v989_v12 = vmul.f32 %v985_v32, %v3323_v36 }
 0x36c   : > { %v3435_v39 = vadd.f32 %v996_v30, %v989_v12 }
 0x36f   : > { %v986_v33 = vpop.f32.mrf.mxu0 }
 0x370   : > { %v987_v35 = vadd.f32 %v986_v33, %v970_v31 }
 0x372   : > { %v990_v38 = vmul.f32 %v987_v35, %v3328_v48 }
 0x374   : > { %v3437_v40 = vadd.f32 %v998_v37, %v990_v38 }
 0x376   : > { %v1005_v42 = vpack.c.bf16 %v3437_v40, %v3435_v39 }
 0x378   : > { %2304 = vmatmul.msk.bf16.vlgmr.msra.gmra.mxu1 %vm691_vm2, %v1005_v42 }
 0x3f5   : > { %v1026_v44 = vpop.f32.mrf.mxu1 }
 0x3f6   : > { %v1027_v45 = vadd.f32 %v3442_v43, %v1026_v44 }
 0x3f8   : > { %v1031_v46 = vmul.f32 %v1027_v45, %v3323_v36  }
 0x3fd   : > { %v1028_v47 = vpop.f32.mrf.mxu1 }
 0x3fe   : > { %v1029_v49 = vadd.f32 %v3442_v43, %v1028_v47 }
 0x400   : > { %v1032_v51 = vmul.f32 %v1029_v49, %v3328_v48  }
 0x401 LB: >> { %s2306_s16 = sshll.u32 %s3074_s13, 3  ;;  %s2018_s20 = smul.u32 24, %s3074_s13  ;;  %v1079_v54 = vrot.slane %v3070_v46, 7  ;;  %v1080_v55 = vrot.slane %v3066_v51, 7  ;;  %v1149_v59 = vrot.slane %v3070_v46, 1  ;;  %v1150_v60 = vrot.slane %v3066_v51, 1  ;;  %s3074_s13 = sphi %s3456_s13, %s1038_s13   ;;  %v3070_v46 = vphi %v1031_v46, %v1270_v46   ;;  %v3066_v51 = vphi %v1032_v51, %v1271_v51   ;;  %v3062_v53 = vphi %v3450_v53, %v3787_v53   ;;  %v3058_v52 = vphi %v3448_v52, %v3786_v52  }
 0x402   : >> { %s2016_s26 = scalar_lea.vmem %s3772_s7, %s2306_s16  ;;  %s2013_s14 = scalar_lea.vmem [#allocation7], %s3074_s13  ;;  %v1117_v7 = vpack.c.bf16 %v3066_v51, %v3070_v46 }
 0x403   : >> { %v2474_v61 = vld [vmem:[%s2016_s26 + $0x10] sm:$0xff]  ;;  %v1081_v62 = vsel %vm580_vm5, %v1079_v54, %v1080_v55  ;;  %v1082_v63 = vsel %vm580_vm5, %v1080_v55, %v1079_v54  ;;  %s2019_s19 = scalar_lea.vmem [#allocation6], %s2018_s20  ;;  %v1151_v5 = vsel %vm648_vm6, %v1149_v59, %v1150_v60  ;;  %v1152_v6 = vsel %vm648_vm6, %v1150_v60, %v1149_v59  ;;  %v2745_v13 = vld [vmem:[%s2013_s14 + $0x2] ss:$0 sm:$0xff]  ;;  %s2030_s29 = scalar_lea.vmem %s3774_s9, %s2306_s16 }
 0x404   : >> { %v2475_v0 = vld [vmem:[%s2019_s19 + $0x30] sm:$0xff]  ;;  %v2476_v2 = vld [vmem:[%s2019_s19 + $0x38] sm:$0xff]  ;;  %v2477_v3 = vld [vmem:[%s2019_s19 + $0x40] sm:$0xff]  ;;  %v1083_v4 = vmul.f32 %v3298_v17, %v1082_v63  ;;  %1067 = vmatpush.bf16.msra.mxu0 %v2474_v61  ;;  %v1154_v8 = vmul.f32 %v3304_v24, %v1152_v6  ;;  %s3131_s30 = smov 112   ;;  %s3132_s25 = smov 96  }
 0x405   : >> { %1108 = vmatpush.bf16.msra.mxu1 %v2475_v0  ;;  %1140 = vmatpush.bf16.msra.mxu2 %v2476_v2  ;;  %v2478_v34 = vld [vmem:[%s2030_s29 + $0x10] sm:$0xff]  ;;  %s1038_s13 = sadd.s32 1, %s3074_s13  }
 0x406   : >> { %v1085_v9 = vpack.c.bf16 %v1081_v62, %v1083_v4  ;;  %1178 = vmatpush.bf16.msra.mxu3 %v2477_v3  ;;  %v1155_v10 = vpack.c.bf16 %v1154_v8, %v1151_v5  ;;  %1248 = vrot.lane.b32.xlu1 %v2745_v13, %s3132_s25  ;;  %p1035_p8 = scmp.ge.s32.totalorder %s1038_s13, 2  }
 0x407   : >> { %2313 = vmatmul.msk.bf16.vlgmr.msra.gmra.mxu0 %vm594_vm3, %v3331_v56  ;;  %s3563_s13 = smov (%p1035_p8), 0  }
 0x408   : >> { %2320 = vmatmul.msk.bf16.vlgmr.msra.gmra.mxu1 %vm594_vm3, %v1085_v9  ;;  %2328 = vmatmul.msk.bf16.vlgmr.msra.gmra.mxu2 %vm594_vm3, %v1117_v7 }
 0x409   : >> { %2336 = vmatmul.msk.bf16.vlgmr.msra.gmra.mxu3 %vm594_vm3, %v1155_v10  ;;  %1261 = vmatpush.bf16.msrb.mxu0 %v2478_v34 }
 0x484   : >> { %v1069_v14 = vpop.f32.mrf.mxu0 }
 0x485   : >> { %v1077_v15 = vadd.f32 %v2745_v13, %v1069_v14  ;;  %v1110_v16 = vpop.f32.mrf.mxu1 }
 0x487   : >> { %v1115_v18 = vadd.f32 %v1110_v16, %v1077_v15  ;;  %v1249_v15 = vpop.permute.xlu1 %1248 }
 0x48b   : >> { %v1142_v19 = vpop.f32.mrf.mxu2 }
 0x48c   : >> { %v1147_v20 = vadd.f32 %v1142_v19, %v1115_v18  ;;  %v1180_v21 = vpop.f32.mrf.mxu3  ;;  %v1071_v22 = vpop.f32.mrf.mxu0 }
 0x48d   : >> { %v1078_v25 = vadd.f32 %v2745_v13, %v1071_v22  ;;  %v1112_v26 = vpop.f32.mrf.mxu1 }
 0x48e   : >> { %v1185_v23 = vadd.f32 %v1180_v21, %v1147_v20 }
 0x48f   : >> { %v1116_v28 = vadd.f32 %v1112_v26, %v1078_v25 }
 0x490   : >> { %v2337_v27 = vmul.f32 -1.442695, %v1185_v23 }
 0x492   : >> { %2746 = vpow2.f32 %v2337_v27 }
 0x493   : >> { %v1144_v29 = vpop.f32.mrf.mxu2 }
 0x494   : >> { %v1148_v57 = vadd.f32 %v1144_v29, %v1116_v28  ;;  %v1182_v58 = vpop.f32.mrf.mxu3  ;;  %v2479_v28 = vld [vmem:[%s3770_s5 + $0x8] sm:$0xff] (%p1035_p8) }
 0x495   : > { %1302 = vmatpush.bf16.msra.mxu0 (%p1035_p8), %v2479_v28 }
 0x496   : >> { %v1186_v11 = vadd.f32 %v1182_v58, %v1148_v57 }
 0x498   : >> { %v2747_v30 = vpop.eup %2746  ;;  %v2338_v31 = vmul.f32 -1.442695, %v1186_v11 }
 0x499   : >> { %v1195_v32 = vadd.f32 1.0, %v2747_v30 }
 0x49a   : >> { %2748 = vpow2.f32 %v2338_v31 }
 0x49b   : >> { %2750 = vrcp.f32 %v1195_v32  ;;  %v1208_v42 = vand.u32 2147483648, %v1195_v32  ;;  %v1206_v45 = vand.u32 2147483647, %v1195_v32  ;;  %vm1202_vm1 = vweird.f32 %v1195_v32 }
 0x49d   : >> { %v1209_v54 = vor.u32 1.1754944e-38, %v1208_v42  ;;  %vm1207_vm7 = vcmp.eq.f32.partialorder %v1206_v45, 8.507059e+37  ;;  %v3555_v45 = vmov (%p1035_p8), 0.0  }
 0x4a0   : >> { %v2749_v33 = vpop.eup %2748 }
 0x4a1   : >> { %v2751_v12 = vpop.eup %2750  ;;  %v1196_v35 = vadd.f32 1.0, %v2749_v33 }
 0x4a2   : >> { %v1198_v37 = vmul.f32 %v2751_v12, %v1195_v32  ;;  %vm1203_vm15 = vweird.f32 %v2751_v12 }
 0x4a3   : >> { %2752 = vrcp.f32 %v1196_v35  ;;  %vm1204_vm4 = vmor %vm1202_vm1, %vm1203_vm15  ;;  %v1223_v62 = vand.u32 2147483648, %v1196_v35  ;;  %v1221_v0 = vand.u32 2147483647, %v1196_v35  ;;  %vm1217_vm9 = vweird.f32 %v1196_v35 }
 0x4a4   : >> { %v1199_v38 = vsub.f32 1.0, %v1198_v37  ;;  %2754 = vtanh.f32 %v1185_v23 }
 0x4a5   : >> { %v1224_v3 = vor.u32 1.1754944e-38, %v1223_v62  ;;  %vm1222_vm11 = vcmp.eq.f32.partialorder %v1221_v0, 8.507059e+37  ;;  %2756 = vtanh.f32 %v1186_v11 }
 0x4a6   : >> { %v1200_v44 = vmul.f32 %v2751_v12, %v1199_v38 }
 0x4a8   : >> { %v1201_v47 = vadd.f32 %v2751_v12, %v1200_v44 }
 0x4a9   : >> { %v2753_v49 = vpop.eup %2752 }
 0x4aa   : >> { %v1205_v55 = vsel %vm1204_vm4, %v2751_v12, %v1201_v47  ;;  %v1213_v59 = vmul.f32 %v2753_v49, %v1196_v35  ;;  %vm1218_vm8 = vweird.f32 %v2753_v49  ;;  %v2755_v7 = vpop.eup %2754  ;;  %v3549_v12 = vld [vmem:[#allocation4 + $0x2] ss:$0 sm:$0xff] (%p1035_p8) }
 0x4ab   : >> { %v1210_v60 = vsel %vm1207_vm7, %v1209_v54, %v1205_v55  ;;  %vm1219_vm10 = vmor %vm1217_vm9, %vm1218_vm8  ;;  %v2757_v8 = vpop.eup %2756 }
 0x4ac   : >> { %1229 = vrot.lane.b32.xlu0 %v1210_v60, %s3131_s30  ;;  %v1214_v61 = vsub.f32 1.0, %v1213_v59 }
 0x4ae   : >> { %v1215_v63 = vmul.f32 %v2753_v49, %v1214_v61 }
 0x4b0   : >> { %v1216_v2 = vadd.f32 %v2753_v49, %v1215_v63 }
 0x4b2   : >> { %v1220_v4 = vsel %vm1219_vm10, %v2753_v49, %v1216_v2 }
 0x4b3   : >> { %v1225_v5 = vsel %vm1222_vm11, %v1224_v3, %v1220_v4 }
 0x4b4   : >> { %1231 = vrot.lane.b32.xlu0 %v1225_v5, %s3131_s30 }
 0x51e   : >> { %v1230_v6 = vpop.permute.xlu0 %1229 }
 0x51f   : >> { %v1235_v10 = vmul.f32 %v2755_v7, %v1230_v6 }
 0x526   : >> { %v1232_v9 = vpop.permute.xlu0 %1231 }
 0x527   : >> { %v1236_v13 = vmul.f32 %v2757_v8, %v1232_v9 }
 0x529   : >> { %v1237_v14 = vpack.c.bf16 %v1236_v13, %v1235_v10 }
 0x52b   : >> { %2346 = vmatmul.msk.bf16.vlgmr.msrb.gmra.mxu0 %vm594_vm3, %v1237_v14 }
 0x5a8   : >> { %v1263_v16 = vpop.f32.mrf.mxu0 }
 0x5a9   : >> { %v1264_v18 = vadd.f32 %v1263_v16, %v1249_v15 }
 0x5ab   : >> { %v1268_v19 = vadd.f32 %v3070_v46, %v1264_v18  ;;  %v1272_v20 = vadd.f32 %v3062_v53, %v1264_v18  }
 0x5ad   : >> { %v1270_v46 = vmul.f32 %v1268_v19, %v3323_v36   ;;  %v3787_v53 = vmov %v1272_v20  ;;  %v1274_v26 = vmul.f32 (%p1035_p8), %v1272_v20, %v3323_v36 }
 0x5ae   : > { %v2354_v46 = vld [vmem:[%s3769_s4 + $0x4] sm:$0x3] (%p1035_p8) }
 0x5b0   : >> { %v1265_v21 = vpop.f32.mrf.mxu0 }
 0x5b1   : >> { %v1266_v22 = vadd.f32 %v1265_v21, %v1249_v15  ;;  %1037 = sbr.rel (!%p1035_p8) target bundleno = 1025 (0x401), region = 199 }
 0x5b3   : >> { %v1269_v23 = vadd.f32 %v3066_v51, %v1266_v22  ;;  %v1273_v25 = vadd.f32 %v3058_v52, %v1266_v22  }
 0x5b5   : >> { %v1271_v51 = vmul.f32 %v1269_v23, %v3328_v48   ;;  %v3786_v52 = vmov %v1273_v25  ;;  %v1275_v27 = vmul.f32 (%p1035_p8), %v1273_v25, %v3328_v48 }
 0x5b6   : > { %v1325_v51 = vsel %vm695_vm0, %v2354_v46, 0 }
 0x5b7   : > { %v1276_v29 = vpack.c.bf16 %v1275_v27, %v1274_v26  ;;  %1334 = vmatpush.bf16.msra.mxu1 %v1325_v51 }
 0x5b9   : > { %1281 = vrot.lane.b32.xlu0 %v1276_v29, %s3129_s17 }
 0x5c1   : > { %1289 = vrot.lane.b32.xlu0 %v3442_v43, %s3129_s17 }
 0x62b   : > { %v1282_v57 = vpop.permute.xlu0 %1281 }
 0x62c   : > { %2353 = vmatmul.msk.bf16.vlgmr.msra.gmra.mxu0 %vm594_vm3, %v1282_v57 }
 0x633   : > { %v1290_v53 = vpop.permute.xlu0 %1289 }
 0x6a9   : > { %v1304_v52 = vpop.f32.mrf.mxu0 }
 0x6aa   : > { %v1305_v34 = vadd.f32 %v1304_v52, %v1290_v53 }
 0x6ac   : > { %v1309_v11 = vmul.f32 %v1305_v34, %v3323_v36 }
 0x6ae   : > { %v3541_v43 = vadd.f32 %v1309_v11, %v3420_v41 }
 0x6b1   : > { %v1306_v58 = vpop.f32.mrf.mxu0 }
 0x6b2   : > { %v1307_v30 = vadd.f32 %v1306_v58, %v1290_v53 }
 0x6b4   : > { %v1310_v31 = vmul.f32 %v1307_v30, %v3328_v48 }
 0x6b6   : > { %v3544_v32 = vadd.f32 %v1310_v31, %v3425_v50  ;;  %v3557_v50 = vmov 0.0  }
 0x6b8   : > { %v1315_v33 = vpack.c.bf16 %v3544_v32, %v3541_v43 }
 0x6ba   : > { %2355 = vmatmul.msk.bf16.vlgmr.msra.gmra.mxu1 %vm691_vm2, %v1315_v33 }
 0x737   : > { %v1336_v35 = vpop.f32.mrf.mxu1 }
 0x738   : > { %v1337_v37 = vadd.f32 %v3549_v12, %v1336_v35 }
 0x73a   : > { %v1341_v38 = vmul.f32 %v1337_v37, %v3323_v36  }
 0x73f   : > { %v1338_v42 = vpop.f32.mrf.mxu1 }
 0x740   : > { %v1339_v44 = vadd.f32 %v3549_v12, %v1338_v42 }
 0x742   : > { %v1342_v41 = vmul.f32 %v1339_v44, %v3328_v48  }
 0x743 LB: >> { %s2357_s16 = sshll.u32 %s3094_s13, 3  ;;  %s2037_s20 = smul.u32 24, %s3094_s13  ;;  %v1389_v47 = vrot.slane %v3090_v38, 7  ;;  %v1390_v49 = vrot.slane %v3086_v41, 7  ;;  %v1459_v54 = vrot.slane %v3090_v38, 1  ;;  %v1460_v55 = vrot.slane %v3086_v41, 1  ;;  %s3094_s13 = sphi %s3563_s13, %s1348_s13   ;;  %v3090_v38 = vphi %v1341_v38, %v1580_v38   ;;  %v3086_v41 = vphi %v1342_v41, %v1581_v41   ;;  %v3082_v50 = vphi %v3557_v50, %v3789_v50   ;;  %v3078_v45 = vphi %v3555_v45, %v3788_v45  }
 0x744   : >> { %s2035_s26 = scalar_lea.vmem %s3772_s7, %s2357_s16  ;;  %s2032_s14 = scalar_lea.vmem [#allocation7], %s3094_s13  ;;  %v1427_v5 = vpack.c.bf16 %v3086_v41, %v3090_v38 }
 0x745   : >> { %v2480_v59 = vld [vmem:[%s2035_s26 + $0x20] sm:$0xff]  ;;  %v1391_v60 = vsel %vm580_vm5, %v1389_v47, %v1390_v49  ;;  %v1392_v61 = vsel %vm580_vm5, %v1390_v49, %v1389_v47  ;;  %s2038_s19 = scalar_lea.vmem [#allocation6], %s2037_s20  ;;  %v1461_v3 = vsel %vm648_vm6, %v1459_v54, %v1460_v55  ;;  %v1462_v4 = vsel %vm648_vm6, %v1460_v55, %v1459_v54  ;;  %s2049_s29 = scalar_lea.vmem %s3774_s9, %s2357_s16 }
 0x746   : >> { %v2481_v62 = vld [vmem:[%s2038_s19 + $0x60] sm:$0xff]  ;;  %v2482_v63 = vld [vmem:[%s2038_s19 + $0x68] sm:$0xff]  ;;  %v2483_v0 = vld [vmem:[%s2038_s19 + $0x70] sm:$0xff]  ;;  %v1393_v2 = vmul.f32 %v3298_v17, %v1392_v61  ;;  %1377 = vmatpush.bf16.msra.mxu0 %v2480_v59  ;;  %v1464_v6 = vmul.f32 %v3304_v24, %v1462_v4  ;;  %s3133_s30 = smov 112   ;;  %s3134_s25 = smov 96  }
 0x747   : >> { %1418 = vmatpush.bf16.msra.mxu1 %v2481_v62  ;;  %1450 = vmatpush.bf16.msra.mxu2 %v2482_v63  ;;  %v2759_v9 = vld [vmem:[%s2032_s14 + $0x4] ss:$0 sm:$0xff]  ;;  %s1348_s13 = sadd.s32 1, %s3094_s13  }
 0x748   : >> { %v1395_v7 = vpack.c.bf16 %v1391_v60, %v1393_v2  ;;  %1488 = vmatpush.bf16.msra.mxu3 %v2483_v0  ;;  %v1465_v8 = vpack.c.bf16 %v1464_v6, %v1461_v3  ;;  %v2484_v29 = vld [vmem:[%s2049_s29 + $0x20] sm:$0xff]  ;;  %1558 = vrot.lane.b32.xlu1 %v2759_v9, %s3134_s25  ;;  %p1345_p9 = scmp.ge.s32.totalorder %s1348_s13, 2  }
 0x749   : >> { %2364 = vmatmul.msk.bf16.vlgmr.msra.gmra.mxu0 %vm594_vm3, %v3331_v56  ;;  %s3672_s13 = smov (%p1345_p9), 0  }
 0x74a   : >> { %2371 = vmatmul.msk.bf16.vlgmr.msra.gmra.mxu1 %vm594_vm3, %v1395_v7  ;;  %2379 = vmatmul.msk.bf16.vlgmr.msra.gmra.mxu2 %vm594_vm3, %v1427_v5 }
 0x74b   : >> { %2387 = vmatmul.msk.bf16.vlgmr.msra.gmra.mxu3 %vm594_vm3, %v1465_v8  ;;  %1571 = vmatpush.bf16.msrb.mxu0 %v2484_v29 }
 0x7c6   : >> { %v1379_v10 = vpop.f32.mrf.mxu0 }
 0x7c7   : >> { %v1387_v13 = vadd.f32 %v2759_v9, %v1379_v10  ;;  %v1420_v14 = vpop.f32.mrf.mxu1 }
 0x7c9   : >> { %v1425_v15 = vadd.f32 %v1420_v14, %v1387_v13  ;;  %v1559_v13 = vpop.permute.xlu1 %1558 }
 0x7cd   : >> { %v1452_v16 = vpop.f32.mrf.mxu2 }
 0x7ce   : >> { %v1457_v18 = vadd.f32 %v1452_v16, %v1425_v15  ;;  %v1490_v19 = vpop.f32.mrf.mxu3  ;;  %v1381_v20 = vpop.f32.mrf.mxu0 }
 0x7cf   : >> { %v1388_v22 = vadd.f32 %v2759_v9, %v1381_v20  ;;  %v1422_v23 = vpop.f32.mrf.mxu1 }
 0x7d0   : >> { %v1495_v21 = vadd.f32 %v1490_v19, %v1457_v18 }
 0x7d1   : >> { %v1426_v26 = vadd.f32 %v1422_v23, %v1388_v22 }
 0x7d2   : >> { %v2388_v25 = vmul.f32 -1.442695, %v1495_v21 }
 0x7d4   : >> { %2760 = vpow2.f32 %v2388_v25 }
 0x7d5   : >> { %v1454_v27 = vpop.f32.mrf.mxu2 }
 0x7d6   : >> { %v1458_v28 = vadd.f32 %v1454_v27, %v1426_v26  ;;  %v1492_v57 = vpop.f32.mrf.mxu3  ;;  %v2485_v26 = vld [vmem:[%s3770_s5 + $0x10] sm:$0xff] (%p1345_p9) }
 0x7d7   : > { %1612 = vmatpush.bf16.msra.mxu0 (%p1345_p9), %v2485_v26 }
 0x7d8   : >> { %v1496_v46 = vadd.f32 %v1492_v57, %v1458_v28 }
 0x7da   : >> { %v2761_v51 = vpop.eup %2760  ;;  %v2389_v52 = vmul.f32 -1.442695, %v1496_v46 }
 0x7db   : >> { %v1505_v53 = vadd.f32 1.0, %v2761_v51 }
 0x7dc   : >> { %2762 = vpow2.f32 %v2389_v52  ;;  %v1622_v52 = vmul.f32 (%p1345_p9), %v3437_v40, %v3328_v48 }
 0x7dd   : >> { %2764 = vrcp.f32 %v1505_v53  ;;  %v1518_v33 = vand.u32 2147483648, %v1505_v53  ;;  %v1516_v37 = vand.u32 2147483647, %v1505_v53  ;;  %vm1512_vm13 = vweird.f32 %v1505_v53 }
 0x7df   : >> { %v1519_v47 = vor.u32 1.1754944e-38, %v1518_v33  ;;  %vm1517_vm15 = vcmp.eq.f32.partialorder %v1516_v37, 8.507059e+37 }
 0x7e2   : >> { %v2763_v34 = vpop.eup %2762 }
 0x7e3   : >> { %v2765_v58 = vpop.eup %2764  ;;  %v1506_v11 = vadd.f32 1.0, %v2763_v34 }
 0x7e4   : >> { %v1508_v30 = vmul.f32 %v2765_v58, %v1505_v53  ;;  %vm1513_vm12 = vweird.f32 %v2765_v58 }
 0x7e5   : >> { %2766 = vrcp.f32 %v1506_v11  ;;  %vm1514_vm14 = vmor %vm1512_vm13, %vm1513_vm12  ;;  %v1533_v60 = vand.u32 2147483648, %v1506_v11  ;;  %v1531_v62 = vand.u32 2147483647, %v1506_v11  ;;  %vm1527_vm4 = vweird.f32 %v1506_v11 }
 0x7e6   : >> { %v1509_v31 = vsub.f32 1.0, %v1508_v30  ;;  %2768 = vtanh.f32 %v1495_v21  ;;  %v3658_v30 = vld [vmem:[#allocation4 + $0x3] ss:$0 sm:$0xff] (%p1345_p9) }
 0x7e7   : >> { %v1534_v0 = vor.u32 1.1754944e-38, %v1533_v60  ;;  %vm1532_vm8 = vcmp.eq.f32.partialorder %v1531_v62, 8.507059e+37  ;;  %2770 = vtanh.f32 %v1496_v46  ;;  %v1621_v46 = vmul.f32 (%p1345_p9), %v3435_v39, %v3323_v36 }
 0x7e8   : >> { %v1510_v35 = vmul.f32 %v2765_v58, %v1509_v31 }
 0x7ea   : >> { %v1511_v42 = vadd.f32 %v2765_v58, %v1510_v35 }
 0x7eb   : >> { %v2767_v44 = vpop.eup %2766 }
 0x7ec   : >> { %v1515_v49 = vsel %vm1514_vm14, %v2765_v58, %v1511_v42  ;;  %v1523_v54 = vmul.f32 %v2767_v44, %v1506_v11  ;;  %vm1528_vm1 = vweird.f32 %v2767_v44  ;;  %v2769_v5 = vpop.eup %2768  ;;  %v3664_v42 = vmov (%p1345_p9), 0.0  }
 0x7ed   : >> { %v1520_v55 = vsel %vm1517_vm15, %v1519_v47, %v1515_v49  ;;  %vm1529_vm7 = vmor %vm1527_vm4, %vm1528_vm1  ;;  %v2771_v6 = vpop.eup %2770 }
 0x7ee   : >> { %1539 = vrot.lane.b32.xlu0 %v1520_v55, %s3133_s30  ;;  %v1524_v59 = vsub.f32 1.0, %v1523_v54 }
 0x7f0   : >> { %v1525_v61 = vmul.f32 %v2767_v44, %v1524_v59 }
 0x7f2   : >> { %v1526_v63 = vadd.f32 %v2767_v44, %v1525_v61 }
 0x7f4   : >> { %v1530_v2 = vsel %vm1529_vm7, %v2767_v44, %v1526_v63  ;;  %v3666_v44 = vmov (%p1345_p9), 0.0  }
 0x7f5   : >> { %v1535_v3 = vsel %vm1532_vm8, %v1534_v0, %v1530_v2 }
 0x7f6   : >> { %1541 = vrot.lane.b32.xlu0 %v1535_v3, %s3133_s30 }
 0x860   : >> { %v1540_v4 = vpop.permute.xlu0 %1539 }
 0x861   : >> { %v1545_v8 = vmul.f32 %v2769_v5, %v1540_v4 }
 0x868   : >> { %v1542_v7 = vpop.permute.xlu0 %1541 }
 0x869   : >> { %v1546_v9 = vmul.f32 %v2771_v6, %v1542_v7 }
 0x86b   : >> { %v1547_v10 = vpack.c.bf16 %v1546_v9, %v1545_v8 }
 0x86d   : >> { %2397 = vmatmul.msk.bf16.vlgmr.msrb.gmra.mxu0 %vm594_vm3, %v1547_v10 }
 0x8ea   : >> { %v1573_v14 = vpop.f32.mrf.mxu0 }
 0x8eb   : >> { %v1574_v15 = vadd.f32 %v1573_v14, %v1559_v13 }
 0x8ed   : >> { %v1578_v16 = vadd.f32 %v3090_v38, %v1574_v15  ;;  %v1582_v18 = vadd.f32 %v3082_v50, %v1574_v15  }
 0x8ef   : >> { %v1580_v38 = vmul.f32 %v1578_v16, %v3323_v36   ;;  %v3789_v50 = vmov %v1582_v18  ;;  %v1584_v23 = vmul.f32 (%p1345_p9), %v1582_v18, %v3323_v36 }
 0x8f0   : > { %v2405_v38 = vld [vmem:[%s3769_s4 + $0x6] sm:$0x3] (%p1345_p9) }
 0x8f2   : >> { %v1575_v19 = vpop.f32.mrf.mxu0 }
 0x8f3   : >> { %v1576_v20 = vadd.f32 %v1575_v19, %v1559_v13  ;;  %1347 = sbr.rel (!%p1345_p9) target bundleno = 1859 (0x743), region = 210 }
 0x8f5   : >> { %v1579_v21 = vadd.f32 %v3086_v41, %v1576_v20  ;;  %v1583_v22 = vadd.f32 %v3078_v45, %v1576_v20  }
 0x8f7   : >> { %v1581_v41 = vmul.f32 %v1579_v21, %v3328_v48   ;;  %v3788_v45 = vmov %v1583_v22  ;;  %v1585_v25 = vmul.f32 (%p1345_p9), %v1583_v22, %v3328_v48 }
 0x8f8   : > { %v1637_v41 = vsel %vm695_vm0, %v2405_v38, 0 }
 0x8f9   : > { %v1586_v27 = vpack.c.bf16 %v1585_v25, %v1584_v23  ;;  %1646 = vmatpush.bf16.msra.mxu1 %v1637_v41 }
 0x8fb   : > { %1591 = vrot.lane.b32.xlu0 %v1586_v27, %s3129_s17 }
 0x903   : > { %1599 = vrot.lane.b32.xlu0 %v3549_v12, %s3129_s17 }
 0x96d   : > { %v1592_v28 = vpop.permute.xlu0 %1591 }
 0x96e   : > { %2404 = vmatmul.msk.bf16.vlgmr.msra.gmra.mxu0 %vm594_vm3, %v1592_v28 }
 0x975   : > { %v1600_v50 = vpop.permute.xlu0 %1599 }
 0x9eb   : > { %v1614_v45 = vpop.f32.mrf.mxu0 }
 0x9ec   : > { %v1615_v29 = vadd.f32 %v1614_v45, %v1600_v50 }
 0x9ee   : > { %v1619_v51 = vmul.f32 %v1615_v29, %v3323_v36 }
 0x9f0   : > { %v3651_v34 = vadd.f32 %v1621_v46, %v1619_v51 }
 0x9f3   : > { %v1616_v57 = vpop.f32.mrf.mxu0 }
 0x9f4   : > { %v1617_v12 = vadd.f32 %v1616_v57, %v1600_v50 }
 0x9f6   : > { %v1620_v53 = vmul.f32 %v1617_v12, %v3328_v48 }
 0x9f8   : > { %v3653_v58 = vadd.f32 %v1622_v52, %v1620_v53 }
 0x9fa   : > { %v1627_v11 = vpack.c.bf16 %v3653_v58, %v3651_v34 }
 0x9fc   : > { %2406 = vmatmul.msk.bf16.vlgmr.msra.gmra.mxu1 %vm691_vm2, %v1627_v11 }
 0xa79   : > { %v1648_v39 = vpop.f32.mrf.mxu1 }
 0xa7a   : > { %v1649_v31 = vadd.f32 %v3658_v30, %v1648_v39 }
 0xa7c   : > { %v1653_v33 = vmul.f32 %v1649_v31, %v3323_v36  }
 0xa81   : > { %v1650_v35 = vpop.f32.mrf.mxu1 }
 0xa82   : > { %v1651_v40 = vadd.f32 %v3658_v30, %v1650_v35 }
 0xa84   : > { %v1654_v37 = vmul.f32 %v1651_v40, %v3328_v48  }
 0xa85 LB: >> { %s2408_s16 = sshll.u32 %s3114_s13, 3  ;;  %s2056_s20 = smul.u32 24, %s3114_s13  ;;  %v1701_v47 = vrot.slane %v3110_v33, 7  ;;  %v1702_v49 = vrot.slane %v3106_v37, 7  ;;  %v1771_v54 = vrot.slane %v3110_v33, 1  ;;  %v1772_v55 = vrot.slane %v3106_v37, 1  ;;  %s3114_s13 = sphi %s3672_s13, %s1660_s13   ;;  %v3110_v33 = vphi %v1653_v33, %v1892_v33   ;;  %v3106_v37 = vphi %v1654_v37, %v1893_v37   ;;  %v3102_v44 = vphi %v3666_v44, %v3791_v44   ;;  %v3098_v42 = vphi %v3664_v42, %v3790_v42  }
 0xa86   : >> { %s2054_s26 = scalar_lea.vmem %s3772_s7, %s2408_s16  ;;  %s2051_s14 = scalar_lea.vmem [#allocation7], %s3114_s13  ;;  %v1739_v5 = vpack.c.bf16 %v3106_v37, %v3110_v33 }
 0xa87   : >> { %v2486_v59 = vld [vmem:[%s2054_s26 + $0x30] sm:$0xff]  ;;  %v1703_v60 = vsel %vm580_vm5, %v1701_v47, %v1702_v49  ;;  %v1704_v61 = vsel %vm580_vm5, %v1702_v49, %v1701_v47  ;;  %s2057_s19 = scalar_lea.vmem [#allocation6], %s2056_s20  ;;  %v1773_v3 = vsel %vm648_vm6, %v1771_v54, %v1772_v55  ;;  %v1774_v4 = vsel %vm648_vm6, %v1772_v55, %v1771_v54  ;;  %v2773_v9 = vld [vmem:[%s2051_s14 + $0x6] ss:$0 sm:$0xff]  ;;  %s2068_s29 = scalar_lea.vmem %s3774_s9, %s2408_s16 }
 0xa88   : >> { %v2487_v62 = vld [vmem:[%s2057_s19 + $0x90] sm:$0xff]  ;;  %v2488_v63 = vld [vmem:[%s2057_s19 + $0x98] sm:$0xff]  ;;  %v2489_v0 = vld [vmem:[%s2057_s19 + $0xa0] sm:$0xff]  ;;  %v1705_v2 = vmul.f32 %v3298_v17, %v1704_v61  ;;  %1689 = vmatpush.bf16.msra.mxu0 %v2486_v59  ;;  %v1776_v6 = vmul.f32 %v3304_v24, %v1774_v4  ;;  %s3135_s30 = smov 112   ;;  %s3136_s25 = smov 96  }
 0xa89   : >> { %1730 = vmatpush.bf16.msra.mxu1 %v2487_v62  ;;  %1762 = vmatpush.bf16.msra.mxu2 %v2488_v63  ;;  %v2490_v38 = vld [vmem:[%s2068_s29 + $0x30] sm:$0xff]  ;;  %s1660_s13 = sadd.s32 1, %s3114_s13  }
 0xa8a   : >> { %v1707_v7 = vpack.c.bf16 %v1703_v60, %v1705_v2  ;;  %1800 = vmatpush.bf16.msra.mxu3 %v2489_v0  ;;  %v1777_v8 = vpack.c.bf16 %v1776_v6, %v1773_v3  ;;  %1870 = vrot.lane.b32.xlu1 %v2773_v9, %s3136_s25  ;;  %p1657_p10 = scmp.ge.s32.totalorder %s1660_s13, 2  }
 0xa8b   : >> { %2415 = vmatmul.msk.bf16.vlgmr.msra.gmra.mxu0 %vm594_vm3, %v3331_v56  ;;  %s3137_s24 = smov (%p1657_p10), 4   ;;  %vm1947_vm5 = vcmask (%p1657_p10), 64512  }
 0xa8c   : >> { %2422 = vmatmul.msk.bf16.vlgmr.msra.gmra.mxu1 %vm594_vm3, %v1707_v7  ;;  %2430 = vmatmul.msk.bf16.vlgmr.msra.gmra.mxu2 %vm594_vm3, %v1739_v5 }
 0xa8d   : >> { %2438 = vmatmul.msk.bf16.vlgmr.msra.gmra.mxu3 %vm594_vm3, %v1777_v8  ;;  %1883 = vmatpush.bf16.msrb.mxu0 %v2490_v38 }
 0xa92   : > { %1939 = vrot.lane.b32.xlu1 (%p1657_p10), %v3651_v34, %s3137_s24  ;;  %v1933_v34 = vmul.f32 (%p1657_p10), %v3541_v43, %v3323_v36 }
 0xa9a   : > { %1941 = vrot.lane.b32.xlu1 (%p1657_p10), %v3653_v58, %s3137_s24 }
 0xb08   : >> { %v1691_v10 = vpop.f32.mrf.mxu0 }
 0xb09   : >> { %v1699_v13 = vadd.f32 %v2773_v9, %v1691_v10  ;;  %v1732_v14 = vpop.f32.mrf.mxu1 }
 0xb0b   : >> { %v1737_v15 = vadd.f32 %v1732_v14, %v1699_v13  ;;  %v1871_v13 = vpop.permute.xlu1 %1870 }
 0xb0f   : >> { %v1764_v16 = vpop.f32.mrf.mxu2 }
 0xb10   : >> { %v1769_v18 = vadd.f32 %v1764_v16, %v1737_v15  ;;  %v1802_v19 = vpop.f32.mrf.mxu3  ;;  %v1693_v20 = vpop.f32.mrf.mxu0 }
 0xb11   : >> { %v1700_v22 = vadd.f32 %v2773_v9, %v1693_v20  ;;  %v1734_v23 = vpop.f32.mrf.mxu1 }
 0xb12   : >> { %v1807_v21 = vadd.f32 %v1802_v19, %v1769_v18 }
 0xb13   : >> { %v1738_v26 = vadd.f32 %v1734_v23, %v1700_v22 }
 0xb14   : >> { %v2439_v25 = vmul.f32 -1.442695, %v1807_v21 }
 0xb16   : >> { %2774 = vpow2.f32 %v2439_v25 }
 0xb17   : >> { %v1766_v27 = vpop.f32.mrf.mxu2 }
 0xb18   : >> { %v1770_v28 = vadd.f32 %v1766_v27, %v1738_v26  ;;  %v1804_v41 = vpop.f32.mrf.mxu3  ;;  %v2491_v26 = vld [vmem:[%s3770_s5 + $0x18] sm:$0xff] (%p1657_p10) }
 0xb19   : > { %1924 = vmatpush.bf16.msra.mxu0 (%p1657_p10), %v2491_v26 }
 0xb1a   : >> { %v1808_v45 = vadd.f32 %v1804_v41, %v1770_v28  ;;  %v1934_v28 = vmul.f32 (%p1657_p10), %v3544_v32, %v3328_v48 }
 0xb1c   : >> { %v2775_v50 = vpop.eup %2774  ;;  %v2440_v29 = vmul.f32 -1.442695, %v1808_v45 }
 0xb1d   : >> { %v1817_v57 = vadd.f32 1.0, %v2775_v50 }
 0xb1e   : >> { %2776 = vpow2.f32 %v2440_v29 }
 0xb1f   : >> { %2778 = vrcp.f32 %v1817_v57  ;;  %v1830_v11 = vand.u32 2147483648, %v1817_v57  ;;  %v1828_v31 = vand.u32 2147483647, %v1817_v57  ;;  %vm1824_vm9 = vweird.f32 %v1817_v57 }
 0xb21   : >> { %v1831_v47 = vor.u32 1.1754944e-38, %v1830_v11  ;;  %vm1829_vm11 = vcmp.eq.f32.partialorder %v1828_v31, 8.507059e+37 }
 0xb24   : >> { %v2777_v46 = vpop.eup %2776 }
 0xb25   : >> { %v2779_v51 = vpop.eup %2778  ;;  %v1818_v12 = vadd.f32 1.0, %v2777_v46 }
 0xb26   : >> { %v1820_v52 = vmul.f32 %v2779_v51, %v1817_v57  ;;  %vm1825_vm0 = vweird.f32 %v2779_v51 }
 0xb27   : >> { %2780 = vrcp.f32 %v1818_v12  ;;  %vm1826_vm10 = vmor %vm1824_vm9, %vm1825_vm0  ;;  %v1845_v60 = vand.u32 2147483648, %v1818_v12  ;;  %v1843_v62 = vand.u32 2147483647, %v1818_v12  ;;  %vm1839_vm13 = vweird.f32 %v1818_v12 }
 0xb28   : >> { %v1821_v53 = vsub.f32 1.0, %v1820_v52  ;;  %2782 = vtanh.f32 %v1807_v21 }
 0xb29   : >> { %v1846_v0 = vor.u32 1.1754944e-38, %v1845_v60  ;;  %vm1844_vm15 = vcmp.eq.f32.partialorder %v1843_v62, 8.507059e+37  ;;  %2784 = vtanh.f32 %v1808_v45 }
 0xb2a   : >> { %v1822_v39 = vmul.f32 %v2779_v51, %v1821_v53 }
 0xb2c   : >> { %v1823_v35 = vadd.f32 %v2779_v51, %v1822_v39 }
 0xb2d   : >> { %v2781_v40 = vpop.eup %2780 }
 0xb2e   : >> { %v1827_v49 = vsel %vm1826_vm10, %v2779_v51, %v1823_v35  ;;  %v1835_v54 = vmul.f32 %v2781_v40, %v1818_v12  ;;  %vm1840_vm12 = vweird.f32 %v2781_v40  ;;  %v2783_v5 = vpop.eup %2782 }
 0xb2f   : >> { %v1832_v55 = vsel %vm1829_vm11, %v1831_v47, %v1827_v49  ;;  %vm1841_vm14 = vmor %vm1839_vm13, %vm1840_vm12  ;;  %v2785_v6 = vpop.eup %2784 }
 0xb30   : >> { %1851 = vrot.lane.b32.xlu0 %v1832_v55, %s3135_s30  ;;  %v1836_v59 = vsub.f32 1.0, %v1835_v54 }
 0xb32   : >> { %v1837_v61 = vmul.f32 %v2781_v40, %v1836_v59 }
 0xb34   : >> { %v1838_v63 = vadd.f32 %v2781_v40, %v1837_v61 }
 0xb36   : >> { %v1842_v2 = vsel %vm1841_vm14, %v2781_v40, %v1838_v63 }
 0xb37   : >> { %v1847_v3 = vsel %vm1844_vm15, %v1846_v0, %v1842_v2 }
 0xb38   : >> { %1853 = vrot.lane.b32.xlu0 %v1847_v3, %s3135_s30 }
 0xba2   : >> { %v1852_v4 = vpop.permute.xlu0 %1851 }
 0xba3   : >> { %v1857_v8 = vmul.f32 %v2783_v5, %v1852_v4 }
 0xbaa   : >> { %v1854_v7 = vpop.permute.xlu0 %1853 }
 0xbab   : >> { %v1858_v9 = vmul.f32 %v2785_v6, %v1854_v7 }
 0xbad   : >> { %v1859_v10 = vpack.c.bf16 %v1858_v9, %v1857_v8 }
 0xbaf   : >> { %2448 = vmatmul.msk.bf16.vlgmr.msrb.gmra.mxu0 %vm594_vm3, %v1859_v10 }
 0xc2c   : >> { %v1885_v14 = vpop.f32.mrf.mxu0 }
 0xc2d   : >> { %v1886_v15 = vadd.f32 %v1885_v14, %v1871_v13 }
 0xc2f   : >> { %v1890_v16 = vadd.f32 %v3110_v33, %v1886_v15  ;;  %v1894_v18 = vadd.f32 %v3102_v44, %v1886_v15  }
 0xc31   : >> { %v1892_v33 = vmul.f32 %v1890_v16, %v3323_v36   ;;  %v3791_v44 = vmov %v1894_v18  ;;  %v1896_v23 = vmul.f32 (%p1657_p10), %v1894_v18, %v3323_v36 }
 0xc32   : > { %v1940_v33 = vpop.permute.xlu1 (%p1657_p10), %1939 }
 0xc34   : >> { %v1887_v19 = vpop.f32.mrf.mxu0 }
 0xc35   : >> { %v1888_v20 = vadd.f32 %v1887_v19, %v1871_v13  ;;  %1659 = sbr.rel (!%p1657_p10) target bundleno = 2693 (0xa85), region = 221 }
 0xc37   : >> { %v1891_v21 = vadd.f32 %v3106_v37, %v1888_v20  ;;  %v1895_v22 = vadd.f32 %v3098_v42, %v1888_v20  }
 0xc39   : >> { %v1893_v37 = vmul.f32 %v1891_v21, %v3328_v48   ;;  %v3790_v42 = vmov %v1895_v22  ;;  %v1897_v25 = vmul.f32 (%p1657_p10), %v1895_v22, %v3328_v48 }
 0xc3a   : > { %v1942_v41 = vpop.permute.xlu1 %1941 }
 0xc3b   : > { %v1898_v27 = vpack.c.bf16 %v1897_v25, %v1896_v23 }
 0xc3d   : > { %1903 = vrot.lane.b32.xlu0 %v1898_v27, %s3129_s17 }
 0xc45   : > { %1911 = vrot.lane.b32.xlu0 %v3658_v30, %s3129_s17 }
 0xcaf   : > { %v1904_v1 = vpop.permute.xlu0 %1903 }
 0xcb0   : > { %2455 = vmatmul.msk.bf16.vlgmr.msra.gmra.mxu0 %vm594_vm3, %v1904_v1 }
 0xcb7   : > { %v1912_v17 = vpop.permute.xlu0 %1911 }
 0xd2d   : > { %v1926_v24 = vpop.f32.mrf.mxu0 }
 0xd2e   : > { %v1927_v56 = vadd.f32 %v1926_v24, %v1912_v17 }
 0xd30   : > { %v1931_v37 = vmul.f32 %v1927_v56, %v3323_v36 }
 0xd32   : > { %v1935_v42 = vadd.f32 %v1933_v34, %v1931_v37 }
 0xd34   : > { %v1945_v58 = vsel %vm691_vm2, %v1935_v42, %v1940_v33 }
 0xd35   : > { %1948 = vst.msk [vmem:[%s3277_s23] sm:$0xff] %vm1947_vm5, %v1945_v58  ;;  %v1928_v44 = vpop.f32.mrf.mxu0 }
 0xd36   : > { %v1929_v30 = vadd.f32 %v1928_v44, %v1912_v17 }
 0xd38   : > { %v1932_v38 = vmul.f32 %v1929_v30, %v3328_v48 }
 0xd3a   : > { %v1936_v45 = vadd.f32 %v1934_v28, %v1932_v38 }
 0xd3c   : > { %v1946_v50 = vsel %vm691_vm2, %v1936_v45, %v1942_v41 }
 0xd3d   : > { %1949 = vst.msk [vmem:[%s3277_s23 + $0x8] sm:$0xff] %vm1947_vm5, %v1946_v50 }
 0xd3e PF: > { %s25_s21 = sadd.s32 1, %s3034_s21  }
 0xd3f   : > { %p22_p11 = scmp.ge.s32.totalorder %s25_s21, 4  }
 0xd41   :  { %24 = sbr.rel (!%p22_p11) target bundleno = 6 (0x6), region = 232 }
 0xd46   :  { %1971 = vsyncpa [#allocation3], 1 }
 0xd47   :  { %1973 = vsyncpa [#allocation3 + $0x1], 1 }
 0xd48   :  { %1974 = vsyncpa [#allocation5], 1 }
 0xd49   :  { %1975 = vsyncpa [#allocation8], 1 }

</bundles_post_ra>
